<compile_context>
chip_gen: v6e
topology: v6e:2x2x1
jax: 0.10.0
libtpu: 0.0.40
codegen_flags: <defaults>
</compile_context>

<pallas_src>
import jax
import jax.numpy as jnp
from jax.experimental import pallas as pl
from jax.experimental.pallas import tpu as pltpu


def _round_up(x, m):
    return (x + m - 1) // m * m


def double_conv_kernel(p1_ref, w1_ref, b1_ref, w2_ref, b2_ref, out_ref, midw_ref):
    # p1_ref  : (1, H*W, K1pad)    bf16  conv1 im2col patch (zero-padded K)
    # w1_ref  : (K1pad, Cpad)      bf16  conv1 weights, K = 9*Cin (zero-padded)
    # b1_ref  : (1, Cpad)          f32
    # w2_ref  : (3, 3*Cpad, Cpad)  bf16  conv2 weights, kw folded into K
    # b2_ref  : (1, Cpad)          f32
    # out_ref : (1, Cout8, H*W)    bf16  channel-major output tile
    # midw_ref: (H+2, W, 3*Cpad)   bf16  conv1 act., kw-shifted copies at lane
    #                                    offsets 0/Cpad/2*Cpad, 1-row halo
    Hp2, W, C3 = midw_ref.shape
    H = Hp2 - 2
    Cpad = C3 // 3
    HW = out_ref.shape[2]
    Cout8 = out_ref.shape[1]
    bf16 = jnp.bfloat16

    # Zero only the halo cells (O(perimeter)); interiors are fully overwritten.
    # Re-done every step: the batch axis is "parallel" and may be sharded
    # across TensorCores, so no core can rely on having run step 0.
    midw_ref[0:1, :, :] = jnp.zeros((1, W, C3), bf16)
    midw_ref[H + 1:H + 2, :, :] = jnp.zeros((1, W, C3), bf16)
    midw_ref[:, 0:1, 0:Cpad] = jnp.zeros((Hp2, 1, Cpad), bf16)                     # kw=0 left pad
    midw_ref[:, W - 1:W, 2 * Cpad:3 * Cpad] = jnp.zeros((Hp2, 1, Cpad), bf16)      # kw=2 right pad

    # ---- conv1: one (H*W, K1pad) x (K1pad, Cpad) MXU dot; f32 accumulate,
    # bias + ReLU fused, single bf16 cast.
    a1 = jnp.dot(p1_ref[0], w1_ref[...], preferred_element_type=jnp.float32)
    h1 = jnp.maximum(a1 + b1_ref[...], 0.0).astype(bf16).reshape(H, W, Cpad)

    # Scatter h1 once into the widened mid buffer: lane group kw holds the
    # kw-shifted copy, so conv2's per-kh patch is one contiguous lane-aligned
    # slab (no concat, no cast on the conv2 critical path).
    midw_ref[1:1 + H, :, Cpad:2 * Cpad] = h1                            # kw = 1 (center)
    midw_ref[1:1 + H, 1:W, 0:Cpad] = h1[:, 0:W - 1, :]                  # kw = 0
    midw_ref[1:1 + H, 0:W - 1, 2 * Cpad:3 * Cpad] = h1[:, 1:W, :]       # kw = 2

    # ---- conv2: three back-to-back K=3*Cpad dots accumulated as a live f32
    # value (no VMEM accumulator round trips; MRB-accumulable on v7x).
    acc = None
    for kh in range(3):
        patch = midw_ref[kh:kh + H, :, :].reshape(HW, C3)
        d = jnp.dot(patch, w2_ref[kh], preferred_element_type=jnp.float32)
        acc = d if acc is None else acc + d

    y = jnp.maximum(acc + b2_ref[...], 0.0)                 # (H*W, Cpad) f32
    # XLU transpose -> channel-major; channel slice happens here + in out_spec.
    out_ref[0] = y.T[:Cout8, :].astype(out_ref.dtype)


def double_convolution_nhwc(x_nhwc, w1, b1, w2, b2):
    """Fused conv3x3+ReLU+conv3x3+ReLU. x: (N,H,W,Cin); weights HWIO.
    Returns (N, Cout, H, W), bf16 (f32 accumulation inside)."""
    N, H, W, Cin = x_nhwc.shape
    Cout = w1.shape[-1]
    Cpad = _round_up(Cout, 128)   # lane-pad channels: unmasked stores, full MXU N
    Cout8 = _round_up(Cout, 8)    # sublane-align the channel-major output slab
    K1 = 9 * Cin
    K1pad = _round_up(K1, 128)
    bf16 = jnp.bfloat16

    # conv1 im2col built wrapper-side (one XLA pass, fuses the layout change):
    # row (i*W + j) holds the 3x3xCin neighborhood of pixel (i, j), tap-major.
    xp = jnp.pad(x_nhwc.astype(bf16), ((0, 0), (1, 1), (1, 1), (0, 0)))
    taps = [xp[:, kh:kh + H, kw:kw + W, :] for kh in range(3) for kw in range(3)]
    p1 = jnp.concatenate(taps, axis=-1).reshape(N, H * W, K1)
    if K1pad != K1:
        p1 = jnp.pad(p1, ((0, 0), (0, 0), (0, K1pad - K1)))

    w1p = jnp.zeros((K1pad, Cpad), bf16).at[:K1, :Cout].set(
        w1.astype(bf16).reshape(K1, Cout))
    b1p = jnp.zeros((1, Cpad), jnp.float32).at[0, :Cout].set(b1.astype(jnp.float32))
    # conv2: pad channels to Cpad, fold kw into K -> (3, 3*Cpad, Cpad), matching
    # the lane order of the widened mid buffer (kw-major, cin within each group).
    w2p = jnp.zeros((3, 3, Cpad, Cpad), bf16).at[:, :, :Cout, :Cout].set(w2.astype(bf16))
    w2p = w2p.reshape(3, 3 * Cpad, Cpad)
    b2p = jnp.zeros((1, Cpad), jnp.float32).at[0, :Cout].set(b2.astype(jnp.float32))

    # Actual VMEM footprint (double-buffered I/O + weights + scratch), 2x margin,
    # capped well below the 64 MiB physical VMEM of a v7x TensorCore.
    p1_blk = H * W * K1pad * 2
    out_blk = Cout8 * H * W * 2
    wgt = (K1pad * Cpad + 9 * Cpad * Cpad) * 2 + 2 * Cpad * 4
    mid = (H + 2) * W * 3 * Cpad * 2
    footprint = 2 * (p1_blk + out_blk) + 2 * wgt + mid
    vmem_limit = int(min(max(2 * footprint, 4 * 1024 * 1024), 48 * 1024 * 1024))

    out = pl.pallas_call(
        double_conv_kernel,
        out_shape=jax.ShapeDtypeStruct((N, Cout8, H * W), bf16),
        grid_spec=pltpu.PrefetchScalarGridSpec(
            num_scalar_prefetch=0,
            grid=(N,),
            in_specs=[
                pl.BlockSpec((1, H * W, K1pad), lambda n: (n, 0, 0)),
                # Loop-invariant operands: constant index_maps -> no per-step re-DMA.
                pl.BlockSpec((K1pad, Cpad), lambda n: (0, 0)),
                pl.BlockSpec((1, Cpad), lambda n: (0, 0)),
                pl.BlockSpec((3, 3 * Cpad, Cpad), lambda n: (0, 0, 0)),
                pl.BlockSpec((1, Cpad), lambda n: (0, 0)),
            ],
            out_specs=pl.BlockSpec((1, Cout8, H * W), lambda n: (n, 0, 0)),
            scratch_shapes=[pltpu.VMEM((H + 2, W, 3 * Cpad), bf16)],
        ),
        compiler_params=pltpu.CompilerParams(
            dimension_semantics=("parallel",),
            vmem_limit_bytes=vmem_limit,
        ),
    )(p1, w1p, b1p, w2p, b2p)

    # Free reshape: the kernel already emitted channel-major (Cout8, H*W) tiles.
    return out[:, :Cout, :].reshape(N, Cout, H, W)


def double_convolution(x_nchw, params):
    """PyTorch-style entry point: NCHW in / NCHW out (weights stored HWIO)."""
    x_nhwc = jnp.transpose(x_nchw, (0, 2, 3, 1))   # fuses into the im2col pass
    return double_convolution_nhwc(x_nhwc, params["w1"], params["b1"],
                                   params["w2"], params["b2"])


def ref_double_convolution(x_nchw, params):
    """Pure-JAX f32 reference (lax conv) for correctness checking."""
    dn = ("NCHW", "HWIO", "NCHW")
    y = jax.lax.conv_general_dilated(x_nchw, params["w1"], (1, 1), "SAME",
                                     dimension_numbers=dn)
    y = jax.nn.relu(y + params["b1"].reshape(1, -1, 1, 1))
    y = jax.lax.conv_general_dilated(y, params["w2"], (1, 1), "SAME",
                                     dimension_numbers=dn)
    return jax.nn.relu(y + params["b2"].reshape(1, -1, 1, 1))


def init_params(key, in_channels, out_channels):
    k1, k2, k3, k4 = jax.random.split(key, 4)
    w1 = jax.random.normal(k1, (3, 3, in_channels, out_channels), jnp.float32) * 0.05
    b1 = jax.random.normal(k2, (out_channels,), jnp.float32) * 0.01
    w2 = jax.random.normal(k3, (3, 3, out_channels, out_channels), jnp.float32) * 0.05
    b2 = jax.random.normal(k4, (out_channels,), jnp.float32) * 0.01
    return {"w1": w1, "b1": b1, "w2": w2, "b2": b2}


if __name__ == "__main__":
    in_channels, out_channels = 3, 64        # first UNet DoubleConvolution block
    N, H, W = 2, 16, 16                      # M = H*W = 256 rows per matmul

    key = jax.random.PRNGKey(0)
    kx, kp = jax.random.split(key)
    params = init_params(kp, in_channels, out_channels)
    x = jax.random.normal(kx, (N, in_channels, H, W), jnp.float32)

    out = double_convolution(x, params)
    out = jax.block_until_ready(out)
    assert out.shape == (N, out_channels, H, W), out.shape

    ref = ref_double_convolution(x, params)
    out_f32 = out.astype(jnp.float32)
    err = float(jnp.max(jnp.abs(out_f32 - ref)))
    assert jnp.allclose(out_f32, ref, atol=3e-2, rtol=3e-2), f"max abs err {err}"

    print("KERNEL_OK")
</pallas_src>

<mosaic_0001>
module attributes {stable_mosaic.version = 11 : i64} {
  func.func @double_conv_kernel(%arg0: i32, %arg1: memref<1x256x128xbf16, #tpu.memory_space<vmem>>, %arg2: memref<128x128xbf16, #tpu.memory_space<vmem>>, %arg3: memref<1x128xf32, #tpu.memory_space<vmem>>, %arg4: memref<3x384x128xbf16, #tpu.memory_space<vmem>>, %arg5: memref<1x128xf32, #tpu.memory_space<vmem>>, %arg6: memref<1x64x256xbf16, #tpu.memory_space<vmem>>, %arg7: memref<18x16x384xbf16, #tpu.memory_space<vmem>>) attributes {dimension_semantics = [#tpu.dimension_semantics<parallel>], iteration_bounds = array<i64: 2>, scalar_prefetch = 0 : i64, scratch_operands = 1 : i64, tpu.core_type = #tpu.core_type<tc>, window_params = [{transform_indices = @transform_0, window_bounds = array<i64: 1, 256, 128>}, {pipeline_mode = #tpu.pipeline_mode<synchronous>, transform_indices = @transform_1, window_bounds = array<i64: 128, 128>}, {pipeline_mode = #tpu.pipeline_mode<synchronous>, transform_indices = @transform_2, window_bounds = array<i64: 1, 128>}, {pipeline_mode = #tpu.pipeline_mode<synchronous>, transform_indices = @transform_3, window_bounds = array<i64: 3, 384, 128>}, {pipeline_mode = #tpu.pipeline_mode<synchronous>, transform_indices = @transform_4, window_bounds = array<i64: 1, 128>}, {transform_indices = @transform_5, window_bounds = array<i64: 1, 64, 256>}]} {
    %cst = arith.constant 0.000000e+00 : bf16
    %0 = vector.broadcast %cst : bf16 to vector<1x16x384xbf16>
    %c0 = arith.constant 0 : index
    %c0_0 = arith.constant 0 : index
    %c0_1 = arith.constant 0 : index
    %1 = vector.load %arg7[%c0, %c0_0, %c0_1] : memref<18x16x384xbf16, #tpu.memory_space<vmem>>, vector<1x16x384xbf16>
    tpu.vector_store %arg7[%c0, %c0_0, %c0_1], %0 {strides = array<i32>} : memref<18x16x384xbf16, #tpu.memory_space<vmem>>, vector<1x16x384xbf16>,
    %cst_2 = arith.constant 0.000000e+00 : bf16
    %2 = vector.broadcast %cst_2 : bf16 to vector<1x16x384xbf16>
    %c17 = arith.constant 17 : index
    %c0_3 = arith.constant 0 : index
    %c0_4 = arith.constant 0 : index
    %3 = vector.load %arg7[%c17, %c0_3, %c0_4] : memref<18x16x384xbf16, #tpu.memory_space<vmem>>, vector<1x16x384xbf16>
    tpu.vector_store %arg7[%c17, %c0_3, %c0_4], %2 {strides = array<i32>} : memref<18x16x384xbf16, #tpu.memory_space<vmem>>, vector<1x16x384xbf16>,
    %cst_5 = arith.constant 0.000000e+00 : bf16
    %4 = vector.broadcast %cst_5 : bf16 to vector<18x1x128xbf16>
    %c0_6 = arith.constant 0 : index
    %c0_7 = arith.constant 0 : index
    %c0_8 = arith.constant 0 : index
    %5 = vector.load %arg7[%c0_6, %c0_7, %c0_8] : memref<18x16x384xbf16, #tpu.memory_space<vmem>>, vector<18x1x128xbf16>
    tpu.vector_store %arg7[%c0_6, %c0_7, %c0_8], %4 {strides = array<i32>} : memref<18x16x384xbf16, #tpu.memory_space<vmem>>, vector<18x1x128xbf16>,
    %cst_9 = arith.constant 0.000000e+00 : bf16
    %6 = vector.broadcast %cst_9 : bf16 to vector<18x1x128xbf16>
    %c0_10 = arith.constant 0 : index
    %c15 = arith.constant 15 : index
    %c256 = arith.constant 256 : index
    %7 = vector.load %arg7[%c0_10, %c15, %c256] : memref<18x16x384xbf16, #tpu.memory_space<vmem>>, vector<18x1x128xbf16>
    tpu.vector_store %arg7[%c0_10, %c15, %c256], %6 {strides = array<i32>} : memref<18x16x384xbf16, #tpu.memory_space<vmem>>, vector<18x1x128xbf16>,
    %c0_11 = arith.constant 0 : index
    %c0_12 = arith.constant 0 : index
    %c0_13 = arith.constant 0 : index
    %8 = vector.load %arg1[%c0_11, %c0_12, %c0_13] : memref<1x256x128xbf16, #tpu.memory_space<vmem>>, vector<1x256x128xbf16>
    %9 = vector.shape_cast %8 : vector<1x256x128xbf16> to vector<256x128xbf16>
    %c0_14 = arith.constant 0 : index
    %c0_15 = arith.constant 0 : index
    %10 = vector.load %arg2[%c0_14, %c0_15] : memref<128x128xbf16, #tpu.memory_space<vmem>>, vector<128x128xbf16>
    %cst_16 = arith.constant dense<0.000000e+00> : vector<256x128xf32>
    %11 = tpu.matmul %9, %10, %cst_16 {dimension_numbers = #tpu.dot_dimension_numbers<[1], [0], [0], [1], [0, 0, 1, 1], [], []>} : vector<256x128xbf16>, vector<128x128xbf16>, vector<256x128xf32> -> vector<256x128xf32>
    %c0_17 = arith.constant 0 : index
    %c0_18 = arith.constant 0 : index
    %12 = vector.load %arg3[%c0_17, %c0_18] : memref<1x128xf32, #tpu.memory_space<vmem>>, vector<1x128xf32>
    %13 = vector.broadcast %12 : vector<1x128xf32> to vector<256x128xf32>
    %14 = arith.addf %11, %13 : vector<256x128xf32>
    %cst_19 = arith.constant 0.000000e+00 : f32
    %15 = vector.broadcast %cst_19 : f32 to vector<256x128xf32>
    %16 = arith.maximumf %14, %15 : vector<256x128xf32>
    %17 = arith.truncf %16 : vector<256x128xf32> to vector<256x128xbf16>
    %18 = vector.shape_cast %17 : vector<256x128xbf16> to vector<16x16x128xbf16>
    %c1 = arith.constant 1 : index
    %c0_20 = arith.constant 0 : index
    %c128 = arith.constant 128 : index
    %19 = vector.load %arg7[%c1, %c0_20, %c128] : memref<18x16x384xbf16, #tpu.memory_space<vmem>>, vector<16x16x128xbf16>
    tpu.vector_store %arg7[%c1, %c0_20, %c128], %18 {strides = array<i32>} : memref<18x16x384xbf16, #tpu.memory_space<vmem>>, vector<16x16x128xbf16>,
    %20 = vector.extract_strided_slice %18 {offsets = [0, 0, 0], sizes = [16, 15, 128], strides = [1, 1, 1]} : vector<16x16x128xbf16> to vector<16x15x128xbf16>
    %c1_21 = arith.constant 1 : index
    %c1_22 = arith.constant 1 : index
    %c0_23 = arith.constant 0 : index
    %21 = vector.load %arg7[%c1_21, %c1_22, %c0_23] : memref<18x16x384xbf16, #tpu.memory_space<vmem>>, vector<16x15x128xbf16>
    tpu.vector_store %arg7[%c1_21, %c1_22, %c0_23], %20 {strides = array<i32>} : memref<18x16x384xbf16, #tpu.memory_space<vmem>>, vector<16x15x128xbf16>,
    %22 = vector.extract_strided_slice %18 {offsets = [0, 1, 0], sizes = [16, 15, 128], strides = [1, 1, 1]} : vector<16x16x128xbf16> to vector<16x15x128xbf16>
    %c1_24 = arith.constant 1 : index
    %c0_25 = arith.constant 0 : index
    %c256_26 = arith.constant 256 : index
    %23 = vector.load %arg7[%c1_24, %c0_25, %c256_26] : memref<18x16x384xbf16, #tpu.memory_space<vmem>>, vector<16x15x128xbf16>
    tpu.vector_store %arg7[%c1_24, %c0_25, %c256_26], %22 {strides = array<i32>} : memref<18x16x384xbf16, #tpu.memory_space<vmem>>, vector<16x15x128xbf16>,
    %c0_27 = arith.constant 0 : index
    %c0_28 = arith.constant 0 : index
    %c0_29 = arith.constant 0 : index
    %24 = vector.load %arg7[%c0_27, %c0_28, %c0_29] : memref<18x16x384xbf16, #tpu.memory_space<vmem>>, vector<16x16x384xbf16>
    %25 = vector.shape_cast %24 : vector<16x16x384xbf16> to vector<256x384xbf16>
    %c0_30 = arith.constant 0 : index
    %c0_31 = arith.constant 0 : index
    %c0_32 = arith.constant 0 : index
    %26 = vector.load %arg4[%c0_30, %c0_31, %c0_32] : memref<3x384x128xbf16, #tpu.memory_space<vmem>>, vector<1x384x128xbf16>
    %27 = vector.shape_cast %26 : vector<1x384x128xbf16> to vector<384x128xbf16>
    %cst_33 = arith.constant dense<0.000000e+00> : vector<256x128xf32>
    %28 = tpu.matmul %25, %27, %cst_33 {dimension_numbers = #tpu.dot_dimension_numbers<[1], [0], [0], [1], [0, 0, 1, 1], [], []>} : vector<256x384xbf16>, vector<384x128xbf16>, vector<256x128xf32> -> vector<256x128xf32>
    %c1_34 = arith.constant 1 : index
    %c0_35 = arith.constant 0 : index
    %c0_36 = arith.constant 0 : index
    %29 = vector.load %arg7[%c1_34, %c0_35, %c0_36] : memref<18x16x384xbf16, #tpu.memory_space<vmem>>, vector<16x16x384xbf16>
    %30 = vector.shape_cast %29 : vector<16x16x384xbf16> to vector<256x384xbf16>
    %c1_37 = arith.constant 1 : index
    %c0_38 = arith.constant 0 : index
    %c0_39 = arith.constant 0 : index
    %31 = vector.load %arg4[%c1_37, %c0_38, %c0_39] : memref<3x384x128xbf16, #tpu.memory_space<vmem>>, vector<1x384x128xbf16>
    %32 = vector.shape_cast %31 : vector<1x384x128xbf16> to vector<384x128xbf16>
    %cst_40 = arith.constant dense<0.000000e+00> : vector<256x128xf32>
    %33 = tpu.matmul %30, %32, %cst_40 {dimension_numbers = #tpu.dot_dimension_numbers<[1], [0], [0], [1], [0, 0, 1, 1], [], []>} : vector<256x384xbf16>, vector<384x128xbf16>, vector<256x128xf32> -> vector<256x128xf32>
    %34 = arith.addf %28, %33 : vector<256x128xf32>
    %c2 = arith.constant 2 : index
    %c0_41 = arith.constant 0 : index
    %c0_42 = arith.constant 0 : index
    %35 = vector.load %arg7[%c2, %c0_41, %c0_42] : memref<18x16x384xbf16, #tpu.memory_space<vmem>>, vector<16x16x384xbf16>
    %36 = vector.shape_cast %35 : vector<16x16x384xbf16> to vector<256x384xbf16>
    %c2_43 = arith.constant 2 : index
    %c0_44 = arith.constant 0 : index
    %c0_45 = arith.constant 0 : index
    %37 = vector.load %arg4[%c2_43, %c0_44, %c0_45] : memref<3x384x128xbf16, #tpu.memory_space<vmem>>, vector<1x384x128xbf16>
    %38 = vector.shape_cast %37 : vector<1x384x128xbf16> to vector<384x128xbf16>
    %cst_46 = arith.constant dense<0.000000e+00> : vector<256x128xf32>
    %39 = tpu.matmul %36, %38, %cst_46 {dimension_numbers = #tpu.dot_dimension_numbers<[1], [0], [0], [1], [0, 0, 1, 1], [], []>} : vector<256x384xbf16>, vector<384x128xbf16>, vector<256x128xf32> -> vector<256x128xf32>
    %40 = arith.addf %34, %39 : vector<256x128xf32>
    %c0_47 = arith.constant 0 : index
    %c0_48 = arith.constant 0 : index
    %41 = vector.load %arg5[%c0_47, %c0_48] : memref<1x128xf32, #tpu.memory_space<vmem>>, vector<1x128xf32>
    %42 = vector.broadcast %41 : vector<1x128xf32> to vector<256x128xf32>
    %43 = arith.addf %40, %42 : vector<256x128xf32>
    %cst_49 = arith.constant 0.000000e+00 : f32
    %44 = vector.broadcast %cst_49 : f32 to vector<256x128xf32>
    %45 = arith.maximumf %43, %44 : vector<256x128xf32>
    %46 = tpu.transpose %45, [1, 0] : vector<256x128xf32> -> vector<128x256xf32>
    %47 = vector.extract_strided_slice %46 {offsets = [0, 0], sizes = [64, 256], strides = [1, 1]} : vector<128x256xf32> to vector<64x256xf32>
    %48 = arith.truncf %47 : vector<64x256xf32> to vector<64x256xbf16>
    %c0_50 = arith.constant 0 : index
    %c0_51 = arith.constant 0 : index
    %c0_52 = arith.constant 0 : index
    %49 = vector.load %arg6[%c0_50, %c0_51, %c0_52] : memref<1x64x256xbf16, #tpu.memory_space<vmem>>, vector<1x64x256xbf16>
    %50 = vector.shape_cast %49 : vector<1x64x256xbf16> to vector<64x256xbf16>
    %51 = vector.shape_cast %48 : vector<64x256xbf16> to vector<1x64x256xbf16>
    tpu.vector_store %arg6[%c0_50, %c0_51, %c0_52], %51 {strides = array<i32>} : memref<1x64x256xbf16, #tpu.memory_space<vmem>>, vector<1x64x256xbf16>,
    return
  }
  func.func @transform_0(%arg0: i32) -> (i32, i32, i32) {
    %c0_i32 = arith.constant 0 : i32
    %c0_i32_0 = arith.constant 0 : i32
    %c0_i32_1 = arith.constant 0 : i32
    return %arg0, %c0_i32, %c0_i32_0 : i32, i32, i32
  }
  func.func @transform_1(%arg0: i32) -> (i32, i32) {
    %c0_i32 = arith.constant 0 : i32
    %c0_i32_0 = arith.constant 0 : i32
    %c0_i32_1 = arith.constant 0 : i32
    return %c0_i32, %c0_i32_0 : i32, i32
  }
  func.func @transform_2(%arg0: i32) -> (i32, i32) {
    %c0_i32 = arith.constant 0 : i32
    %c0_i32_0 = arith.constant 0 : i32
    %c0_i32_1 = arith.constant 0 : i32
    return %c0_i32, %c0_i32_0 : i32, i32
  }
  func.func @transform_3(%arg0: i32) -> (i32, i32, i32) {
    %c0_i32 = arith.constant 0 : i32
    %c0_i32_0 = arith.constant 0 : i32
    %c0_i32_1 = arith.constant 0 : i32
    %c0_i32_2 = arith.constant 0 : i32
    return %c0_i32, %c0_i32_0, %c0_i32_1 : i32, i32, i32
  }
  func.func @transform_4(%arg0: i32) -> (i32, i32) {
    %c0_i32 = arith.constant 0 : i32
    %c0_i32_0 = arith.constant 0 : i32
    %c0_i32_1 = arith.constant 0 : i32
    return %c0_i32, %c0_i32_0 : i32, i32
  }
  func.func @transform_5(%arg0: i32) -> (i32, i32, i32) {
    %c0_i32 = arith.constant 0 : i32
    %c0_i32_0 = arith.constant 0 : i32
    %c0_i32_1 = arith.constant 0 : i32
    return %arg0, %c0_i32, %c0_i32_0 : i32, i32, i32
  }
}

</mosaic_0001>

<bundles_post_ra>
// kernel: tpu_custom_call.1
= control target key start
LH: loop header
LB: loop body
LE: loop exit
PB: predicated region body
PF: predicated region fallthrough
CT: control target
= control target key end

     0   :  { %10 = vsyncpa [#allocation4], 0  ;;  %s7034_s0 = inlined_call_operand.hbm [shape: bf16[2,256,128], index: 0, kind: input, shape index: {}]   ;;  %s7035_s1 = inlined_call_operand.hbm [shape: bf16[128,128], index: 1, kind: input, shape index: {}]   ;;  %s7036_s2 = inlined_call_operand.vmem [shape: f32[1,128], index: 2, kind: input, shape index: {}]   ;;  %s7037_s3 = inlined_call_operand.hbm [shape: bf16[3,384,128], index: 3, kind: input, shape index: {}]   ;;  %s7038_s4 = inlined_call_operand.vmem [shape: f32[1,128], index: 4, kind: input, shape index: {}]   ;;  %s7039_s5 = inlined_call_operand.hbm [shape: bf16[2,64,256], index: 5, kind: output, shape index: {}]  }
   0x1   :  { %12 = vsyncpa [#allocation4 + $0x1], 0 }
   0x2   :  { %13 = vsyncpa [#allocation7], 0 }
   0x3   :  { %14 = vsyncpa [#allocation5], 0 }
   0x4   :  { %16 = vsyncpa [#allocation5 + $0x1], 0  ;;  %s5931_s18 = smov 0   ;;  %s5933_s19 = smov 0  }
   0x5   :  { %s5935_s20 = smov 0   ;;  %s5937_s21 = smov 0  }
   0x6 LB: > { %s5952_s22 = sadd.s32 4294967295, %s5890_s21   ;;  %s4384_s23 = sadd.s32 4294967294, %s5890_s21   ;;  %s5890_s21 = sphi %s5937_s21, %s7074_s21   ;;  %s5886_s20 = sphi %s5935_s20, %s7073_s20   ;;  %s5882_s19 = sphi %s5933_s19, %s7072_s19   ;;  %s5878_s18 = sphi %s5931_s18, %s7071_s18  }
   0x7   : > { %p42_p0 = scmp.ne.s32.totalorder %s5882_s19, %s5878_s18  ;;  %p7040_p1 = scmp.eq.s32.totalorder %s5952_s22, 0 }
   0x8   : > { %p150_p2 = scmp.eq.s32.totalorder %s5952_s22, 1  ;;  %p156_p3 = scmp.eq.s32.totalorder %s4384_s23, 1 }
   0x9   : > { %p5961_p4 = por %p7040_p1, %p42_p0  ;;  %p4385_p5 = scmp.ge.s32.totalorder %s5890_s21, 1 }
   0xa   : > { %p5966_p6 = por %p156_p3, %p42_p0  ;;  %p163_p7 = scmp.lt.s32.totalorder %s5890_s21, 3 }
   0xb   : > { %s7045_s24 = scalar_select %p5961_p4, 1, 0 }
   0xc   : > { %s7046_s25 = scalar_select %p5966_p6, 1, 0 }
   0xd   : > { %p5971_p8 = pnand %p4385_p5, %p163_p7  ;;  %s5892_s27 = smov [#allocation6]  }
   0xe   : > { %s175_s28 = sshll.u32 %s5892_s27, 4  ;;  %s5893_s30 = smov [#allocation8]   ;;  %s176_s28 = int_to_ptr.vmem [resolvable:$true] %s175_s28 }
   0xf   : > { %s7047_s26 = scalar_select %p5971_p8, 1, 0 }
  0x10   : > { %p5362_p9 = pneg %p5971_p8  ;;  %s191_s6 = sshll.u32 %s5893_s30, 4  ;;  %s192_s6 = int_to_ptr.vmem [resolvable:$true] %s191_s6 }
  0x11   : > { %s5753_s7 = scalar_lea.vmem %s176_s28, 1024  ;;  %p5761_p5 = scmp.lt.s32.totalorder %s176_s28, %s176_s28 }
  0x12   : > { %p5980_p11 = pnand %p5362_p9, %p7040_p1  ;;  %p5754_p13 = scmp.ne.s32.totalorder %s176_s28, %s5753_s7 }
  0x13   : > { %p5762_p7 = scmp.lt.s32.totalorder %s5753_s7, %s5753_s7 }
  0x14   : > { %p5744_p12 = pneg %p5980_p11 }
  0x15   : > { %p5763_p10 = por %p5762_p7, %p5761_p5 }
  0x16   : > { %p5756_p0 = pnand %p5754_p13, %p5744_p12 }
  0x18   : > { %p5757_p3 = pneg %p5756_p0 }
  0x1a   : > { %p5764_p9 = pnand %p5763_p10, %p5757_p3 }
  0x1c   : > { %5767 = shalt.err (!%p5764_p9)
}
  0x1d   : > { %s7041_s8 = smov 64   ;;  %s5895_s9 = smov 4  }
  0x1e   : > { %5365 = dma.hbm_to_vmem [thread:$0]  (!%p5980_p11), %s7035_s1, 1024, %s176_s28, [#allocation7], %s7041_s8, %s7041_s8, %s5895_s9  }
  0x1f   : > { %s5779_s12 = scalar_lea.vmem %s192_s6, 9216  ;;  %p5787_p10 = scmp.lt.s32.totalorder %s192_s6, %s192_s6 }
  0x20   : > { %p5780_p13 = scmp.ne.s32.totalorder %s192_s6, %s5779_s12  ;;  %p5788_p3 = scmp.lt.s32.totalorder %s5779_s12, %s5779_s12 }
  0x22   : > { %p5782_p0 = pnand %p5780_p13, %p5744_p12  ;;  %p5789_p7 = por %p5788_p3, %p5787_p10 }
  0x24   : > { %p5783_p5 = pneg %p5782_p0 }
  0x26   : > { %p5790_p9 = pnand %p5789_p7, %p5783_p5 }
  0x28   : > { %5793 = shalt.err (!%p5790_p9)
}
  0x29   : > { %5368 = dma.hbm_to_vmem [thread:$0]  (!%p5980_p11), %s7037_s3, 9216, %s192_s6, [#allocation7], %s7041_s8, %s7041_s8, %s5895_s9  }
  0x2a   : > { %s6009_s15 = sadd.s32 1, %s5890_s21   ;;  %s29_s16 = sadd.s32 1, %s5886_s20 }
  0x2b   : > { %s26_s17 = ssub.s32 %s5890_s21, %s6009_s15  ;;  %p36_p12 = scmp.ne.s32.totalorder %s5886_s20, %s5882_s19 }
  0x2c   : > { %p27_p13 = scmp.eq.s32.totalorder %s26_s17, 0  ;;  %p37_p0 = scmp.eq.s32.totalorder %s5890_s21, 0 }
  0x2d   : > { %p6019_p5 = por %p150_p2, %p36_p12  ;;  %p5379_p10 = scmp.lt.s32.totalorder %s5890_s21, 2 }
  0x2e   : > { %s6025_s27 = scalar_select %p27_p13, %s5886_s20, %s29_s16  }
  0x2f   : > { %s7049_s23 = scalar_select %p6019_p5, 1, 0 }
  0x30   : > { %p38_p3 = por %p37_p0, %p36_p12  ;;  %s208_s28 = sand.u32 1, %s5886_s20  }
  0x31   : > { %s4389_s29 = sshll.u32 %s208_s28, 7  ;;  %s4684_s30 = sshll.u32 %s5890_s21, 11 }
  0x32   : > { %s6032_s10 = scalar_lea.hbm %s7034_s0, %s4684_s30  ;;  %s212_s11 = scalar_lea.vmem [#allocation3], %s4389_s29 }
  0x33   : > { %s219_s12 = sshll.u32 %s212_s11, 4  ;;  %p6036_p2 = pnand %p5379_p10, %p38_p3  ;;  %s6034_s12 = int_to_ptr.vmem [resolvable:$true] %s219_s12 }
  0x34   : > { %s6040_s14 = scalar_lea.sflag [#allocation4], %s208_s28  ;;  %s5794_s16 = scalar_lea.hbm %s6032_s10, 2048 }
  0x35   : > { %p5795_p11 = scmp.ne.s32.totalorder %s6032_s10, %s5794_s16  ;;  %p5796_p7 = pneg %p6036_p2 }
  0x36   : > { %s5799_s29 = scalar_lea.hbm %s7034_s0, 4096  ;;  %p5800_p13 = scmp.lt.s32.totalorder %s6032_s10, %s7034_s0 }
  0x37   : > { %p5797_p9 = pnand %p5796_p7, %p5795_p11  ;;  %p5801_p0 = scmp.lt.s32.totalorder %s5799_s29, %s5794_s16 }
  0x39   : > { %p5798_p12 = pneg %p5797_p9  ;;  %p5802_p10 = por %p5801_p0, %p5800_p13 }
  0x3b   : > { %p5803_p3 = pnand %p5802_p10, %p5798_p12 }
  0x3d   : > { %5806 = shalt.err (!%p5803_p3)
}
  0x3e   : > { %s5807_s28 = scalar_lea.vmem %s6034_s12, 2048  ;;  %s5896_s11 = smov [#allocation3]  }
  0x3f   : > { %p5808_p1 = scmp.ne.s32.totalorder %s6034_s12, %s5807_s28  ;;  %s5812_s8 = sshll.u32 %s5896_s11, 4  ;;  %s5813_s8 = int_to_ptr.vmem [resolvable:$false] %s5812_s8 }
  0x40   : > { %s5814_s17 = scalar_lea.vmem %s5813_s8, 4096  ;;  %p5815_p9 = scmp.lt.s32.totalorder %s6034_s12, %s5813_s8 }
  0x41   : > { %p5810_p6 = pnand %p5808_p1, %p5796_p7  ;;  %p5816_p5 = scmp.lt.s32.totalorder %s5814_s17, %s5807_s28 }
  0x43   : > { %p5811_p11 = pneg %p5810_p6  ;;  %p5817_p4 = por %p5816_p5, %p5815_p9 }
  0x45   : > { %p5818_p8 = pnand %p5817_p4, %p5811_p11 }
  0x47   : > { %5821 = shalt.err (!%p5818_p8)
}
  0x48   : > { %s7051_s16 = smov 64   ;;  %p7052_p1 = scmp.ne.s32.totalorder %s7047_s26, 0 }
  0x49   : > { %5372 = dma.hbm_to_vmem [thread:$0]  (!%p6036_p2), %s6032_s10, 2048, %s6034_s12, %s6040_s14, %s7051_s16, %s7051_s16, %s5895_s9  }
  0x4a   : > { %231 = sbr.rel (%p7052_p1) target bundleno = 983 (0x3d7), region = 40  ;;  %s6067_s30 = sand.u32 (!%p7052_p1), 1, %s5882_s19  }
  0x4b   : > { %s4393_s8 = sshll.u32 (!%p7052_p1), %s6067_s30, 7  ;;  %s234_s29 = scalar_lea.sflag (!%p7052_p1), [#allocation4], %s6067_s30 }
  0x4c   : > { %s6071_s6 = scalar_lea.vmem (!%p7052_p1), [#allocation3], %s4393_s8  ;;  %p7053_p4 = scmp.ne.s32.totalorder (!%p7052_p1), %s7045_s24, 0 }
  0x4f   : > { %5865 = dma.done.wait (%p7053_p4), %s234_s29, 2048  }
  0x50   : > { %5867 = vsyncadd (%p7053_p4), %s234_s29, 4294965248  ;;  %p7054_p6 = scmp.eq.s32.totalorder %s5952_s22, 0 }
  0x52   : > { %5869 = dma.done.wait (%p7054_p6), [#allocation7], 10240   ;;  %p7055_p8 = pmov %p7054_p6 }
  0x53   : > { %v5494_v0 = vld [vmem:[#allocation6 + $0x38] sm:$0xff]   ;;  %v5495_v1 = vld [vmem:[#allocation6 + $0x30] sm:$0xff]   ;;  %v5496_v2 = vld [vmem:[#allocation6 + $0x28] sm:$0xff]   ;;  %vm282_vm0 = vcmask 1040384   ;;  %vm283_vm1 = vsmask.f32 256 }
  0x54   : > { %5871 = vsyncadd (%p7055_p8), [#allocation7], 4294957056  ;;  %5158 = vmatprep.subr.bf16.mxu0 %v5494_v0  ;;  %v5497_v3 = vld [vmem:[#allocation6 + $0x20] sm:$0xff]   ;;  %v5498_v5 = vld [vmem:[#allocation6 + $0x18] sm:$0xff]   ;;  %vm339_vm3 = vcmask 1043459   ;;  %vm1239_vm6 = vcmask 1043456  }
  0x55   : > { %5159 = vmatpush3.bf16.msra.mxu0 %v5494_v0  ;;  %v5502_v4 = vld [vmem:[%s6071_s6] sm:$0xff]   ;;  %v5499_v6 = vld [vmem:[#allocation6 + $0x10] sm:$0xff]   ;;  %v5500_v7 = vld [vmem:[#allocation6 + $0x8] sm:$0xff]   ;;  %vm340_vm4 = vsmask.f32 7950  ;;  %s4396_s14 = sshll.u32 %s6067_s30, 6 }
  0x56   : > { %5160 = vmatprep.subr.bf16.mxu0 %v5495_v1  ;;  %5174 = vmatprep.mubr.bf16.mxu0 %v5502_v4  ;;  %vm6083_vm2 = vmand %vm282_vm0, %vm283_vm1  ;;  %v5501_v9 = vld [vmem:[#allocation6] sm:$0xff]   ;;  %v5518_v10 = vld [vmem:[#allocation8 + $0x138] sm:$0xff]   ;;  %vm1240_vm7 = vsmask.f32 7938  ;;  %vm949_vm8 = vsmask.f32 4368 }
  0x57   : > { %v5519_v11 = vld [vmem:[#allocation8 + $0xf8] sm:$0xff]   ;;  %4750 = vmatprep.subr.bf16.mxu1 %v5518_v10  ;;  %v291_v12 = vld [vmem:[#allocation2 + $0x30] sm:$0x1]  ;;  %v5503_v14 = vld [vmem:[%s6071_s6 + $0x8] sm:$0xff]   ;;  %vm1306_vm9 = vsmask.f32 3328 }
  0x58   : > { %4751 = vmatpush3.bf16.msra.mxu1 %v5519_v11  ;;  %v292_v13 = vsel %vm6083_vm2, 0, %v291_v12  ;;  %v5504_v15 = vld [vmem:[%s6071_s6 + $0x10] sm:$0xff]   ;;  %v5505_v16 = vld [vmem:[%s6071_s6 + $0x18] sm:$0xff]   ;;  %v5506_v17 = vld [vmem:[%s6071_s6 + $0x20] sm:$0xff]   ;;  %vm1307_vm10 = vsmask.f32 7440 }
  0x59   : > { %5161 = vmatpush3.bf16.msra.mxu0 %v5495_v1  ;;  %293 = vst [vmem:[#allocation2 + $0x30] sm:$0x1] %v292_v13  ;;  %v5507_v18 = vld [vmem:[%s6071_s6 + $0x28] sm:$0xff]   ;;  %v5508_v19 = vld [vmem:[%s6071_s6 + $0x30] sm:$0xff]   ;;  %v5509_v20 = vld [vmem:[%s6071_s6 + $0x38] sm:$0xff]   ;;  %s6974_s7 = scalar_lea.vmem [#allocation9], %s4396_s14 }
  0x5a   : > { %5162 = vmatprep.subr.bf16.mxu0 %v5496_v2  ;;  %v5510_v21 = vld [vmem:[%s6071_s6 + $0x40] sm:$0xff]   ;;  %v5511_v22 = vld [vmem:[%s6071_s6 + $0x48] sm:$0xff]   ;;  %v5512_v23 = vld [vmem:[%s6071_s6 + $0x50] sm:$0xff]   ;;  %s4725_s28 = sshll.u32 %s5952_s22, 10  ;;  %s4292_s11 = sshll.u32 %s6974_s7, 4  ;;  %s6990_s11 = int_to_ptr.vmem [resolvable:$true] %s4292_s11 }
  0x5b   : > { %v5513_v24 = vld [vmem:[%s6071_s6 + $0x58] sm:$0xff]   ;;  %v5514_v25 = vld [vmem:[%s6071_s6 + $0x60] sm:$0xff]   ;;  %v5515_v26 = vld [vmem:[%s6071_s6 + $0x68] sm:$0xff]   ;;  %s6988_s8 = scalar_lea.hbm %s7039_s5, %s4725_s28  ;;  %s4279_s29 = scalar_lea.sflag [#allocation5], %s6067_s30 }
  0x5c   : > { %v5516_v27 = vld [vmem:[%s6071_s6 + $0x70] sm:$0xff]   ;;  %v5517_v28 = vld [vmem:[%s6071_s6 + $0x78] sm:$0xff]   ;;  %v288_v33 = vld [vmem:[#allocation2 + $0x18] sm:$0x1]  ;;  %s5822_s6 = scalar_lea.vmem %s6990_s11, 1024  ;;  %p7068_p2 = scmp.ne.s32.totalorder %s7049_s23, 0 }
  0x5d   : > { %5163 = vmatpush3.bf16.msra.mxu0 %v5496_v2  ;;  %v5520_v29 = vld [vmem:[#allocation8 + $0x178] sm:$0xff]   ;;  %v5521_v30 = vld [vmem:[#allocation8 + $0x130] sm:$0xff]   ;;  %v289_v34 = vsel %vm6083_vm2, 0, %v288_v33  ;;  %v5524_v35 = vld [vmem:[#allocation8 + $0x128] sm:$0xff]   ;;  %p5823_p5 = scmp.ne.s32.totalorder %s6990_s11, %s5822_s6  ;;  %s5898_s22 = smov [#allocation9]  }
  0x5e   : > { %5164 = vmatprep.subr.bf16.mxu0 %v5497_v3  ;;  %v5522_v31 = vld [vmem:[#allocation8 + $0xf0] sm:$0xff]   ;;  %4752 = vmatprep.subr.bf16.mxu1 %v5521_v30  ;;  %290 = vst [vmem:[#allocation2 + $0x18] sm:$0x1] %v289_v34  ;;  %v5525_v36 = vld [vmem:[#allocation8 + $0xe8] sm:$0xff]   ;;  %vm6106_vm5 = vmand %vm339_vm3, %vm340_vm4  ;;  %s5826_s24 = sshll.u32 %s5898_s22, 4  ;;  %s5827_s24 = int_to_ptr.vmem [resolvable:$false] %s5826_s24 }
  0x5f   : > { %v5523_v32 = vld [vmem:[#allocation8 + $0x170] sm:$0xff]   ;;  %4753 = vmatpush3.bf16.msra.mxu1 %v5522_v31  ;;  %v5526_v39 = vld [vmem:[#allocation8 + $0x168] sm:$0xff]   ;;  %v345_v41 = vld [vmem:[#allocation2 + $0x2c] sm:$0x8]  ;;  %p5824_p7 = pnand %p5823_p5, %p7068_p2  ;;  %s5828_s26 = scalar_lea.vmem %s5827_s24, 2048 }
  0x60   : > { %v348_v38 = vld [vmem:[#allocation2 + $0x44] sm:$0x8]  ;;  %4754 = vmatprep.subr.bf16.mxu1 %v5524_v35  ;;  %v346_v42 = vsel %vm6106_vm5, 0, %v345_v41  ;;  %v5527_v43 = vld [vmem:[#allocation8 + $0x120] sm:$0xff]   ;;  %v297_v45 = vld [vmem:[#allocation2 + $0x60] sm:$0x1]  ;;  %p5829_p13 = scmp.lt.s32.totalorder %s6990_s11, %s5827_s24  ;;  %p5830_p0 = scmp.lt.s32.totalorder %s5828_s26, %s5822_s6 }
  0x61   : > { %5165 = vmatpush3.bf16.msra.mxu0 %v5497_v3  ;;  %v349_v40 = vsel %vm6106_vm5, 0, %v348_v38  ;;  %347 = vst [vmem:[#allocation2 + $0x2c] sm:$0x8] %v346_v42  ;;  %v5528_v44 = vld [vmem:[#allocation8 + $0xe0] sm:$0xff]   ;;  %v298_v46 = vsel %vm6083_vm2, 0, %v297_v45  ;;  %v5530_v50 = vld [vmem:[#allocation8 + $0x118] sm:$0xff]   ;;  %vm6186_vm11 = vmand %vm1239_vm6, %vm1240_vm7  ;;  %p5825_p12 = pneg %p5824_p7 }
  0x62   : > { %5166 = vmatprep.subr.bf16.mxu0 %v5498_v5  ;;  %350 = vst [vmem:[#allocation2 + $0x44] sm:$0x8] %v349_v40  ;;  %v294_v47 = vld [vmem:[#allocation2 + $0x48] sm:$0x1]  ;;  %299 = vst [vmem:[#allocation2 + $0x60] sm:$0x1] %v298_v46  ;;  %p5831_p10 = por %p5830_p0, %p5829_p13 }
  0x63   : > { %4755 = vmatpush3.bf16.msra.mxu1 %v5525_v36  ;;  %v295_v48 = vsel %vm6083_vm2, 0, %v294_v47  ;;  %v5529_v49 = vld [vmem:[#allocation8 + $0x160] sm:$0xff]   ;;  %v5531_v52 = vld [vmem:[#allocation8 + $0xd8] sm:$0xff]   ;;  %v5533_v55 = vld [vmem:[#allocation8 + $0x110] sm:$0xff]  }
  0x64   : > { %4756 = vmatprep.subr.bf16.mxu1 %v5527_v43  ;;  %296 = vst [vmem:[#allocation2 + $0x48] sm:$0x1] %v295_v48  ;;  %v354_v51 = vld [vmem:[#allocation2 + $0x74] sm:$0x8]  ;;  %v5532_v54 = vld [vmem:[#allocation8 + $0x158] sm:$0xff]   ;;  %v5534_v56 = vld [vmem:[#allocation8 + $0xd0] sm:$0xff]   ;;  %p5832_p3 = pnand %p5831_p10, %p5825_p12 }
  0x65   : > { %5167 = vmatpush3.bf16.msra.mxu0 %v5498_v5  ;;  %v355_v53 = vsel %vm6106_vm5, 0, %v354_v51  ;;  %v351_v57 = vld [vmem:[#allocation2 + $0x5c] sm:$0x8]  ;;  %v5535_v59 = vld [vmem:[#allocation8 + $0x150] sm:$0xff]   ;;  %v303_v60 = vld [vmem:[#allocation2 + $0x90] sm:$0x1] }
  0x66   : > { %5168 = vmatprep.subr.bf16.mxu0 %v5499_v6  ;;  %356 = vst [vmem:[#allocation2 + $0x74] sm:$0x8] %v355_v53  ;;  %v352_v58 = vsel %vm6106_vm5, 0, %v351_v57  ;;  %v300_v61 = vld [vmem:[#allocation2 + $0x78] sm:$0x1]  ;;  %v304_v63 = vsel %vm6083_vm2, 0, %v303_v60  ;;  %vm6199_vm12 = vmor %vm1306_vm9, %vm1307_vm10 }
  0x67   : > { %4757 = vmatpush3.bf16.msra.mxu1 %v5528_v44  ;;  %353 = vst [vmem:[#allocation2 + $0x5c] sm:$0x8] %v352_v58  ;;  %v360_v62 = vld [vmem:[#allocation2 + $0xa4] sm:$0x8]  ;;  %v301_v0 = vsel %vm6083_vm2, 0, %v300_v61  ;;  %v5536_v3 = vld [vmem:[#allocation8 + $0x108] sm:$0xff]   ;;  %vm6207_vm13 = vmor %vm283_vm1, %vm949_vm8 }
  0x68   : > { %4758 = vmatprep.subr.bf16.mxu1 %v5530_v50  ;;  %v361_v1 = vsel %vm6106_vm5, 0, %v360_v62  ;;  %v357_v2 = vld [vmem:[#allocation2 + $0x8c] sm:$0x8]  ;;  %305 = vst [vmem:[#allocation2 + $0x90] sm:$0x1] %v304_v63  ;;  %v5537_v5 = vld [vmem:[#allocation8 + $0xc8] sm:$0xff]   ;;  %vm6218_vm14 = vmand %vm1239_vm6, %vm1306_vm9 }
  0x69   : > { %5169 = vmatpush3.bf16.msra.mxu0 %v5499_v6  ;;  %302 = vst [vmem:[#allocation2 + $0x78] sm:$0x1] %v301_v0  ;;  %362 = vst [vmem:[#allocation2 + $0xa4] sm:$0x8] %v361_v1  ;;  %v358_v4 = vsel %vm6106_vm5, 0, %v357_v2  ;;  %v5538_v6 = vld [vmem:[#allocation8 + $0x148] sm:$0xff]  }
  0x6a   : > { %5170 = vmatprep.subr.bf16.mxu0 %v5500_v7  ;;  %359 = vst [vmem:[#allocation2 + $0x8c] sm:$0x8] %v358_v4  ;;  %v5541_v10 = vld [vmem:[#allocation8 + $0x140] sm:$0xff]   ;;  %v363_v11 = vld [vmem:[#allocation2 + $0xbc] sm:$0x8]  ;;  %v5571_v45 = vld [vmem:[#allocation8 + $0x78] sm:$0xff]  }
  0x6b   : > { %4759 = vmatpush3.bf16.msra.mxu1 %v5531_v52  ;;  %v366_v12 = vld [vmem:[#allocation2 + $0xd4] sm:$0x8]  ;;  %v364_v13 = vsel %vm6106_vm5, 0, %v363_v11  ;;  %v375_v30 = vld [vmem:[#allocation2 + $0x11c] sm:$0x8] }
  0x6c   : > { %4760 = vmatprep.subr.bf16.mxu1 %v5533_v55  ;;  %365 = vst [vmem:[#allocation2 + $0xbc] sm:$0x8] %v364_v13  ;;  %v321_v31 = vld [vmem:[#allocation2 + $0x120] sm:$0x1]  ;;  %v318_v34 = vld [vmem:[#allocation2 + $0x108] sm:$0x1] }
  0x6d   : > { %5171 = vmatpush3.bf16.msra.mxu0 %v5500_v7  ;;  %v5539_v7 = vld [vmem:[#allocation8 + $0x100] sm:$0xff]   ;;  %v322_v33 = vsel %vm6083_vm2, 0, %v321_v31  ;;  %v319_v35 = vsel %vm6083_vm2, 0, %v318_v34  ;;  %v381_v36 = vld [vmem:[#allocation2 + $0x14c] sm:$0x8] }
  0x6e   : > { %5172 = vmatprep.subr.bf16.mxu0 %v5501_v9  ;;  %323 = vst [vmem:[#allocation2 + $0x120] sm:$0x1] %v322_v33  ;;  %320 = vst [vmem:[#allocation2 + $0x108] sm:$0x1] %v319_v35  ;;  %v384_v38 = vld [vmem:[#allocation2 + $0x164] sm:$0x8] }
  0x6f   : > { %4761 = vmatpush3.bf16.msra.mxu1 %v5534_v56  ;;  %v385_v40 = vsel %vm6106_vm5, 0, %v384_v38  ;;  %v327_v41 = vld [vmem:[#allocation2 + $0x150] sm:$0x1]  ;;  %v324_v42 = vld [vmem:[#allocation2 + $0x138] sm:$0x1] }
  0x70   : > { %4762 = vmatprep.subr.bf16.mxu1 %v5536_v3  ;;  %386 = vst [vmem:[#allocation2 + $0x164] sm:$0x8] %v385_v40  ;;  %v328_v43 = vsel %vm6083_vm2, 0, %v327_v41  ;;  %v325_v44 = vsel %vm6083_vm2, 0, %v324_v42  ;;  %v390_v46 = vld [vmem:[#allocation2 + $0x194] sm:$0x8] }
  0x71   : > { %5173 = vmatpush3.bf16.msra.mxu0 %v5501_v9  ;;  %v5540_v9 = vld [vmem:[#allocation8 + $0xc0] sm:$0xff]   ;;  %329 = vst [vmem:[#allocation2 + $0x150] sm:$0x1] %v328_v43  ;;  %326 = vst [vmem:[#allocation2 + $0x138] sm:$0x1] %v325_v44  ;;  %v391_v48 = vsel %vm6106_vm5, 0, %v390_v46 }
  0x72   : > { %5206 = vmatprep.subr.bf16.mxu0 %v5520_v29  ;;  %v387_v47 = vld [vmem:[#allocation2 + $0x17c] sm:$0x8]  ;;  %v333_v50 = vld [vmem:[#allocation2 + $0x180] sm:$0x1]  ;;  %v330_v51 = vld [vmem:[#allocation2 + $0x168] sm:$0x1] }
  0x73   : > { %4763 = vmatpush3.bf16.msra.mxu1 %v5537_v5  ;;  %392 = vst [vmem:[#allocation2 + $0x194] sm:$0x8] %v391_v48  ;;  %v334_v52 = vsel %vm6083_vm2, 0, %v333_v50  ;;  %v331_v53 = vsel %vm6083_vm2, 0, %v330_v51  ;;  %v6176_v56 = vld [vmem:[%s7036_s2] ss:$0 sm:$0xff] }
  0x74   : > { %5175 = vmatmul.mubr.bf16.vlgmr.msra.gmra.mxu0 %v5503_v14  ;;  %4764 = vmatprep.subr.bf16.mxu1 %v5539_v7  ;;  %v367_v14 = vsel %vm6106_vm5, 0, %v366_v12  ;;  %335 = vst [vmem:[#allocation2 + $0x180] sm:$0x1] %v334_v52  ;;  %332 = vst [vmem:[#allocation2 + $0x168] sm:$0x1] %v331_v53 }
  0x75   : > { %5178 = vmatprep.mubr.bf16.mxu0 %v5504_v15  ;;  %5207 = vmatpush3.bf16.msra.mxu0 %v5520_v29  ;;  %v309_v15 = vld [vmem:[#allocation2 + $0xc0] sm:$0x1]  ;;  %368 = vst [vmem:[#allocation2 + $0xd4] sm:$0x8] %v367_v14 }
  0x76   : > { %5208 = vmatprep.subr.bf16.mxu0 %v5523_v32 }
  0x77   : > { %4765 = vmatpush3.bf16.msra.mxu1 %v5540_v9 }
  0x79   : > { %5209 = vmatpush3.bf16.msra.mxu0 %v5523_v32  ;;  %v376_v32 = vsel %vm6106_vm5, 0, %v375_v30 }
  0x7a   : > { %5210 = vmatprep.subr.bf16.mxu0 %v5526_v39  ;;  %377 = vst [vmem:[#allocation2 + $0x11c] sm:$0x8] %v376_v32 }
  0x7c   : > { %5179 = vmatmul.mubr.bf16.gmra.mxu0 %v5505_v16  ;;  %v306_v16 = vld [vmem:[#allocation2 + $0xa8] sm:$0x1] }
  0x7d   : > { %5182 = vmatprep.mubr.bf16.mxu0 %v5506_v17  ;;  %5211 = vmatpush3.bf16.msra.mxu0 %v5526_v39  ;;  %v310_v17 = vsel %vm6083_vm2, 0, %v309_v15  ;;  %v382_v39 = vsel %vm6106_vm5, 0, %v381_v36 }
  0x7e   : > { %5212 = vmatprep.subr.bf16.mxu0 %v5529_v49  ;;  %311 = vst [vmem:[#allocation2 + $0xc0] sm:$0x1] %v310_v17  ;;  %383 = vst [vmem:[#allocation2 + $0x14c] sm:$0x8] %v382_v39 }
  0x81   : > { %5213 = vmatpush3.bf16.msra.mxu0 %v5529_v49  ;;  %v388_v49 = vsel %vm6106_vm5, 0, %v387_v47 }
  0x82   : > { %5214 = vmatprep.subr.bf16.mxu0 %v5532_v54  ;;  %389 = vst [vmem:[#allocation2 + $0x17c] sm:$0x8] %v388_v49 }
  0x84   : > { %5183 = vmatmul.mubr.bf16.gmra.mxu0 %v5507_v18  ;;  %v307_v18 = vsel %vm6083_vm2, 0, %v306_v16  ;;  %v1246_v16 = vld [vmem:[#allocation2 + $0x30] sm:$0xf] }
  0x85   : > { %5186 = vmatprep.mubr.bf16.mxu0 %v5508_v19  ;;  %5215 = vmatpush3.bf16.msra.mxu0 %v5532_v54  ;;  %308 = vst [vmem:[#allocation2 + $0xa8] sm:$0x1] %v307_v18  ;;  %v372_v19 = vld [vmem:[#allocation2 + $0x104] sm:$0x8]  ;;  %v5897_v54 = vmov 0  }
  0x86   : > { %5216 = vmatprep.subr.bf16.mxu0 %v5535_v59  ;;  %273 = vst [vmem:[#allocation2] sm:$0xff] %v5897_v54  ;;  %275 = vst [vmem:[#allocation2 + $0xc] sm:$0xff] %v5897_v54 }
  0x87   : > { %274 = vst [vmem:[#allocation2 + $0x8] sm:$0xf] %v5897_v54  ;;  %276 = vst [vmem:[#allocation2 + $0x14] sm:$0xf] %v5897_v54 }
  0x88   : > { %278 = vst [vmem:[#allocation2 + $0x198] sm:$0xff] %v5897_v54  ;;  %279 = vst [vmem:[#allocation2 + $0x1a0] sm:$0xf] %v5897_v54 }
  0x89   : > { %5217 = vmatpush3.bf16.msra.mxu0 %v5535_v59  ;;  %281 = vst [vmem:[#allocation2 + $0x1ac] sm:$0xf] %v5897_v54 }
  0x8a   : > { %5218 = vmatprep.subr.bf16.mxu0 %v5538_v6 }
  0x8c   : > { %5187 = vmatmul.mubr.bf16.gmra.mxu0 %v5509_v20  ;;  %v373_v20 = vsel %vm6106_vm5, 0, %v372_v19 }
  0x8d   : > { %5190 = vmatprep.mubr.bf16.mxu0 %v5510_v21  ;;  %5219 = vmatpush3.bf16.msra.mxu0 %v5538_v6  ;;  %v6140_v21 = vld [vmem:[#allocation8 + $0xb8] sm:$0xff]   ;;  %374 = vst [vmem:[#allocation2 + $0x104] sm:$0x8] %v373_v20  ;;  %v285_v55 = vld [vmem:[#allocation2] sm:$0x1] }
  0x8e   : > { %5220 = vmatprep.subr.bf16.mxu0 %v5541_v10  ;;  %5254 = vmatprep.subr.bf16.mxu1 %v6140_v21  ;;  %v286_v57 = vsel %vm6083_vm2, 0, %v285_v55  ;;  %v1491_v55 = vld [vmem:[#allocation2 + $0x44] sm:$0xf] }
  0x8f   : > { %287 = vst [vmem:[#allocation2] sm:$0x1] %v286_v57 }
  0x91   : > { %5221 = vmatpush3.bf16.msra.mxu0 %v5541_v10 }
  0x92   : > { %4886 = vmatprep.subr.bf16.mxu0 %v5571_v45 }
  0x94   : > { %5191 = vmatmul.mubr.bf16.gmra.mxu0 %v5511_v22  ;;  %v315_v22 = vld [vmem:[#allocation2 + $0xf0] sm:$0x1] }
  0x95   : > { %5194 = vmatprep.mubr.bf16.mxu0 %v5512_v23  ;;  %v312_v23 = vld [vmem:[#allocation2 + $0xd8] sm:$0x1] }
  0x96   : > { %v1550_v45 = vld [vmem:[#allocation2] sm:$0xff] }
  0x9c   : > { %5195 = vmatmul.mubr.bf16.gmra.mxu0 %v5513_v24  ;;  %v316_v24 = vsel %vm6083_vm2, 0, %v315_v22 }
  0x9d   : > { %5198 = vmatprep.mubr.bf16.mxu0 %v5514_v25  ;;  %v313_v25 = vsel %vm6083_vm2, 0, %v312_v23  ;;  %317 = vst [vmem:[#allocation2 + $0xf0] sm:$0x1] %v316_v24 }
  0x9e   : > { %314 = vst [vmem:[#allocation2 + $0xd8] sm:$0x1] %v313_v25 }
  0xa4   : > { %5199 = vmatmul.mubr.bf16.gmra.mxu0 %v5515_v26  ;;  %v369_v26 = vld [vmem:[#allocation2 + $0xec] sm:$0x8] }
  0xa5   : > { %5202 = vmatprep.mubr.bf16.mxu0 %v5516_v27  ;;  %v370_v27 = vsel %vm6106_vm5, 0, %v369_v26 }
  0xa6   : > { %371 = vst [vmem:[#allocation2 + $0xec] sm:$0x8] %v370_v27  ;;  %v1242_v27 = vld [vmem:[#allocation2 + $0x18] sm:$0xf] }
  0xac   : > { %5203 = vmatmul.mubr.bf16.gmra.mxu0 %v5517_v28  ;;  %v378_v28 = vld [vmem:[#allocation2 + $0x134] sm:$0x8] }
  0xad   : > { %v379_v29 = vsel %vm6106_vm5, 0, %v378_v28 }
  0xae   : > { %380 = vst [vmem:[#allocation2 + $0x134] sm:$0x8] %v379_v29 }
 0x134   : > { %v5176_v58 = vpop.f32.mrf.mxu0 }
 0x135   : > { %v638_v59 = vadd.f32 %v5176_v58, %v6176_v56 }
 0x136   : > { %v629_v60 = vpop.f32.mrf.mxu0 }
 0x137   : > { %v758_v61 = vmax.f32 %v638_v59, 0.0  ;;  %v630_v62 = vadd.f32 %v6176_v56, %v629_v60 }
 0x138   : > { %v5177_v63 = vpop.f32.mrf.mxu0 }
 0x139   : > { %v4687_v0 = vpack.c.bf16 %v758_v61, %v758_v61  ;;  %v756_v1 = vmax.f32 %v630_v62, 0.0  ;;  %v641_v2 = vadd.f32 %v5177_v63, %v6176_v56 }
 0x13a   : > { %v632_v3 = vpop.f32.mrf.mxu0 }
 0x13b   : > { %919 = vst [vmem:[#allocation2 + $0x34] sm:$0xf] %v4687_v0  ;;  %v968_v4 = vshrl.u32 %v4687_v0, 16  ;;  %v971_v5 = vshll.u32 %v4687_v0, 16  ;;  %v4685_v6 = vpack.c.bf16 %v756_v1, %v756_v1  ;;  %v759_v7 = vmax.f32 %v641_v2, 0.0 }
 0x13c   : > { %v633_v9 = vadd.f32 %v6176_v56, %v632_v3  ;;  %v5180_v10 = vpop.f32.mrf.mxu0 }
 0x13d   : > { %v970_v11 = vrot.slane %v968_v4, 7  ;;  %v1318_v12 = vrot.slane %v968_v4, 4  ;;  %v1319_v13 = vrot.slane %v971_v5, 5  ;;  %917 = vst [vmem:[#allocation2 + $0x1c] sm:$0xf] %v4685_v6  ;;  %v952_v14 = vshrl.u32 %v4685_v6, 16 }
 0x13e   : > { %v955_v17 = vshll.u32 %v4685_v6, 16  ;;  %v4688_v18 = vpack.c.bf16 %v759_v7, %v759_v7  ;;  %v757_v19 = vmax.f32 %v633_v9, 0.0  ;;  %v654_v20 = vadd.f32 %v5180_v10, %v6176_v56  ;;  %v645_v22 = vpop.f32.mrf.mxu0 }
 0x13f   : > { %v973_v23 = vor.u32 %v971_v5, %v970_v11  ;;  %v974_v24 = vrot.slane %v970_v11, 4  ;;  %v1320_v25 = vor.u32 %v1319_v13, %v1318_v12  ;;  %v6191_v26 = vrot.slane %v952_v14, 7 }
 0x140   : > { %v1309_v28 = vrot.slane %v952_v14, 4  ;;  %v1310_v29 = vrot.slane %v955_v17, 5  ;;  %920 = vst [vmem:[#allocation2 + $0x40] sm:$0xf] %v4688_v18  ;;  %v976_v30 = vshrl.u32 %v4688_v18, 16  ;;  %v979_v31 = vshll.u32 %v4688_v18, 16  ;;  %v5181_v32 = vpop.f32.mrf.mxu0 }
 0x141   : > { %v1247_v33 = vsel %vm6186_vm11, %v973_v23, %v1246_v16  ;;  %v1321_v34 = vrot.slane %v1320_v25, 4  ;;  %v957_v35 = vor.u32 %v955_v17, %v6191_v26  ;;  %v958_v36 = vrot.slane %v6191_v26, 4  ;;  %v1487_v16 = vld [vmem:[#allocation2 + $0x2c] sm:$0xf]  ;;  %v1254_v18 = vld [vmem:[#allocation2 + $0x60] sm:$0xf] }
 0x142   : > { %1248 = vst [vmem:[#allocation2 + $0x30] sm:$0xf] %v1247_v33  ;;  %v1311_v39 = vor.u32 %v1310_v29, %v1309_v28  ;;  %v978_v40 = vrot.slane %v976_v30, 7  ;;  %v1322_v41 = vrot.slane %v979_v31, 5  ;;  %v1324_v42 = vrot.slane %v976_v30, 4  ;;  %v648_v43 = vpop.f32.mrf.mxu0 }
 0x143   : > { %v1243_v44 = vsel %vm6186_vm11, %v957_v35, %v1242_v27  ;;  %v4686_v46 = vpack.c.bf16 %v757_v19, %v757_v19  ;;  %v762_v47 = vmax.f32 %v654_v20, 0.0  ;;  %v646_v48 = vadd.f32 %v6176_v56, %v645_v22  ;;  %v1250_v29 = vld [vmem:[#allocation2 + $0x48] sm:$0xf] }
 0x144   : > { %1244 = vst [vmem:[#allocation2 + $0x18] sm:$0xf] %v1243_v44  ;;  %v1312_v49 = vrot.slane %v1311_v39, 4  ;;  %v981_v50 = vor.u32 %v979_v31, %v978_v40  ;;  %v1323_v51 = vsel %vm6199_vm12, %v1321_v34, %v1322_v41  ;;  %v1325_v52 = vor.u32 %v1324_v42, %v1322_v41  ;;  %v6214_v53 = vpop.f32.mrf.mxu0 }
 0x145   : > { %1490 = vst [vmem:[#allocation2 + $0x38] sm:$0xf] %v1323_v51  ;;  %918 = vst [vmem:[#allocation2 + $0x28] sm:$0xf] %v4686_v46  ;;  %v960_v57 = vshrl.u32 %v4686_v46, 16  ;;  %v963_v58 = vshll.u32 %v4686_v46, 16  ;;  %v4691_v59 = vpack.c.bf16 %v762_v47, %v762_v47  ;;  %v657_v63 = vadd.f32 %v5181_v32, %v6176_v56 }
 0x146   : > { %v760_v60 = vmax.f32 %v646_v48, 0.0  ;;  %v982_v61 = vsel %vm6207_vm13, %v974_v24, %v981_v50  ;;  %v1326_v62 = vrot.slane %v1325_v52, 4  ;;  %v649_v0 = vadd.f32 %v6176_v56, %v648_v43  ;;  %v661_v1 = vpop.f32.mrf.mxu0 }
 0x147   : > { %1249 = vst [vmem:[#allocation2 + $0x3c] sm:$0xf] %v982_v61  ;;  %v962_v2 = vrot.slane %v960_v57, 7  ;;  %v1313_v3 = vrot.slane %v963_v58, 5  ;;  %v1315_v4 = vrot.slane %v960_v57, 4  ;;  %v1000_v5 = vshrl.u32 %v4691_v59, 16 }
 0x148   : > { %923 = vst [vmem:[#allocation2 + $0x64] sm:$0xf] %v4691_v59  ;;  %v1492_v6 = vsel %vm6218_vm14, %v1326_v62, %v1491_v55  ;;  %v1003_v7 = vshll.u32 %v4691_v59, 16  ;;  %v4689_v9 = vpack.c.bf16 %v760_v60, %v760_v60  ;;  %v763_v10 = vmax.f32 %v657_v63, 0.0  ;;  %v5185_v11 = vpop.f32.mrf.mxu0  ;;  %v1499_v63 = vld [vmem:[#allocation2 + $0x74] sm:$0xf] }
 0x149   : > { %1493 = vst [vmem:[#allocation2 + $0x44] sm:$0xf] %v1492_v6  ;;  %v965_v12 = vor.u32 %v963_v58, %v962_v2  ;;  %v1314_v13 = vsel %vm6199_vm12, %v1312_v49, %v1313_v3  ;;  %v1316_v14 = vor.u32 %v1315_v4, %v1313_v3  ;;  %v6230_v17 = vrot.slane %v1000_v5, 7 }
 0x14a   : > { %1485 = vst [vmem:[#allocation2 + $0x20] sm:$0xf] %v1314_v13  ;;  %v1336_v19 = vrot.slane %v1000_v5, 4  ;;  %v1337_v20 = vrot.slane %v1003_v7, 5  ;;  %921 = vst [vmem:[#allocation2 + $0x4c] sm:$0xf] %v4689_v9  ;;  %v6232_v24 = vpop.f32.mrf.mxu0  ;;  %v4692_v39 = vpack.c.bf16 %v763_v10, %v763_v10  ;;  %v670_v50 = vadd.f32 %v6214_v53, %v6176_v56 }
 0x14b   : > { %v984_v22 = vshrl.u32 %v4689_v9, 16  ;;  %v987_v23 = vshll.u32 %v4689_v9, 16  ;;  %v966_v25 = vsel %vm6207_vm13, %v958_v36, %v965_v12  ;;  %v1317_v26 = vrot.slane %v1316_v14, 4  ;;  %v6260_v5 = vld [vmem:[#allocation8 + $0xb0] sm:$0xff]  }
 0x14c   : > { %v1005_v27 = vor.u32 %v1003_v7, %v6230_v17  ;;  %v1006_v28 = vrot.slane %v6230_v17, 4  ;;  %1245 = vst [vmem:[#allocation2 + $0x24] sm:$0xf] %v966_v25  ;;  %v1338_v30 = vor.u32 %v1337_v20, %v1336_v19  ;;  %v6240_v34 = vpop.f32.mrf.mxu0  ;;  %v761_v40 = vmax.f32 %v649_v0, 0.0  ;;  %924 = vst [vmem:[#allocation2 + $0x70] sm:$0xf] %v4692_v39 }
 0x14d   : > { %v6238_v31 = vrot.slane %v984_v22, 7  ;;  %v1327_v32 = vrot.slane %v984_v22, 4  ;;  %v1328_v33 = vrot.slane %v987_v23, 5  ;;  %v1488_v35 = vsel %vm6218_vm14, %v1317_v26, %v1487_v16  ;;  %v5546_v17 = vld [vmem:[#allocation2 + $0x34] ss:$12 sps:$4 sm:$0xff]  }
 0x14e   : > { %v1255_v36 = vsel %vm6186_vm11, %v1005_v27, %v1254_v18  ;;  %1489 = vst [vmem:[#allocation2 + $0x2c] sm:$0xf] %v1488_v35  ;;  %v1339_v41 = vrot.slane %v1338_v30, 4  ;;  %v6248_v46 = vpop.f32.mrf.mxu0  ;;  %v1008_v47 = vshrl.u32 %v4692_v39, 16  ;;  %v1011_v48 = vshll.u32 %v4692_v39, 16  ;;  %v5573_v18 = vld [vmem:[#allocation8 + $0x38] sm:$0xff]  }
 0x14f   : > { %1256 = vst [vmem:[#allocation2 + $0x60] sm:$0xf] %v1255_v36  ;;  %v989_v42 = vor.u32 %v987_v23, %v6238_v31  ;;  %v990_v43 = vrot.slane %v6238_v31, 4  ;;  %v1329_v44 = vor.u32 %v1328_v33, %v1327_v32  ;;  %v4690_v49 = vpack.c.bf16 %v761_v40, %v761_v40  ;;  %v1495_v23 = vld [vmem:[#allocation2 + $0x5c] sm:$0xf]  ;;  %v5574_v33 = vld [vmem:[#allocation8 + $0x70] sm:$0xff]  }
 0x150   : > { %v662_v55 = vadd.f32 %v6176_v56, %v661_v1  ;;  %v673_v57 = vadd.f32 %v5185_v11, %v6176_v56  ;;  %v6256_v58 = vpop.f32.mrf.mxu0  ;;  %v1010_v59 = vrot.slane %v1008_v47, 7  ;;  %v1340_v60 = vrot.slane %v1011_v48, 5  ;;  %v5544_v11 = vld [vmem:[#allocation2 + $0x1c] ss:$12 sps:$4 sm:$0xff]   ;;  %v1262_v39 = vld [vmem:[#allocation2 + $0x90] sm:$0xf] }
 0x151   : > { %v1251_v51 = vsel %vm6186_vm11, %v989_v42, %v1250_v29  ;;  %v1330_v52 = vrot.slane %v1329_v44, 4  ;;  %v1342_v61 = vrot.slane %v1008_v47, 4  ;;  %922 = vst [vmem:[#allocation2 + $0x58] sm:$0xf] %v4690_v49  ;;  %v992_v62 = vshrl.u32 %v4690_v49, 16  ;;  %2207 = vmatprep.mubr.bf16.mxu1 %v5544_v11  ;;  %v5585_v11 = vld [vmem:[#allocation8 + $0xa0] sm:$0xff]  }
 0x152   : > { %1252 = vst [vmem:[#allocation2 + $0x48] sm:$0xf] %v1251_v51  ;;  %v995_v0 = vshll.u32 %v4690_v49, 16  ;;  %v766_v2 = vmax.f32 %v670_v50, 0.0  ;;  %v764_v53 = vmax.f32 %v662_v55, 0.0  ;;  %v767_v3 = vmax.f32 %v673_v57, 0.0  ;;  %v6258_v4 = vpop.f32.mrf.mxu0 }
 0x153   : > { %v1013_v1 = vor.u32 %v1011_v48, %v1010_v59  ;;  %v1341_v6 = vsel %vm6199_vm12, %v1339_v41, %v1340_v60  ;;  %v1343_v7 = vor.u32 %v1342_v61, %v1340_v60  ;;  %v994_v9 = vrot.slane %v992_v62, 7  ;;  %v5542_v10 = vld [vmem:[#allocation2 + $0x18] ss:$12 sps:$4 sm:$0xff]  }
 0x154   : > { %1498 = vst [vmem:[#allocation2 + $0x68] sm:$0xf] %v1341_v6  ;;  %v1331_v12 = vrot.slane %v995_v0, 5  ;;  %v1333_v13 = vrot.slane %v992_v62, 4  ;;  %v4695_v14 = vpack.c.bf16 %v766_v2, %v766_v2  ;;  %v4693_v16 = vpack.c.bf16 %v764_v53, %v764_v53  ;;  %v6268_v26 = vpop.f32.mrf.mxu0  ;;  %2208 = vmatmul.mubr.bf16.vlgmr.msra.gmra.mxu1 %v5542_v10  ;;  %v5549_v42 = vld [vmem:[#allocation2 + $0x38] ss:$12 sps:$4 sm:$0xff]  }
 0x155   : > { %v1014_v19 = vsel %vm6207_vm13, %v1006_v28, %v1013_v1  ;;  %v1344_v20 = vrot.slane %v1343_v7, 4  ;;  %v997_v22 = vor.u32 %v995_v0, %v994_v9  ;;  %v6266_v25 = vpack.c.bf16 %v767_v3, %v767_v3  ;;  %v5548_v27 = vld [vmem:[#allocation2 + $0x20] ss:$12 sps:$4 sm:$0xff]   ;;  %v6272_v28 = vld [vmem:[#allocation8 + $0xa8] sm:$0xff]   ;;  %5255 = vmatpush3.bf16.msra.mxu1 %v6140_v21  ;;  %2215 = vmatprep.mubr.bf16.mxu1 %v5546_v17 }
 0x156   : > { %1257 = vst [vmem:[#allocation2 + $0x6c] sm:$0xf] %v1014_v19  ;;  %v1332_v29 = vsel %vm6199_vm12, %v1330_v52, %v1331_v12  ;;  %v1334_v30 = vor.u32 %v1333_v13, %v1331_v12  ;;  %927 = vst [vmem:[#allocation2 + $0x94] sm:$0xf] %v4695_v14  ;;  %v1032_v31 = vshrl.u32 %v4695_v14, 16  ;;  %v1035_v32 = vshll.u32 %v4695_v14, 16  ;;  %5222 = vmatprep.mubr.bf16.mxu0 %v5548_v27  ;;  %v6284_v21 = vpop.f32.mrf.mxu0 }
 0x157   : > { %925 = vst [vmem:[#allocation2 + $0x7c] sm:$0xf] %v4693_v16  ;;  %v1500_v35 = vsel %vm6218_vm14, %v1344_v20, %v1499_v63  ;;  %v998_v36 = vsel %vm6207_vm13, %v990_v43, %v997_v22  ;;  %1494 = vst [vmem:[#allocation2 + $0x50] sm:$0xf] %v1332_v29  ;;  %v1016_v40 = vshrl.u32 %v4693_v16, 16  ;;  %v1019_v41 = vshll.u32 %v4693_v16, 16  ;;  %5256 = vmatprep.subr.bf16.mxu1 %v6260_v5 }
 0x158   : > { %928 = vst [vmem:[#allocation2 + $0xa0] sm:$0xf] %v6266_v25  ;;  %1501 = vst [vmem:[#allocation2 + $0x74] sm:$0xf] %v1500_v35  ;;  %v1335_v44 = vrot.slane %v1334_v30, 4  ;;  %v1034_v47 = vrot.slane %v1032_v31, 7  ;;  %5223 = vmatmul.mubr.bf16.vlgmr.msra.gmra.mxu0 %v5549_v42  ;;  %v686_v14 = vadd.f32 %v6240_v34, %v6176_v56  ;;  %v6303_v16 = vpop.f32.mrf.mxu0  ;;  %v678_v22 = vadd.f32 %v6176_v56, %v6248_v46 }
 0x159   : > { %1253 = vst [vmem:[#allocation2 + $0x54] sm:$0xf] %v998_v36  ;;  %v1354_v48 = vrot.slane %v1032_v31, 4  ;;  %v1355_v49 = vrot.slane %v1035_v32, 5  ;;  %v1258_v50 = vld [vmem:[#allocation2 + $0x78] sm:$0xf]  ;;  %4887 = vmatpush3.bf16.msra.mxu0 %v5573_v18  ;;  %5257 = vmatpush3.bf16.msra.mxu1 %v6260_v5  ;;  %v665_v5 = vadd.f32 %v6176_v56, %v6232_v24  ;;  %v6311_v34 = vadd.f32 %v6176_v56, %v6258_v4 }
 0x15a   : > { %v6281_v43 = vrot.slane %v1016_v40, 7  ;;  %v1345_v51 = vrot.slane %v1016_v40, 4  ;;  %v1346_v52 = vrot.slane %v1019_v41, 5  ;;  %v1040_v55 = vshrl.u32 %v6266_v25, 16  ;;  %v5575_v57 = vld [vmem:[#allocation8 + $0x30] sm:$0xff]   ;;  %v5581_v59 = vld [vmem:[#allocation8 + $0x68] sm:$0xff]   ;;  %4888 = vmatprep.subr.bf16.mxu0 %v5574_v33  ;;  %5258 = vmatprep.subr.bf16.mxu1 %v6272_v28 }
 0x15b   : > { %v1496_v60 = vsel %vm6218_vm14, %v1335_v44, %v1495_v23  ;;  %v1037_v61 = vor.u32 %v1035_v32, %v1034_v47  ;;  %v1038_v62 = vrot.slane %v1034_v47, 4  ;;  %v1356_v63 = vor.u32 %v1355_v49, %v1354_v48  ;;  %v5550_v0 = vld [vmem:[#allocation2 + $0x30] ss:$12 sps:$4 sm:$0xff]   ;;  %v5551_v30 = vld [vmem:[#allocation2 + $0x4c] ss:$12 sps:$4 sm:$0xff]  }
 0x15c   : > { %1497 = vst [vmem:[#allocation2 + $0x5c] sm:$0xf] %v1496_v60  ;;  %v1021_v2 = vor.u32 %v1019_v41, %v6281_v43  ;;  %v1022_v53 = vrot.slane %v6281_v43, 4  ;;  %v1347_v3 = vor.u32 %v1346_v52, %v1345_v51  ;;  %v1042_v1 = vrot.slane %v1040_v55, 7  ;;  %v5582_v17 = vld [vmem:[#allocation8 + $0x28] sm:$0xff]   ;;  %v5583_v18 = vld [vmem:[#allocation8 + $0x60] sm:$0xff]   ;;  %2216 = vmatmul.mubr.bf16.gmra.mxu1 %v5550_v0 }
 0x15d   : > { %v1263_v6 = vsel %vm6186_vm11, %v1037_v61, %v1262_v39  ;;  %v1357_v7 = vrot.slane %v1356_v63, 4  ;;  %v1043_v9 = vshll.u32 %v6266_v25, 16  ;;  %v1360_v10 = vrot.slane %v1040_v55, 4  ;;  %4889 = vmatpush3.bf16.msra.mxu0 %v5575_v57  ;;  %v1507_v25 = vld [vmem:[#allocation2 + $0xa4] sm:$0xf]  ;;  %5259 = vmatpush3.bf16.msra.mxu1 %v6272_v28  ;;  %v5584_v33 = vld [vmem:[#allocation8 + $0x20] sm:$0xff]   ;;  %v6325_v39 = vpop.f32.mrf.mxu0 }
 0x15e   : > { %1264 = vst [vmem:[#allocation2 + $0x90] sm:$0xf] %v1263_v6  ;;  %v1259_v12 = vsel %vm6186_vm11, %v1021_v2, %v1258_v50  ;;  %v6297_v13 = vrot.slane %v1347_v3, 4  ;;  %v689_v23 = vadd.f32 %v6256_v58, %v6176_v56  ;;  %v765_v24 = vmax.f32 %v665_v5, 0.0  ;;  %4890 = vmatprep.subr.bf16.mxu0 %v5581_v59  ;;  %5260 = vmatprep.subr.bf16.mxu1 %v5585_v11  ;;  %v6322_v4 = vld [vmem:[#allocation8 + $0x98] sm:$0xff]   ;;  %v6332_v59 = vld [vmem:[#allocation8 + $0x90] sm:$0xff]  }
 0x15f   : > { %1260 = vst [vmem:[#allocation2 + $0x78] sm:$0xf] %v1259_v12  ;;  %v1045_v19 = vor.u32 %v1043_v9, %v1042_v1  ;;  %v1358_v20 = vrot.slane %v1043_v9, 5  ;;  %v770_v27 = vmax.f32 %v686_v14, 0.0  ;;  %v6315_v29 = vadd.f32 %v6268_v26, %v6176_v56  ;;  %2223 = vmatprep.mubr.bf16.mxu1 %v5551_v30  ;;  %v5554_v40 = vld [vmem:[#allocation2 + $0x68] ss:$12 sps:$4 sm:$0xff]  }
 0x160   : > { %v768_v32 = vmax.f32 %v678_v22, 0.0  ;;  %v4694_v26 = vpack.c.bf16 %v765_v24, %v765_v24  ;;  %v771_v36 = vmax.f32 %v689_v23, 0.0  ;;  %v769_v28 = vmax.f32 %v6311_v34, 0.0  ;;  %v5591_v49 = vld [vmem:[#allocation8 + $0x58] sm:$0xff]   ;;  %v5557_v57 = vld [vmem:[#allocation2 + $0x64] ss:$12 sps:$4 sm:$0xff]  }
 0x161   : > { %v1046_v46 = vsel %vm6207_vm13, %v1038_v62, %v1045_v19  ;;  %v1359_v58 = vsel %vm6199_vm12, %v1357_v7, %v1358_v20  ;;  %v1361_v31 = vor.u32 %v1360_v10, %v1358_v20  ;;  %v4699_v35 = vpack.c.bf16 %v770_v27, %v770_v27  ;;  %4891 = vmatpush3.bf16.msra.mxu0 %v5582_v17  ;;  %v1270_v61 = vld [vmem:[#allocation2 + $0xc0] sm:$0xf]  ;;  %v5556_v0 = vld [vmem:[#allocation2 + $0x48] ss:$12 sps:$4 sm:$0xff]   ;;  %v6341_v7 = vpop.f32.mrf.mxu0  ;;  %v1503_v19 = vld [vmem:[#allocation2 + $0x8c] sm:$0xf] }
 0x162   : > { %1265 = vst [vmem:[#allocation2 + $0x9c] sm:$0xf] %v1046_v46  ;;  %1506 = vst [vmem:[#allocation2 + $0x98] sm:$0xf] %v1359_v58  ;;  %v4697_v42 = vpack.c.bf16 %v768_v32, %v768_v32  ;;  %v774_v44 = vmax.f32 %v6315_v29, 0.0  ;;  %v6330_v47 = vadd.f32 %v6176_v56, %v6284_v21  ;;  %v1024_v50 = vshrl.u32 %v4694_v26, 16  ;;  %4892 = vmatprep.subr.bf16.mxu0 %v5583_v18 }
 0x163   : > { %v1362_v41 = vrot.slane %v1361_v31, 4  ;;  %v5553_v48 = vld [vmem:[#allocation2 + $0x50] ss:$12 sps:$4 sm:$0xff]   ;;  %926 = vst [vmem:[#allocation2 + $0x88] sm:$0xf] %v4694_v26  ;;  %v1027_v51 = vshll.u32 %v4694_v26, 16  ;;  %5261 = vmatpush3.bf16.msra.mxu1 %v5585_v11  ;;  %v6336_v63 = vpack.c.bf16 %v771_v36, %v771_v36  ;;  %v6360_v32 = vpop.f32.mrf.mxu0 }
 0x164   : > { %931 = vst [vmem:[#allocation2 + $0xc4] sm:$0xf] %v4699_v35  ;;  %v1064_v52 = vshrl.u32 %v4699_v35, 16  ;;  %v1067_v55 = vshll.u32 %v4699_v35, 16  ;;  %929 = vst [vmem:[#allocation2 + $0xac] sm:$0xf] %v4697_v42  ;;  %5226 = vmatprep.mubr.bf16.mxu0 %v5553_v48  ;;  %5262 = vmatprep.subr.bf16.mxu1 %v6322_v4  ;;  %v4703_v48 = vpack.c.bf16 %v774_v44, %v774_v44 }
 0x165   : > { %v1508_v60 = vsel %vm6218_vm14, %v1362_v41, %v1507_v25  ;;  %v1048_v21 = vshrl.u32 %v4697_v42, 16  ;;  %v1051_v62 = vshll.u32 %v4697_v42, 16  ;;  %v1026_v2 = vrot.slane %v1024_v50, 7  ;;  %5227 = vmatmul.mubr.bf16.gmra.mxu0 %v5554_v40  ;;  %932 = vst [vmem:[#allocation2 + $0xd0] sm:$0xf] %v6336_v63  ;;  %2224 = vmatmul.mubr.bf16.gmra.mxu1 %v5556_v0  ;;  %v5592_v5 = vld [vmem:[#allocation8 + $0x18] sm:$0xff]   ;;  %v6377_v29 = vpop.f32.mrf.mxu0 }
 0x166   : > { %1509 = vst [vmem:[#allocation2 + $0xa4] sm:$0xf] %v1508_v60  ;;  %v1349_v3 = vrot.slane %v1027_v51, 5  ;;  %v1351_v1 = vrot.slane %v1024_v50, 4  ;;  %v6339_v6 = vrot.slane %v1064_v52, 7  ;;  %v1372_v9 = vrot.slane %v1064_v52, 4  ;;  %4893 = vmatpush3.bf16.msra.mxu0 %v5584_v33  ;;  %2231 = vmatprep.mubr.bf16.mxu1 %v5557_v57 }
 0x167   : > { %v1373_v10 = vrot.slane %v1067_v55, 5  ;;  %v6343_v11 = vrot.slane %v1048_v21, 7  ;;  %v1363_v12 = vrot.slane %v1048_v21, 4  ;;  %v1029_v14 = vor.u32 %v1027_v51, %v1026_v2  ;;  %v1266_v22 = vld [vmem:[#allocation2 + $0xa8] sm:$0xf]  ;;  %v5593_v23 = vld [vmem:[#allocation8 + $0x50] sm:$0xff]   ;;  %4894 = vmatprep.subr.bf16.mxu0 %v5591_v49  ;;  %5263 = vmatpush3.bf16.msra.mxu1 %v6322_v4 }
 0x168   : > { %v1350_v17 = vsel %vm6199_vm12, %v6297_v13, %v1349_v3  ;;  %v1352_v18 = vor.u32 %v1351_v1, %v1349_v3  ;;  %v1069_v20 = vor.u32 %v1067_v55, %v6339_v6  ;;  %v1070_v25 = vrot.slane %v6339_v6, 4  ;;  %v5594_v33 = vld [vmem:[#allocation8 + $0x10] sm:$0xff]   ;;  %5264 = vmatprep.subr.bf16.mxu1 %v6332_v59  ;;  %v5624_v26 = vld [vmem:[#allocation8 + $0x88] sm:$0xff]   ;;  %v1515_v60 = vld [vmem:[#allocation2 + $0xd4] sm:$0xf] }
 0x169   : > { %1502 = vst [vmem:[#allocation2 + $0x80] sm:$0xf] %v1350_v17  ;;  %v1374_v24 = vor.u32 %v1373_v10, %v1372_v9  ;;  %v1053_v27 = vor.u32 %v1051_v62, %v6343_v11  ;;  %v1054_v30 = vrot.slane %v6343_v11, 4  ;;  %v1030_v13 = vsel %vm6207_vm13, %v1022_v53, %v1029_v14  ;;  %v5600_v36 = vld [vmem:[#allocation8 + $0x48] sm:$0xff]   ;;  %v5561_v49 = vld [vmem:[#allocation2 + $0x60] ss:$12 sps:$4 sm:$0xff]  }
 0x16a   : > { %v1353_v46 = vrot.slane %v1352_v18, 4  ;;  %v1271_v58 = vsel %vm6186_vm11, %v1069_v20, %v1270_v61  ;;  %v1364_v31 = vrot.slane %v1051_v62, 5  ;;  %1261 = vst [vmem:[#allocation2 + $0x84] sm:$0xf] %v1030_v13  ;;  %v1072_v4 = vshrl.u32 %v6336_v63, 16  ;;  %4895 = vmatpush3.bf16.msra.mxu0 %v5592_v5  ;;  %v5632_v44 = vld [vmem:[#allocation8 + $0x80] sm:$0xff]  }
 0x16b   : > { %1272 = vst [vmem:[#allocation2 + $0xc0] sm:$0xf] %v1271_v58  ;;  %v1375_v35 = vrot.slane %v1374_v24, 4  ;;  %v1267_v43 = vsel %vm6186_vm11, %v1053_v27, %v1266_v22  ;;  %v1075_v53 = vshll.u32 %v6336_v63, 16  ;;  %v4698_v42 = vpack.c.bf16 %v769_v28, %v769_v28  ;;  %4896 = vmatprep.subr.bf16.mxu0 %v5593_v23  ;;  %5265 = vmatpush3.bf16.msra.mxu1 %v6332_v59  ;;  %v5602_v59 = vld [vmem:[#allocation8 + $0x40] sm:$0xff]   ;;  %v6388_v23 = vpop.f32.mrf.mxu0 }
 0x16c   : > { %v1504_v40 = vsel %vm6218_vm14, %v1353_v46, %v1503_v19  ;;  %1268 = vst [vmem:[#allocation2 + $0xa8] sm:$0xf] %v1267_v43  ;;  %v1365_v41 = vor.u32 %v1364_v31, %v1363_v12  ;;  %v1074_v50 = vrot.slane %v1072_v4, 7  ;;  %v1378_v52 = vrot.slane %v1072_v4, 4  ;;  %935 = vst [vmem:[#allocation2 + $0xf4] sm:$0xf] %v4703_v48  ;;  %5266 = vmatprep.subr.bf16.mxu1 %v5624_v26 }
 0x16d   : > { %1505 = vst [vmem:[#allocation2 + $0x8c] sm:$0xf] %v1504_v40  ;;  %v1376_v51 = vrot.slane %v1075_v53, 5  ;;  %v772_v55 = vmax.f32 %v6330_v47, 0.0  ;;  %930 = vst [vmem:[#allocation2 + $0xb8] sm:$0xf] %v4698_v42  ;;  %2232 = vmatmul.mubr.bf16.gmra.mxu1 %v5561_v49  ;;  %v710_v49 = vadd.f32 %v6176_v56, %v6360_v32  ;;  %v6421_v32 = vadd.f32 %v6377_v29, %v6176_v56 }
 0x16e   : > { %v1366_v57 = vrot.slane %v1365_v41, 4  ;;  %v1056_v34 = vshrl.u32 %v4698_v42, 16  ;;  %v1059_v61 = vshll.u32 %v4698_v42, 16  ;;  %v1096_v28 = vshrl.u32 %v4703_v48, 16  ;;  %4897 = vmatpush3.bf16.msra.mxu0 %v5594_v33  ;;  %v5601_v47 = vld [vmem:[#allocation8 + $0x8] sm:$0xff]   ;;  %v5603_v13 = vld [vmem:[#allocation8] sm:$0xff]  }
 0x16f   : > { %v1077_v21 = vor.u32 %v1075_v53, %v1074_v50  ;;  %v1377_v62 = vsel %vm6199_vm12, %v1375_v35, %v1376_v51  ;;  %v1379_v63 = vor.u32 %v1378_v52, %v1376_v51  ;;  %v1099_v0 = vshll.u32 %v4703_v48, 16  ;;  %4898 = vmatprep.subr.bf16.mxu0 %v5600_v36  ;;  %v1511_v12 = vld [vmem:[#allocation2 + $0xbc] sm:$0xf]  ;;  %v1278_v5 = vld [vmem:[#allocation2 + $0xf0] sm:$0xf]  ;;  %5267 = vmatpush3.bf16.msra.mxu1 %v5624_v26  ;;  %v6393_v26 = vld [vmem:[#allocation8 + $0x238] sm:$0xff]   ;;  %v6413_v50 = vpop.f32.mrf.mxu0 }
 0x170   : > { %1514 = vst [vmem:[#allocation2 + $0xc8] sm:$0xf] %v1377_v62  ;;  %v1058_v2 = vrot.slane %v1056_v34, 7  ;;  %v1367_v3 = vrot.slane %v1059_v61, 5  ;;  %v1369_v1 = vrot.slane %v1056_v34, 4  ;;  %v6381_v6 = vrot.slane %v1096_v28, 7  ;;  %5268 = vmatprep.subr.bf16.mxu1 %v5632_v44 }
 0x171   : > { %v1078_v9 = vsel %vm6207_vm13, %v1070_v25, %v1077_v21  ;;  %v1380_v10 = vrot.slane %v1379_v63, 4  ;;  %v1390_v14 = vrot.slane %v1096_v28, 4  ;;  %v1391_v17 = vrot.slane %v1099_v0, 5  ;;  %v5560_v24 = vld [vmem:[#allocation2 + $0x98] ss:$12 sps:$4 sm:$0xff]   ;;  %v5639_v28 = vld [vmem:[#allocation8 + $0x1f8] sm:$0xff]  }
 0x172   : > { %1273 = vst [vmem:[#allocation2 + $0xcc] sm:$0xf] %v1078_v9  ;;  %v1061_v18 = vor.u32 %v1059_v61, %v1058_v2  ;;  %v1368_v19 = vsel %vm6199_vm12, %v1366_v57, %v1367_v3  ;;  %v1370_v20 = vor.u32 %v1369_v1, %v1367_v3  ;;  %v1101_v22 = vor.u32 %v1099_v0, %v6381_v6  ;;  %v5562_v27 = vld [vmem:[#allocation2 + $0x7c] ss:$12 sps:$4 sm:$0xff]   ;;  %v5567_v33 = vld [vmem:[#allocation2 + $0x78] ss:$12 sps:$4 sm:$0xff]  }
 0x173   : > { %v1516_v25 = vsel %vm6218_vm14, %v1380_v10, %v1515_v60  ;;  %1510 = vst [vmem:[#allocation2 + $0xb0] sm:$0xf] %v1368_v19  ;;  %v1102_v46 = vrot.slane %v6381_v6, 4  ;;  %v1392_v58 = vor.u32 %v1391_v17, %v1390_v14  ;;  %v4701_v31 = vpack.c.bf16 %v772_v55, %v772_v55  ;;  %4899 = vmatpush3.bf16.msra.mxu0 %v5601_v47  ;;  %v6415_v51 = vld [vmem:[#allocation2 + $0x94] ss:$12 sps:$4 sm:$0xff]  }
 0x174   : > { %1517 = vst [vmem:[#allocation2 + $0xd4] sm:$0xf] %v1516_v25  ;;  %v1062_v35 = vsel %vm6207_vm13, %v1054_v30, %v1061_v18  ;;  %v1371_v43 = vrot.slane %v1370_v20, 4  ;;  %v1279_v4 = vsel %vm6186_vm11, %v1101_v22, %v1278_v5  ;;  %v705_v53 = vadd.f32 %v6303_v16, %v6176_v56  ;;  %v5559_v36 = vld [vmem:[#allocation2 + $0x80] ss:$12 sps:$4 sm:$0xff]   ;;  %2239 = vmatprep.mubr.bf16.mxu1 %v5562_v27 }
 0x175   : > { %4900 = vmatprep.subr.bf16.mxu0 %v5602_v59  ;;  %1269 = vst [vmem:[#allocation2 + $0xb4] sm:$0xf] %v1062_v35  ;;  %1280 = vst [vmem:[#allocation2 + $0xf0] sm:$0xf] %v1279_v4  ;;  %v6403_v40 = vrot.slane %v1392_v58, 4  ;;  %v1080_v41 = vshrl.u32 %v4701_v31, 16  ;;  %v697_v30 = vadd.f32 %v6176_v56, %v6325_v39  ;;  %5269 = vmatpush3.bf16.msra.mxu1 %v5632_v44 }
 0x176   : > { %933 = vst [vmem:[#allocation2 + $0xdc] sm:$0xf] %v4701_v31  ;;  %v1083_v11 = vshll.u32 %v4701_v31, 16  ;;  %v1512_v42 = vsel %vm6218_vm14, %v1371_v43, %v1511_v12  ;;  %v775_v48 = vmax.f32 %v705_v53, 0.0  ;;  %v718_v16 = vadd.f32 %v6341_v7, %v6176_v56  ;;  %5230 = vmatprep.mubr.bf16.mxu0 %v5559_v36  ;;  %2240 = vmatmul.mubr.bf16.gmra.mxu1 %v5567_v33  ;;  %v1274_v60 = vld [vmem:[#allocation2 + $0xd8] sm:$0xf]  ;;  %v6429_v56 = vpop.f32.mrf.mxu0 }
 0x177   : > { %1513 = vst [vmem:[#allocation2 + $0xbc] sm:$0xf] %v1512_v42  ;;  %v6417_v52 = vrot.slane %v1080_v41, 7  ;;  %v1381_v39 = vrot.slane %v1080_v41, 4  ;;  %v773_v57 = vmax.f32 %v697_v30, 0.0  ;;  %5231 = vmatmul.mubr.bf16.gmra.mxu0 %v5560_v24  ;;  %v776_v7 = vmax.f32 %v710_v49, 0.0  ;;  %2247 = vmatprep.mubr.bf16.mxu1 %v6415_v51 }
 0x178   : > { %v1382_v55 = vrot.slane %v1083_v11, 5  ;;  %v4704_v34 = vpack.c.bf16 %v775_v48, %v775_v48  ;;  %v778_v61 = vmax.f32 %v718_v16, 0.0  ;;  %4901 = vmatpush3.bf16.msra.mxu0 %v5603_v13  ;;  %5022 = vmatprep.subr.bf16.mxu1 %v5639_v28  ;;  %v6433_v10 = vld [vmem:[#allocation2 + $0x90] ss:$12 sps:$4 sm:$0xff]   ;;  %v1523_v19 = vld [vmem:[#allocation2 + $0x104] sm:$0xf]  ;;  %v5201_v33 = vpop.f32.mrf.mxu0 }
 0x179   : > { %v1085_v44 = vor.u32 %v1083_v11, %v6417_v52  ;;  %v1086_v21 = vrot.slane %v6417_v52, 4  ;;  %v4702_v63 = vpack.c.bf16 %v773_v57, %v773_v57  ;;  %5302 = vmatprep.subr.bf16.mxu0 %v6393_v26  ;;  %v6427_v2 = vpack.c.bf16 %v776_v7, %v776_v7  ;;  %v1286_v36 = vld [vmem:[#allocation2 + $0x120] sm:$0xf]  ;;  %v6444_v11 = vld [vmem:[#allocation2 + $0xac] ss:$12 sps:$4 sm:$0xff]  }
 0x17a   : > { %v1383_v62 = vor.u32 %v1382_v55, %v1381_v39  ;;  %936 = vst [vmem:[#allocation2 + $0x100] sm:$0xf] %v4704_v34  ;;  %v1104_v0 = vshrl.u32 %v4704_v34, 16  ;;  %v1107_v47 = vshll.u32 %v4704_v34, 16  ;;  %v4707_v59 = vpack.c.bf16 %v778_v61, %v778_v61  ;;  %v1519_v42 = vld [vmem:[#allocation2 + $0xec] sm:$0xf]  ;;  %v728_v34 = vpop.f32.mrf.mxu0 }
 0x17b   : > { %v1275_v29 = vsel %vm6186_vm11, %v1085_v44, %v1274_v60  ;;  %934 = vst [vmem:[#allocation2 + $0xe8] sm:$0xf] %v4702_v63  ;;  %v1088_v1 = vshrl.u32 %v4702_v63, 16  ;;  %v1091_v9 = vshll.u32 %v4702_v63, 16  ;;  %937 = vst [vmem:[#allocation2 + $0x10c] sm:$0xf] %v6427_v2 }
 0x17c   : > { %v1384_v3 = vrot.slane %v1383_v62, 4  ;;  %1276 = vst [vmem:[#allocation2 + $0xd8] sm:$0xf] %v1275_v29  ;;  %v1106_v12 = vrot.slane %v1104_v0, 7  ;;  %v1394_v5 = vrot.slane %v1107_v47, 5  ;;  %v1396_v14 = vrot.slane %v1104_v0, 4 }
 0x17d   : > { %939 = vst [vmem:[#allocation2 + $0x124] sm:$0xf] %v4707_v59  ;;  %v1128_v17 = vshrl.u32 %v4707_v59, 16  ;;  %v5565_v18 = vld [vmem:[#allocation2 + $0xc8] ss:$12 sps:$4 sm:$0xff]   ;;  %v1090_v20 = vrot.slane %v1088_v1, 7 }
 0x17e   : > { %v1385_v22 = vrot.slane %v1091_v9, 5  ;;  %v1387_v24 = vrot.slane %v1088_v1, 4  ;;  %v1131_v27 = vshll.u32 %v4707_v59, 16  ;;  %v1109_v13 = vor.u32 %v1107_v47, %v1106_v12  ;;  %v5564_v35 = vld [vmem:[#allocation2 + $0xb0] ss:$12 sps:$4 sm:$0xff]   ;;  %2248 = vmatmul.mubr.bf16.gmra.mxu1 %v6433_v10 }
 0x17f   : > { %v1395_v25 = vsel %vm6199_vm12, %v6403_v40, %v1394_v5  ;;  %v1397_v58 = vor.u32 %v1396_v14, %v1394_v5  ;;  %v6439_v31 = vrot.slane %v1128_v17, 7  ;;  %v1093_v43 = vor.u32 %v1091_v9, %v1090_v20  ;;  %5234 = vmatprep.mubr.bf16.mxu0 %v5564_v35  ;;  %2255 = vmatprep.mubr.bf16.mxu1 %v6444_v11  ;;  %v1282_v44 = vld [vmem:[#allocation2 + $0x108] sm:$0xf]  ;;  %v6469_v0 = vld [vmem:[%s7036_s2] ss:$0 sm:$0xff] }
 0x180   : > { %1522 = vst [vmem:[#allocation2 + $0xf8] sm:$0xf] %v1395_v25  ;;  %v1386_v4 = vsel %vm6199_vm12, %v1384_v3, %v1385_v22  ;;  %v1388_v53 = vor.u32 %v1387_v24, %v1385_v22  ;;  %v1408_v41 = vrot.slane %v1128_v17, 4  ;;  %v1110_v40 = vsel %vm6207_vm13, %v1102_v46, %v1109_v13  ;;  %5235 = vmatmul.mubr.bf16.gmra.mxu0 %v5565_v18  ;;  %v6479_v1 = vld [vmem:[#allocation2 + $0xa8] ss:$12 sps:$4 sm:$0xff]   ;;  %v6483_v17 = vpop.f32.mrf.mxu0 }
 0x181   : > { %v1398_v30 = vrot.slane %v1397_v58, 4  ;;  %1518 = vst [vmem:[#allocation2 + $0xe0] sm:$0xf] %v1386_v4  ;;  %v1133_v48 = vor.u32 %v1131_v27, %v6439_v31  ;;  %v1134_v16 = vrot.slane %v6439_v31, 4  ;;  %1281 = vst [vmem:[#allocation2 + $0xfc] sm:$0xf] %v1110_v40  ;;  %v1094_v49 = vsel %vm6207_vm13, %v1086_v21, %v1093_v43 }
 0x182   : > { %v1389_v52 = vrot.slane %v1388_v53, 4  ;;  %v1409_v39 = vrot.slane %v1131_v27, 5  ;;  %v1112_v55 = vshrl.u32 %v6427_v2, 16  ;;  %1277 = vst [vmem:[#allocation2 + $0xe4] sm:$0xf] %v1094_v49  ;;  %v1115_v57 = vshll.u32 %v6427_v2, 16 }
 0x183   : > { %v1524_v6 = vsel %vm6218_vm14, %v1398_v30, %v1523_v19  ;;  %v1287_v46 = vsel %vm6186_vm11, %v1133_v48, %v1286_v36  ;;  %v779_v60 = vmax.f32 %v6421_v32, 0.0  ;;  %v713_v32 = vadd.f32 %v6469_v0, %v6388_v23  ;;  %v6481_v9 = vld [vmem:[#allocation2 + $0xc4] ss:$12 sps:$4 sm:$0xff]   ;;  %v1531_v53 = vld [vmem:[#allocation2 + $0x134] sm:$0xf] }
 0x184   : > { %1525 = vst [vmem:[#allocation2 + $0x104] sm:$0xf] %v1524_v6  ;;  %v1520_v61 = vsel %vm6218_vm14, %v1389_v52, %v1519_v42  ;;  %1288 = vst [vmem:[#allocation2 + $0x120] sm:$0xf] %v1287_v46  ;;  %v1410_v7 = vor.u32 %v1409_v39, %v1408_v41  ;;  %v6464_v28 = vrot.slane %v1112_v55, 7  ;;  %v1399_v21 = vrot.slane %v1112_v55, 4  ;;  %v741_v41 = vpop.f32.mrf.mxu0 }
 0x185   : > { %1521 = vst [vmem:[#allocation2 + $0xec] sm:$0xf] %v1520_v61  ;;  %v1400_v62 = vrot.slane %v1115_v57, 5  ;;  %v4708_v63 = vpack.c.bf16 %v779_v60, %v779_v60  ;;  %v734_v47 = vadd.f32 %v6469_v0, %v6413_v50  ;;  %v726_v3 = vadd.f32 %v6469_v0, %v6429_v56  ;;  %v1294_v55 = vld [vmem:[#allocation2 + $0x150] sm:$0xf] }
 0x186   : > { %v1411_v59 = vrot.slane %v1410_v7, 4  ;;  %v1117_v2 = vor.u32 %v1115_v57, %v6464_v28  ;;  %v1118_v29 = vrot.slane %v6464_v28, 4  ;;  %v777_v23 = vmax.f32 %v713_v32, 0.0  ;;  %2256 = vmatmul.mubr.bf16.gmra.mxu1 %v6479_v1  ;;  %v6508_v32 = vld [vmem:[#allocation2 + $0xc0] ss:$12 sps:$4 sm:$0xff]  }
 0x187   : > { %v1401_v12 = vor.u32 %v1400_v62, %v1399_v21  ;;  %940 = vst [vmem:[#allocation2 + $0x130] sm:$0xf] %v4708_v63  ;;  %v1136_v5 = vshrl.u32 %v4708_v63, 16  ;;  %v1139_v14 = vshll.u32 %v4708_v63, 16  ;;  %v782_v18 = vmax.f32 %v734_v47, 0.0  ;;  %2263 = vmatprep.mubr.bf16.mxu1 %v6481_v9 }
 0x188   : > { %v1283_v50 = vsel %vm6186_vm11, %v1117_v2, %v1282_v44  ;;  %v780_v19 = vmax.f32 %v726_v3, 0.0  ;;  %v6488_v20 = vadd.f32 %v6469_v0, %v5201_v33  ;;  %v4706_v13 = vpack.c.bf16 %v777_v23, %v777_v23  ;;  %v1290_v44 = vld [vmem:[#allocation2 + $0x138] sm:$0xf] }
 0x189   : > { %1284 = vst [vmem:[#allocation2 + $0x108] sm:$0xf] %v1283_v50  ;;  %v1402_v56 = vrot.slane %v1401_v12, 4  ;;  %v1138_v22 = vrot.slane %v1136_v5, 7  ;;  %v1412_v24 = vrot.slane %v1139_v14, 5  ;;  %v1414_v27 = vrot.slane %v1136_v5, 4 }
 0x18a   : > { %v4711_v25 = vpack.c.bf16 %v782_v18, %v782_v18  ;;  %v4709_v58 = vpack.c.bf16 %v780_v19, %v780_v19  ;;  %v783_v35 = vmax.f32 %v6488_v20, 0.0  ;;  %v6496_v36 = vadd.f32 %v6469_v0, %v728_v34  ;;  %938 = vst [vmem:[#allocation2 + $0x118] sm:$0xf] %v4706_v13  ;;  %v6513_v12 = vld [vmem:[#allocation2 + $0xdc] ss:$12 sps:$4 sm:$0xff]  }
 0x18b   : > { %v1141_v43 = vor.u32 %v1139_v14, %v1138_v22  ;;  %v1413_v4 = vsel %vm6199_vm12, %v1411_v59, %v1412_v24  ;;  %v1415_v33 = vor.u32 %v1414_v27, %v1412_v24  ;;  %v5572_v40 = vld [vmem:[#allocation2 + $0xf8] ss:$12 sps:$4 sm:$0xff]   ;;  %v1120_v30 = vshrl.u32 %v4706_v13, 16  ;;  %v1527_v5 = vld [vmem:[#allocation2 + $0x11c] sm:$0xf] }
 0x18c   : > { %1530 = vst [vmem:[#allocation2 + $0x128] sm:$0xf] %v1413_v4  ;;  %v1123_v42 = vshll.u32 %v4706_v13, 16  ;;  %943 = vst [vmem:[#allocation2 + $0x154] sm:$0xf] %v4711_v25  ;;  %v1160_v48 = vshrl.u32 %v4711_v25, 16  ;;  %v742_v4 = vadd.f32 %v6469_v0, %v741_v41 }
 0x18d   : > { %v1163_v49 = vshll.u32 %v4711_v25, 16  ;;  %941 = vst [vmem:[#allocation2 + $0x13c] sm:$0xf] %v4709_v58  ;;  %v1142_v52 = vsel %vm6207_vm13, %v1134_v16, %v1141_v43  ;;  %v1416_v39 = vrot.slane %v1415_v33, 4  ;;  %v1144_v6 = vshrl.u32 %v4709_v58, 16  ;;  %v5205_v16 = vpop.f32.mrf.mxu0 }
 0x18e   : > { %v1147_v46 = vshll.u32 %v4709_v58, 16  ;;  %v5570_v57 = vld [vmem:[#allocation2 + $0xe0] ss:$12 sps:$4 sm:$0xff]   ;;  %1289 = vst [vmem:[#allocation2 + $0x12c] sm:$0xf] %v1142_v52  ;;  %v1122_v60 = vrot.slane %v1120_v30, 7  ;;  %2264 = vmatmul.mubr.bf16.gmra.mxu1 %v6508_v32  ;;  %v4712_v25 = vpack.c.bf16 %v783_v35, %v783_v35  ;;  %v750_v43 = vadd.f32 %v6469_v0, %v6483_v17 }
 0x18f   : > { %v1403_v34 = vrot.slane %v1123_v42, 5  ;;  %v1405_v61 = vrot.slane %v1120_v30, 4  ;;  %v6502_v7 = vrot.slane %v1160_v48, 7  ;;  %v1532_v21 = vsel %vm6218_vm14, %v1416_v39, %v1531_v53  ;;  %5238 = vmatprep.mubr.bf16.mxu0 %v5570_v57  ;;  %2271 = vmatprep.mubr.bf16.mxu1 %v6513_v12  ;;  %v744_v58 = vpop.f32.mrf.mxu0 }
 0x190   : > { %v1426_v62 = vrot.slane %v1160_v48, 4  ;;  %v1427_v31 = vrot.slane %v1163_v49, 5  ;;  %v6506_v63 = vrot.slane %v1144_v6, 7  ;;  %1533 = vst [vmem:[#allocation2 + $0x134] sm:$0xf] %v1532_v21  ;;  %v1125_v47 = vor.u32 %v1123_v42, %v1122_v60  ;;  %5239 = vmatmul.mubr.bf16.gmra.mxu0 %v5572_v40 }
 0x191   : > { %v1404_v59 = vsel %vm6199_vm12, %v1402_v56, %v1403_v34  ;;  %v1406_v2 = vor.u32 %v1405_v61, %v1403_v34  ;;  %v1165_v3 = vor.u32 %v1163_v49, %v6502_v7  ;;  %v1166_v14 = vrot.slane %v6502_v7, 4  ;;  %944 = vst [vmem:[#allocation2 + $0x160] sm:$0xf] %v4712_v25  ;;  %v6542_v60 = vld [vmem:[#allocation2 + $0xf4] ss:$12 sps:$4 sm:$0xff]  }
 0x192   : > { %1526 = vst [vmem:[#allocation2 + $0x110] sm:$0xf] %v1404_v59  ;;  %v1428_v23 = vor.u32 %v1427_v31, %v1426_v62  ;;  %v1149_v50 = vor.u32 %v1147_v46, %v6506_v63  ;;  %v1150_v18 = vrot.slane %v6506_v63, 4  ;;  %v1126_v19 = vsel %vm6207_vm13, %v1118_v29, %v1125_v47 }
 0x193   : > { %v1407_v20 = vrot.slane %v1406_v2, 4  ;;  %v1295_v56 = vsel %vm6186_vm11, %v1165_v3, %v1294_v55  ;;  %v1417_v22 = vrot.slane %v1144_v6, 4  ;;  %1285 = vst [vmem:[#allocation2 + $0x114] sm:$0xf] %v1126_v19  ;;  %v1418_v13 = vrot.slane %v1147_v46, 5 }
 0x194   : > { %1296 = vst [vmem:[#allocation2 + $0x150] sm:$0xf] %v1295_v56  ;;  %v1429_v24 = vrot.slane %v1428_v23, 4  ;;  %v1291_v27 = vsel %vm6186_vm11, %v1149_v50, %v1290_v44  ;;  %v781_v29 = vmax.f32 %v6496_v36, 0.0  ;;  %v1168_v53 = vshrl.u32 %v4712_v25, 16 }
 0x195   : > { %v1528_v28 = vsel %vm6218_vm14, %v1407_v20, %v1527_v5  ;;  %1292 = vst [vmem:[#allocation2 + $0x138] sm:$0xf] %v1291_v27  ;;  %v1419_v33 = vor.u32 %v1418_v13, %v1417_v22  ;;  %v1171_v40 = vshll.u32 %v4712_v25, 16  ;;  %v6535_v30 = vadd.f32 %v6469_v0, %v5205_v16  ;;  %v6540_v36 = vld [vmem:[#allocation2 + $0xd8] ss:$12 sps:$4 sm:$0xff]  }
 0x196   : > { %1529 = vst [vmem:[#allocation2 + $0x11c] sm:$0xf] %v1528_v28  ;;  %v4710_v35 = vpack.c.bf16 %v781_v29, %v781_v29  ;;  %v786_v42 = vmax.f32 %v750_v43, 0.0  ;;  %v784_v48 = vmax.f32 %v742_v4, 0.0  ;;  %v6538_v49 = vadd.f32 %v6469_v0, %v744_v58  ;;  %v1539_v0 = vld [vmem:[#allocation2 + $0x164] sm:$0xf]  ;;  %2272 = vmatmul.mubr.bf16.gmra.mxu1 %v6540_v36 }
 0x197   : > { %v1420_v52 = vrot.slane %v1419_v33, 4  ;;  %v1170_v17 = vrot.slane %v1168_v53, 7  ;;  %v1430_v39 = vrot.slane %v1171_v40, 5  ;;  %v1432_v41 = vrot.slane %v1168_v53, 4  ;;  %2279 = vmatprep.mubr.bf16.mxu1 %v6542_v60  ;;  %v1535_v2 = vld [vmem:[#allocation2 + $0x14c] sm:$0xf] }
 0x198   : > { %942 = vst [vmem:[#allocation2 + $0x148] sm:$0xf] %v4710_v35  ;;  %v1152_v55 = vshrl.u32 %v4710_v35, 16  ;;  %v1155_v6 = vshll.u32 %v4710_v35, 16  ;;  %v4715_v46 = vpack.c.bf16 %v786_v42, %v786_v42  ;;  %v4713_v57 = vpack.c.bf16 %v784_v48, %v784_v48  ;;  %v1302_v5 = vld [vmem:[#allocation2 + $0x180] sm:$0xf] }
 0x199   : > { %v1173_v34 = vor.u32 %v1171_v40, %v1170_v17  ;;  %v1431_v61 = vsel %vm6199_vm12, %v1429_v24, %v1430_v39  ;;  %v1433_v7 = vor.u32 %v1432_v41, %v1430_v39  ;;  %v787_v44 = vmax.f32 %v6535_v30, 0.0  ;;  %v5580_v50 = vld [vmem:[#allocation2 + $0x128] ss:$12 sps:$4 sm:$0xff]   ;;  %v6564_v30 = vld [vmem:[#allocation2 + $0xf0] ss:$12 sps:$4 sm:$0xff]  }
 0x19a   : > { %1538 = vst [vmem:[#allocation2 + $0x158] sm:$0xf] %v1431_v61  ;;  %v1154_v21 = vrot.slane %v1152_v55, 7  ;;  %v1421_v62 = vrot.slane %v1155_v6, 5  ;;  %v1423_v31 = vrot.slane %v1152_v55, 4  ;;  %v1192_v16 = vshrl.u32 %v4715_v46, 16 }
 0x19b   : > { %947 = vst [vmem:[#allocation2 + $0x184] sm:$0xf] %v4715_v46  ;;  %945 = vst [vmem:[#allocation2 + $0x16c] sm:$0xf] %v4713_v57  ;;  %v1174_v47 = vsel %vm6207_vm13, %v1166_v14, %v1173_v34  ;;  %v1434_v59 = vrot.slane %v1433_v7, 4  ;;  %v1195_v3 = vshll.u32 %v4715_v46, 16  ;;  %v4716_v42 = vpack.c.bf16 %v787_v44, %v787_v44 }
 0x19c   : > { %v1176_v23 = vshrl.u32 %v4713_v57, 16  ;;  %1297 = vst [vmem:[#allocation2 + $0x15c] sm:$0xf] %v1174_v47  ;;  %v1157_v19 = vor.u32 %v1155_v6, %v1154_v21  ;;  %v1422_v20 = vsel %vm6199_vm12, %v1420_v52, %v1421_v62  ;;  %v1424_v56 = vor.u32 %v1423_v31, %v1421_v62  ;;  %v342_v58 = vld [vmem:[#allocation2 + $0x14] sm:$0x8] }
 0x19d   : > { %v6553_v22 = vrot.slane %v1192_v16, 7  ;;  %v5579_v24 = vld [vmem:[#allocation2 + $0x110] ss:$12 sps:$4 sm:$0xff]   ;;  %v1540_v27 = vsel %vm6218_vm14, %v1434_v59, %v1539_v0  ;;  %1534 = vst [vmem:[#allocation2 + $0x140] sm:$0xf] %v1422_v20  ;;  %v1444_v14 = vrot.slane %v1192_v16, 4 }
 0x19e   : > { %v1445_v13 = vrot.slane %v1195_v3, 5  ;;  %v6557_v25 = vrot.slane %v1176_v23, 7  ;;  %1541 = vst [vmem:[#allocation2 + $0x164] sm:$0xf] %v1540_v27  ;;  %v1158_v28 = vsel %vm6207_vm13, %v1150_v18, %v1157_v19  ;;  %v1425_v29 = vrot.slane %v1424_v56, 4  ;;  %5242 = vmatprep.mubr.bf16.mxu0 %v5579_v24  ;;  %2280 = vmatmul.mubr.bf16.gmra.mxu1 %v6564_v30 }
 0x19f   : > { %v1197_v43 = vor.u32 %v1195_v3, %v6553_v22  ;;  %v1298_v4 = vld [vmem:[#allocation2 + $0x168] sm:$0xf]  ;;  %1293 = vst [vmem:[#allocation2 + $0x144] sm:$0xf] %v1158_v28  ;;  %v1179_v53 = vshll.u32 %v4713_v57, 16  ;;  %v1435_v40 = vrot.slane %v1176_v23, 4  ;;  %5243 = vmatmul.mubr.bf16.gmra.mxu0 %v5580_v50 }
 0x1a0   : > { %v1446_v33 = vor.u32 %v1445_v13, %v1444_v14  ;;  %v1536_v35 = vsel %vm6218_vm14, %v1425_v29, %v1535_v2  ;;  %v785_v18 = vmax.f32 %v6538_v49, 0.0  ;;  %v6571_v48 = vld [vmem:[#allocation2 + $0x10c] ss:$12 sps:$4 sm:$0xff]   ;;  %v343_v39 = vsel %vm6106_vm5, 0, %v342_v58  ;;  %948 = vst [vmem:[#allocation2 + $0x190] sm:$0xf] %v4716_v42 }
 0x1a1   : > { %v1303_v63 = vsel %vm6186_vm11, %v1197_v43, %v1302_v5  ;;  %1537 = vst [vmem:[#allocation2 + $0x14c] sm:$0xf] %v1536_v35  ;;  %v1181_v52 = vor.u32 %v1179_v53, %v6557_v25  ;;  %v1436_v17 = vrot.slane %v1179_v53, 5  ;;  %v1200_v55 = vshrl.u32 %v4716_v42, 16  ;;  %2287 = vmatprep.mubr.bf16.mxu1 %v6571_v48  ;;  %344 = vst [vmem:[#allocation2 + $0x14] sm:$0x8] %v343_v39 }
 0x1a2   : > { %1304 = vst [vmem:[#allocation2 + $0x180] sm:$0xf] %v1303_v63  ;;  %v1447_v41 = vrot.slane %v1446_v33, 4  ;;  %v1203_v6 = vshll.u32 %v4716_v42, 16  ;;  %v4714_v46 = vpack.c.bf16 %v785_v18, %v785_v18  ;;  %v1198_v49 = vrot.slane %v6553_v22, 4  ;;  %v6606_v53 = vld [vmem:[#allocation2 + $0xc] sm:$0xff] }
 0x1a3   : > { %v1299_v57 = vsel %vm6186_vm11, %v1181_v52, %v1298_v4  ;;  %v1437_v34 = vor.u32 %v1436_v17, %v1435_v40  ;;  %v1202_v61 = vrot.slane %v1200_v55, 7  ;;  %v1450_v0 = vrot.slane %v1200_v55, 4  ;;  %v1547_v31 = vld [vmem:[#allocation2 + $0x194] sm:$0xf]  ;;  %v6586_v23 = vld [vmem:[#allocation2 + $0x124] ss:$12 sps:$4 sm:$0xff]  }
 0x1a4   : > { %1300 = vst [vmem:[#allocation2 + $0x168] sm:$0xf] %v1299_v57  ;;  %v1448_v7 = vrot.slane %v1203_v6, 5  ;;  %946 = vst [vmem:[#allocation2 + $0x178] sm:$0xf] %v4714_v46  ;;  %v1184_v44 = vshrl.u32 %v4714_v46, 16  ;;  %v4527_v40 = vcombine.high %v1550_v45, %v6606_v53  ;;  %v4526_v63 = vcombine.low %v1550_v45, %v6606_v53 }
 0x1a5   : > { %v1182_v21 = vrot.slane %v6557_v25, 4  ;;  %v1438_v62 = vrot.slane %v1437_v34, 4  ;;  %v1187_v16 = vshll.u32 %v4714_v46, 16  ;;  %v1205_v47 = vor.u32 %v1203_v6, %v1202_v61  ;;  %v5590_v15 = vld [vmem:[#allocation2 + $0x158] ss:$12 sps:$4 sm:$0xff]   ;;  %v5652_v55 = vld [vmem:[#allocation8 + $0x220] sm:$0xff]  }
 0x1a6   : > { %v1449_v59 = vsel %vm6199_vm12, %v1447_v41, %v1448_v7  ;;  %v1451_v2 = vor.u32 %v1450_v0, %v1448_v7  ;;  %v1186_v3 = vrot.slane %v1184_v44, 7  ;;  %v6584_v5 = vld [vmem:[#allocation2 + $0x108] ss:$12 sps:$4 sm:$0xff]   ;;  %v1441_v19 = vrot.slane %v1184_v44, 4  ;;  %v1543_v58 = vld [vmem:[#allocation2 + $0x17c] sm:$0xf] }
 0x1a7   : > { %1546 = vst [vmem:[#allocation2 + $0x188] sm:$0xf] %v1449_v59  ;;  %v1439_v50 = vrot.slane %v1187_v16, 5  ;;  %v1206_v20 = vsel %vm6207_vm13, %v1198_v49, %v1205_v47  ;;  %2288 = vmatmul.mubr.bf16.gmra.mxu1 %v6584_v5  ;;  %v6600_v29 = vld [vmem:[#allocation2 + $0x120] ss:$12 sps:$4 sm:$0xff]   ;;  %v5643_v39 = vld [vmem:[#allocation8 + $0x228] sm:$0xff]  }
 0x1a8   : > { %v1452_v56 = vrot.slane %v1451_v2, 4  ;;  %v1189_v22 = vor.u32 %v1187_v16, %v1186_v3  ;;  %v5589_v24 = vld [vmem:[#allocation2 + $0x140] ss:$12 sps:$4 sm:$0xff]   ;;  %1305 = vst [vmem:[#allocation2 + $0x18c] sm:$0xf] %v1206_v20  ;;  %2295 = vmatprep.mubr.bf16.mxu1 %v6586_v23  ;;  %v5674_v44 = vld [vmem:[#allocation8 + $0x208] sm:$0xff]  }
 0x1a9   : > { %v1440_v27 = vsel %vm6199_vm12, %v1438_v62, %v1439_v50  ;;  %v1442_v14 = vor.u32 %v1441_v19, %v1439_v50  ;;  %5246 = vmatprep.mubr.bf16.mxu0 %v5589_v24  ;;  %v6602_v43 = vld [vmem:[#allocation2 + $0x13c] ss:$12 sps:$4 sm:$0xff]   ;;  %v6609_v35 = vld [vmem:[#allocation2 + $0x138] ss:$12 sps:$4 sm:$0xff]   ;;  %v6611_v54 = vld [vmem:[#allocation2 + $0x154] ss:$12 sps:$4 sm:$0xff]  }
 0x1aa   : > { %v1548_v13 = vsel %vm6218_vm14, %v1452_v56, %v1547_v31  ;;  %v1190_v25 = vsel %vm6207_vm13, %v1182_v21, %v1189_v22  ;;  %1542 = vst [vmem:[#allocation2 + $0x170] sm:$0xf] %v1440_v27  ;;  %5247 = vmatmul.mubr.bf16.gmra.mxu0 %v5590_v15  ;;  %v5636_v42 = vld [vmem:[#allocation8 + $0x230] sm:$0xff]   ;;  %v5608_v18 = vld [vmem:[#allocation2 + $0x1c] ss:$12 sps:$4 sm:$0xff]   ;;  %v5676_v21 = vld [vmem:[#allocation8 + $0x200] sm:$0xff]  }
 0x1ab   : > { %1549 = vst [vmem:[#allocation2 + $0x194] sm:$0xf] %v1548_v13  ;;  %1301 = vst [vmem:[#allocation2 + $0x174] sm:$0xf] %v1190_v25  ;;  %v1443_v28 = vrot.slane %v1442_v14, 4  ;;  %v5661_v49 = vld [vmem:[#allocation8 + $0x218] sm:$0xff]  }
 0x1ac   : > { %v6616_v52 = vld [vmem:[#allocation2 + $0x150] ss:$12 sps:$4 sm:$0xff]   ;;  %v6619_v17 = vld [vmem:[#allocation2 + $0x16c] ss:$12 sps:$4 sm:$0xff]   ;;  %v6623_v6 = vld [vmem:[#allocation2 + $0x34] ss:$12 sps:$4 sm:$0xff]  }
 0x1ad   : > { %v1544_v38 = vsel %vm6218_vm14, %v1443_v28, %v1543_v58  ;;  %v5613_v41 = vld [vmem:[#allocation2 + $0x18] ss:$12 sps:$4 sm:$0xff]   ;;  %v6629_v57 = vld [vmem:[#allocation2 + $0x30] ss:$12 sps:$4 sm:$0xff]   ;;  %v5638_v61 = vld [vmem:[#allocation2 + $0x8] ss:$12 sps:$4 sm:$0xff]  }
 0x1ae   : > { %1545 = vst [vmem:[#allocation2 + $0x17c] sm:$0xf] %v1544_v38  ;;  %v5670_v34 = vld [vmem:[#allocation8 + $0x210] sm:$0xff]   ;;  %v5736_v0 = vld [vmem:[#allocation2 + $0x4c] ss:$12 sps:$4 sm:$0xff]   ;;  %v5653_v56 = vld [vmem:[#allocation8 + $0x1e0] sm:$0xff]  }
 0x1af   : > { %2296 = vmatmul.mubr.bf16.gmra.mxu1 %v6600_v29  ;;  %v5637_v7 = vld [vmem:[#allocation2 + $0x180] ss:$12 sps:$4 sm:$0xff]   ;;  %v5737_v31 = vld [vmem:[#allocation2 + $0x48] ss:$12 sps:$4 sm:$0xff]   ;;  %v5738_v59 = vld [vmem:[#allocation2 + $0x64] ss:$12 sps:$4 sm:$0xff]  }
 0x1b0   : > { %2303 = vmatprep.mubr.bf16.mxu1 %v6602_v43  ;;  %v5641_v62 = vld [vmem:[#allocation8 + $0x1b8] sm:$0xff]   ;;  %v5644_v47 = vld [vmem:[#allocation8 + $0x1f0] sm:$0xff]   ;;  %v5648_v15 = vld [vmem:[#allocation8 + $0x1e8] sm:$0xff]  }
 0x1b1   : > { %v5640_v16 = vld [vmem:[#allocation2 + $0x20] ss:$12 sps:$4 sm:$0xff]   ;;  %v5642_v2 = vld [vmem:[#allocation2 + $0x38] ss:$12 sps:$4 sm:$0xff]   ;;  %v5645_v20 = vld [vmem:[#allocation2 + $0x50] ss:$12 sps:$4 sm:$0xff]  }
 0x1b2   : > { %v5599_v4 = vld [vmem:[#allocation2 + $0x188] ss:$12 sps:$4 sm:$0xff]   ;;  %v5646_v3 = vld [vmem:[#allocation8 + $0x1b0] sm:$0xff]   ;;  %v5650_v50 = vld [vmem:[#allocation8 + $0x1a8] sm:$0xff]  }
 0x1b3   : > { %v6625_v46 = vld [vmem:[#allocation2 + $0x168] ss:$12 sps:$4 sm:$0xff]   ;;  %v5739_v19 = vld [vmem:[#allocation2 + $0x60] ss:$12 sps:$4 sm:$0xff]   ;;  %v5741_v25 = vld [vmem:[#allocation2 + $0x78] ss:$12 sps:$4 sm:$0xff]  }
 0x1b4   : > { %v5740_v22 = vld [vmem:[#allocation2 + $0x7c] ss:$12 sps:$4 sm:$0xff]   ;;  %v5655_v27 = vld [vmem:[#allocation8 + $0x1a0] sm:$0xff]   ;;  %v5649_v58 = vld [vmem:[#allocation2 + $0x80] ss:$12 sps:$4 sm:$0xff]  }
 0x1b5   : > { %v5598_v33 = vld [vmem:[#allocation2 + $0x170] ss:$12 sps:$4 sm:$0xff]   ;;  %v5647_v24 = vld [vmem:[#allocation2 + $0x68] ss:$12 sps:$4 sm:$0xff]   ;;  %v5662_v28 = vld [vmem:[#allocation8 + $0x1d0] sm:$0xff]  }
 0x1b6   : > { %5250 = vmatprep.mubr.bf16.mxu0 %v5598_v33  ;;  %v5657_v14 = vld [vmem:[#allocation8 + $0x1d8] sm:$0xff]   ;;  %v5651_v38 = vld [vmem:[#allocation2 + $0x98] ss:$12 sps:$4 sm:$0xff]  }
 0x1b7   : > { %5251 = vmatmul.mubr.bf16.gmra.mxu0 %v5599_v4  ;;  %2304 = vmatmul.mubr.bf16.gmra.mxu1 %v6609_v35  ;;  %v5659_v13 = vld [vmem:[#allocation8 + $0x198] sm:$0xff]   ;;  %v5664_v45 = vld [vmem:[#allocation8 + $0x190] sm:$0xff]   ;;  %v5666_v4 = vld [vmem:[#allocation8 + $0x1c8] sm:$0xff]  }
 0x1b8   : > { %2929 = vmatprep.mubr.bf16.mxu0 %v4527_v40  ;;  %2311 = vmatprep.mubr.bf16.mxu1 %v6611_v54  ;;  %v5668_v33 = vld [vmem:[#allocation8 + $0x188] sm:$0xff]  }
 0x1b9   : > { %v5654_v40 = vld [vmem:[#allocation2 + $0xb0] ss:$12 sps:$4 sm:$0xff]  }
 0x1bf   : > { %2930 = vmatmul.mubr.bf16.vlgmr.msra.gmra.mxu0 %v4526_v63  ;;  %2312 = vmatmul.mubr.bf16.gmra.mxu1 %v6616_v52  ;;  %v5671_v63 = vld [vmem:[#allocation8 + $0x1c0] sm:$0xff]  }
 0x1c0   : > { %2937 = vmatprep.mubr.bf16.mxu0 %v5608_v18  ;;  %5303 = vmatpush3.bf16.msra.mxu0 %v6393_v26  ;;  %v5634_v26 = vld [vmem:[#allocation2 + $0x184] ss:$12 sps:$4 sm:$0xff]   ;;  %v5658_v18 = vld [vmem:[#allocation2 + $0xe0] ss:$12 sps:$4 sm:$0xff]  }
 0x1c1   : > { %5304 = vmatprep.subr.bf16.mxu0 %v5636_v42  ;;  %2319 = vmatprep.mubr.bf16.mxu1 %v6619_v17 }
 0x1c4   : > { %5305 = vmatpush3.bf16.msra.mxu0 %v5636_v42  ;;  %v5656_v42 = vld [vmem:[#allocation2 + $0xc8] ss:$12 sps:$4 sm:$0xff]  }
 0x1c5   : > { %5306 = vmatprep.subr.bf16.mxu0 %v5643_v39 }
 0x1c7   : > { %2938 = vmatmul.mubr.bf16.gmra.mxu0 %v5613_v41  ;;  %2320 = vmatmul.mubr.bf16.gmra.mxu1 %v6625_v46  ;;  %v5667_v41 = vld [vmem:[#allocation2 + $0x140] ss:$12 sps:$4 sm:$0xff]  }
 0x1c8   : > { %2945 = vmatprep.mubr.bf16.mxu0 %v6623_v6  ;;  %5307 = vmatpush3.bf16.msra.mxu0 %v5643_v39  ;;  %v5660_v39 = vld [vmem:[#allocation2 + $0xf8] ss:$12 sps:$4 sm:$0xff]  }
 0x1c9   : > { %5308 = vmatprep.subr.bf16.mxu0 %v5652_v55  ;;  %2327 = vmatprep.mubr.bf16.mxu1 %v5634_v26 }
 0x1cc   : > { %5309 = vmatpush3.bf16.msra.mxu0 %v5652_v55 }
 0x1cd   : > { %5310 = vmatprep.subr.bf16.mxu0 %v5661_v49 }
 0x1cf   : > { %2946 = vmatmul.mubr.bf16.gmra.mxu0 %v6629_v57  ;;  %2328 = vmatmul.mubr.bf16.gmra.mxu1 %v5637_v7  ;;  %v5682_v7 = vld [vmem:[#allocation2 + $0x64] ss:$12 sps:$4 sm:$0xff]  }
 0x1d0   : > { %2953 = vmatprep.mubr.bf16.mxu0 %v5736_v0  ;;  %5311 = vmatpush3.bf16.msra.mxu0 %v5661_v49 }
 0x1d1   : > { %5312 = vmatprep.subr.bf16.mxu0 %v5670_v34  ;;  %5270 = vmatprep.mubr.bf16.mxu1 %v5638_v61 }
 0x1d4   : > { %5313 = vmatpush3.bf16.msra.mxu0 %v5670_v34 }
 0x1d5   : > { %5314 = vmatprep.subr.bf16.mxu0 %v5674_v44 }
 0x1d7   : > { %2954 = vmatmul.mubr.bf16.gmra.mxu0 %v5737_v31  ;;  %5271 = vmatmul.mubr.bf16.vlgmr.msra.gmra.mxu1 %v5640_v16 }
 0x1d8   : > { %2961 = vmatprep.mubr.bf16.mxu0 %v5738_v59  ;;  %5315 = vmatpush3.bf16.msra.mxu0 %v5674_v44  ;;  %v5686_v59 = vld [vmem:[#allocation2 + $0x60] ss:$12 sps:$4 sm:$0xff]  }
 0x1d9   : > { %5316 = vmatprep.subr.bf16.mxu0 %v5676_v21  ;;  %5023 = vmatpush3.bf16.msra.mxu1 %v5641_v62 }
 0x1da   : > { %5274 = vmatprep.mubr.bf16.mxu1 %v5642_v2  ;;  %5024 = vmatprep.subr.bf16.mxu1 %v5644_v47 }
 0x1dc   : > { %5317 = vmatpush3.bf16.msra.mxu0 %v5676_v21 }
 0x1dd   : > { %5025 = vmatpush3.bf16.msra.mxu1 %v5646_v3  ;;  %v5687_v3 = vld [vmem:[#allocation2 + $0x7c] ss:$12 sps:$4 sm:$0xff]  }
 0x1de   : > { %5026 = vmatprep.subr.bf16.mxu1 %v5648_v15 }
 0x1df   : > { %2962 = vmatmul.mubr.bf16.gmra.mxu0 %v5739_v19  ;;  %5275 = vmatmul.mubr.bf16.gmra.mxu1 %v5645_v20  ;;  %v393_v19 = vld [vmem:[#allocation2 + $0x1ac] sm:$0x8] }
 0x1e0   : > { %2969 = vmatprep.mubr.bf16.mxu0 %v5740_v22  ;;  %5278 = vmatprep.mubr.bf16.mxu1 %v5647_v24  ;;  %v394_v22 = vsel %vm6106_vm5, 0, %v393_v19 }
 0x1e1   : > { %5027 = vmatpush3.bf16.msra.mxu1 %v5650_v50  ;;  %395 = vst [vmem:[#allocation2 + $0x1ac] sm:$0x8] %v394_v22 }
 0x1e2   : > { %5028 = vmatprep.subr.bf16.mxu1 %v5653_v56 }
 0x1e5   : > { %5029 = vmatpush3.bf16.msra.mxu1 %v5655_v27 }
 0x1e6   : > { %5030 = vmatprep.subr.bf16.mxu1 %v5657_v14 }
 0x1e7   : > { %2970 = vmatmul.mubr.bf16.gmra.mxu0 %v5741_v25  ;;  %5279 = vmatmul.mubr.bf16.gmra.mxu1 %v5649_v58  ;;  %v5694_v58 = vld [vmem:[#allocation2 + $0x94] ss:$12 sps:$4 sm:$0xff]  }
 0x1e8   : > { %2977 = vmatprep.mubr.bf16.mxu0 %v6415_v51  ;;  %5282 = vmatprep.mubr.bf16.mxu1 %v5651_v38  ;;  %v5673_v51 = vld [vmem:[#allocation8 + $0x180] sm:$0xff]  }
 0x1e9   : > { %5031 = vmatpush3.bf16.msra.mxu1 %v5659_v13  ;;  %v5691_v13 = vld [vmem:[#allocation2 + $0x78] ss:$12 sps:$4 sm:$0xff]  }
 0x1ea   : > { %5032 = vmatprep.subr.bf16.mxu1 %v5662_v28 }
 0x1ed   : > { %5033 = vmatpush3.bf16.msra.mxu1 %v5664_v45  ;;  %v336_v45 = vld [vmem:[#allocation2 + $0x198] sm:$0x1] }
 0x1ee   : > { %5034 = vmatprep.subr.bf16.mxu1 %v5666_v4 }
 0x1ef   : > { %2978 = vmatmul.mubr.bf16.gmra.mxu0 %v6433_v10  ;;  %5283 = vmatmul.mubr.bf16.gmra.mxu1 %v5654_v40  ;;  %v5663_v10 = vld [vmem:[#allocation2 + $0x110] ss:$12 sps:$4 sm:$0xff]   ;;  %v5675_v40 = vld [vmem:[#allocation2 + $0x38] ss:$12 sps:$4 sm:$0xff]  }
 0x1f0   : > { %2985 = vmatprep.mubr.bf16.mxu0 %v6444_v11  ;;  %5286 = vmatprep.mubr.bf16.mxu1 %v5656_v42  ;;  %v5665_v11 = vld [vmem:[#allocation2 + $0x128] ss:$12 sps:$4 sm:$0xff]   ;;  %v5692_v42 = vld [vmem:[#allocation2 + $0x90] ss:$12 sps:$4 sm:$0xff]  }
 0x1f1   : > { %5035 = vmatpush3.bf16.msra.mxu1 %v5668_v33  ;;  %v337_v33 = vsel %vm6083_vm2, 0, %v336_v45 }
 0x1f2   : > { %5036 = vmatprep.subr.bf16.mxu1 %v5671_v63  ;;  %338 = vst [vmem:[#allocation2 + $0x198] sm:$0x1] %v337_v33 }
 0x1f5   : > { %5037 = vmatpush3.bf16.msra.mxu1 %v5673_v51 }
 0x1f7   : > { %2986 = vmatmul.mubr.bf16.gmra.mxu0 %v6479_v1  ;;  %5287 = vmatmul.mubr.bf16.gmra.mxu1 %v5658_v18  ;;  %v5669_v1 = vld [vmem:[#allocation2 + $0x158] ss:$12 sps:$4 sm:$0xff]  }
 0x1f8   : > { %2993 = vmatprep.mubr.bf16.mxu0 %v6481_v9  ;;  %5290 = vmatprep.mubr.bf16.mxu1 %v5660_v39  ;;  %v5672_v9 = vld [vmem:[#allocation2 + $0x170] ss:$12 sps:$4 sm:$0xff]   ;;  %v5699_v39 = vld [vmem:[#allocation2 + $0xac] ss:$12 sps:$4 sm:$0xff]  }
 0x1ff   : > { %2994 = vmatmul.mubr.bf16.gmra.mxu0 %v6508_v32  ;;  %5291 = vmatmul.mubr.bf16.gmra.mxu1 %v5663_v10 }
 0x200   : > { %3001 = vmatprep.mubr.bf16.mxu0 %v6513_v12  ;;  %5294 = vmatprep.mubr.bf16.mxu1 %v5665_v11  ;;  %v5677_v12 = vld [vmem:[#allocation2 + $0x4c] ss:$12 sps:$4 sm:$0xff]  }
 0x207   : > { %3002 = vmatmul.mubr.bf16.gmra.mxu0 %v6540_v36  ;;  %5295 = vmatmul.mubr.bf16.gmra.mxu1 %v5667_v41 }
 0x208   : > { %3009 = vmatprep.mubr.bf16.mxu0 %v6542_v60  ;;  %5298 = vmatprep.mubr.bf16.mxu1 %v5669_v1 }
 0x20f   : > { %3010 = vmatmul.mubr.bf16.gmra.mxu0 %v6564_v30  ;;  %5299 = vmatmul.mubr.bf16.gmra.mxu1 %v5672_v9 }
 0x210   : > { %3017 = vmatprep.mubr.bf16.mxu0 %v6571_v48  ;;  %3765 = vmatprep.mubr.bf16.mxu1 %v6623_v6  ;;  %v5681_v6 = vld [vmem:[#allocation2 + $0x48] ss:$12 sps:$4 sm:$0xff]  }
 0x214   : > { %v4766_v32 = vpop.f32.mrf.mxu1 }
 0x216   : > { %v4767_v36 = vpop.f32.mrf.mxu1 }
 0x217   : > { %3018 = vmatmul.mubr.bf16.gmra.mxu0 %v6584_v5  ;;  %3766 = vmatmul.mubr.bf16.vlgmr.msra.gmra.mxu1 %v6629_v57  ;;  %v4768_v60 = vadd.f32 %v4767_v36, %v4766_v32  ;;  %v5679_v32 = vld [vmem:[#allocation2 + $0x50] ss:$12 sps:$4 sm:$0xff]  }
 0x218   : > { %3025 = vmatprep.mubr.bf16.mxu0 %v6586_v23  ;;  %3773 = vmatprep.mubr.bf16.mxu1 %v5677_v12  ;;  %v5224_v55 = vpop.f32.mrf.mxu0  ;;  %v4769_v26 = vpop.f32.mrf.mxu1 }
 0x21a   : > { %v2370_v30 = vpop.f32.mrf.mxu0  ;;  %v4770_v48 = vpop.f32.mrf.mxu1 }
 0x21b   : > { %v6647_v49 = vadd.f32 %v4768_v60, %v2370_v30  ;;  %v4771_v34 = vadd.f32 %v4770_v48, %v4769_v26  ;;  %v5704_v48 = vld [vmem:[#allocation2 + $0xc4] ss:$12 sps:$4 sm:$0xff]  }
 0x21c   : > { %v5225_v61 = vpop.f32.mrf.mxu0  ;;  %v4772_v5 = vpop.f32.mrf.mxu1 }
 0x21e   : > { %v2373_v23 = vpop.f32.mrf.mxu0  ;;  %v4773_v0 = vpop.f32.mrf.mxu1 }
 0x21f   : > { %3026 = vmatmul.mubr.bf16.gmra.mxu0 %v6600_v29  ;;  %v6651_v57 = vadd.f32 %v4771_v34, %v2373_v23  ;;  %3774 = vmatmul.mubr.bf16.gmra.mxu1 %v5681_v6  ;;  %v4774_v44 = vadd.f32 %v4773_v0, %v4772_v5  ;;  %v5684_v0 = vld [vmem:[#allocation2 + $0x80] ss:$12 sps:$4 sm:$0xff]  }
 0x220   : > { %3033 = vmatprep.mubr.bf16.mxu0 %v6602_v43  ;;  %3781 = vmatprep.mubr.bf16.mxu1 %v5682_v7  ;;  %v4775_v21 = vpop.f32.mrf.mxu1 }
 0x221   : > { %v6653_v62 = vadd.f32 %v5224_v55, %v4774_v44  ;;  %v5697_v55 = vld [vmem:[#allocation2 + $0xa8] ss:$12 sps:$4 sm:$0xff]  }
 0x222   : > { %v4776_v31 = vpop.f32.mrf.mxu1 }
 0x223   : > { %v4777_v47 = vadd.f32 %v4776_v31, %v4775_v21  ;;  %v5685_v21 = vld [vmem:[#allocation2 + $0x98] ss:$12 sps:$4 sm:$0xff]  }
 0x225   : > { %v5228_v16 = vpop.f32.mrf.mxu0  ;;  %v4778_v29 = vpop.f32.mrf.mxu1  ;;  %v6657_v2 = vadd.f32 %v5225_v61, %v4777_v47  ;;  %v5702_v47 = vld [vmem:[#allocation2 + $0xc0] ss:$12 sps:$4 sm:$0xff]  }
 0x227   : > { %3034 = vmatmul.mubr.bf16.gmra.mxu0 %v6609_v35  ;;  %v2386_v43 = vpop.f32.mrf.mxu0  ;;  %3782 = vmatmul.mubr.bf16.gmra.mxu1 %v5686_v59  ;;  %v4779_v15 = vpop.f32.mrf.mxu1 }
 0x228   : > { %3041 = vmatprep.mubr.bf16.mxu0 %v6611_v54  ;;  %3789 = vmatprep.mubr.bf16.mxu1 %v5687_v3  ;;  %v4780_v50 = vadd.f32 %v4779_v15, %v4778_v29 }
 0x229   : > { %v5229_v20 = vpop.f32.mrf.mxu0  ;;  %v4781_v56 = vpop.f32.mrf.mxu1 }
 0x22a   : > { %v6661_v24 = vadd.f32 %v4780_v50, %v2386_v43  ;;  %v5709_v43 = vld [vmem:[#allocation2 + $0xdc] ss:$12 sps:$4 sm:$0xff]  }
 0x22b   : > { %v4782_v35 = vpop.f32.mrf.mxu1  ;;  %v2389_v54 = vpop.f32.mrf.mxu0 }
 0x22c   : > { %v4783_v27 = vadd.f32 %v4782_v35, %v4781_v56  ;;  %v5689_v56 = vld [vmem:[#allocation2 + $0xb0] ss:$12 sps:$4 sm:$0xff]   ;;  %v5690_v35 = vld [vmem:[#allocation2 + $0xc8] ss:$12 sps:$4 sm:$0xff]  }
 0x22d   : > { %v4784_v14 = vpop.f32.mrf.mxu1 }
 0x22e   : > { %v6665_v25 = vadd.f32 %v4783_v27, %v2389_v54 }
 0x22f   : > { %3042 = vmatmul.mubr.bf16.gmra.mxu0 %v6616_v52  ;;  %3790 = vmatmul.mubr.bf16.gmra.mxu1 %v5691_v13  ;;  %v4785_v28 = vpop.f32.mrf.mxu1 }
 0x230   : > { %3049 = vmatprep.mubr.bf16.mxu0 %v6619_v17  ;;  %3797 = vmatprep.mubr.bf16.mxu1 %v5694_v58  ;;  %v4786_v37 = vadd.f32 %v4785_v28, %v4784_v14  ;;  %v5707_v14 = vld [vmem:[#allocation2 + $0xd8] ss:$12 sps:$4 sm:$0xff]   ;;  %v5714_v28 = vld [vmem:[#allocation2 + $0xf4] ss:$12 sps:$4 sm:$0xff]  }
 0x231   : > { %v4787_v38 = vpop.f32.mrf.mxu1 }
 0x232   : > { %v6667_v4 = vadd.f32 %v5228_v16, %v4786_v37 }
 0x233   : > { %v4788_v52 = vpop.f32.mrf.mxu1 }
 0x234   : > { %v4789_v63 = vadd.f32 %v4788_v52, %v4787_v38  ;;  %v5695_v52 = vld [vmem:[#allocation2 + $0xe0] ss:$12 sps:$4 sm:$0xff]  }
 0x236   : > { %v4790_v51 = vpop.f32.mrf.mxu1  ;;  %v6672_v18 = vadd.f32 %v5229_v20, %v4789_v63  ;;  %v5696_v63 = vld [vmem:[#allocation2 + $0xf8] ss:$12 sps:$4 sm:$0xff]  }
 0x237   : > { %3050 = vmatmul.mubr.bf16.gmra.mxu0 %v6625_v46  ;;  %v5232_v17 = vpop.f32.mrf.mxu0  ;;  %3798 = vmatmul.mubr.bf16.gmra.mxu1 %v5692_v42  ;;  %v5680_v46 = vld [vmem:[#allocation2 + $0x68] ss:$12 sps:$4 sm:$0xff]  }
 0x238   : > { %5318 = vmatprep.mubr.bf16.mxu0 %v5675_v40  ;;  %v4791_v11 = vpop.f32.mrf.mxu1  ;;  %3805 = vmatprep.mubr.bf16.mxu1 %v5699_v39 }
 0x239   : > { %v2402_v10 = vpop.f32.mrf.mxu0  ;;  %v4792_v41 = vadd.f32 %v4791_v11, %v4790_v51  ;;  %v5712_v51 = vld [vmem:[#allocation2 + $0xf0] ss:$12 sps:$4 sm:$0xff]   ;;  %v5717_v11 = vld [vmem:[#allocation2 + $0x10c] ss:$12 sps:$4 sm:$0xff]  }
 0x23a   : > { %v4793_v1 = vpop.f32.mrf.mxu1 }
 0x23b   : > { %v5233_v8 = vpop.f32.mrf.mxu0  ;;  %v6674_v9 = vadd.f32 %v4792_v41, %v2402_v10 }
 0x23c   : > { %v4794_v36 = vpop.f32.mrf.mxu1 }
 0x23d   : > { %v2405_v12 = vpop.f32.mrf.mxu0  ;;  %v4795_v60 = vadd.f32 %v4794_v36, %v4793_v1  ;;  %v5700_v36 = vld [vmem:[#allocation2 + $0x110] ss:$12 sps:$4 sm:$0xff]  }
 0x23e   : > { %v4796_v26 = vpop.f32.mrf.mxu1 }
 0x23f   : > { %5319 = vmatmul.mubr.bf16.vlgmr.msra.gmra.mxu0 %v5679_v32  ;;  %v6676_v30 = vadd.f32 %v4795_v60, %v2405_v12  ;;  %3806 = vmatmul.mubr.bf16.gmra.mxu1 %v5697_v55  ;;  %v5701_v60 = vld [vmem:[#allocation2 + $0x128] ss:$12 sps:$4 sm:$0xff]  }
 0x240   : > { %5322 = vmatprep.mubr.bf16.mxu0 %v5680_v46  ;;  %v5236_v34 = vpop.f32.mrf.mxu0  ;;  %v4797_v61 = vpop.f32.mrf.mxu1  ;;  %3813 = vmatprep.mubr.bf16.mxu1 %v5704_v48  ;;  %v5715_v48 = vld [vmem:[#allocation2 + $0x108] ss:$12 sps:$4 sm:$0xff]  }
 0x241   : > { %v4798_v5 = vadd.f32 %v4797_v61, %v4796_v26 }
 0x242   : > { %v2418_v6 = vpop.f32.mrf.mxu0  ;;  %v4799_v23 = vpop.f32.mrf.mxu1 }
 0x243   : > { %v6678_v7 = vadd.f32 %v5232_v17, %v4798_v5 }
 0x244   : > { %v4800_v44 = vpop.f32.mrf.mxu1  ;;  %v5237_v16 = vpop.f32.mrf.mxu0 }
 0x245   : > { %v4801_v31 = vadd.f32 %v4800_v44, %v4799_v23 }
 0x246   : > { %v4802_v29 = vpop.f32.mrf.mxu1  ;;  %v2421_v50 = vpop.f32.mrf.mxu0 }
 0x247   : > { %5323 = vmatmul.mubr.bf16.gmra.mxu0 %v5684_v0  ;;  %v6680_v59 = vadd.f32 %v5233_v8, %v4801_v31  ;;  %3814 = vmatmul.mubr.bf16.gmra.mxu1 %v5702_v47 }
 0x248   : > { %5326 = vmatprep.mubr.bf16.mxu0 %v5685_v21  ;;  %v4803_v3 = vpop.f32.mrf.mxu1  ;;  %3821 = vmatprep.mubr.bf16.mxu1 %v5709_v43 }
 0x249   : > { %v4804_v15 = vadd.f32 %v4803_v3, %v4802_v29  ;;  %v5706_v29 = vld [vmem:[#allocation2 + $0x158] ss:$12 sps:$4 sm:$0xff]  }
 0x24a   : > { %v4805_v19 = vpop.f32.mrf.mxu1 }
 0x24b   : > { %v6682_v20 = vadd.f32 %v4804_v15, %v2418_v6  ;;  %v5720_v6 = vld [vmem:[#allocation2 + $0x124] ss:$12 sps:$4 sm:$0xff]   ;;  %v5718_v15 = vld [vmem:[#allocation2 + $0x120] ss:$12 sps:$4 sm:$0xff]  }
 0x24c   : > { %v4806_v22 = vpop.f32.mrf.mxu1 }
 0x24d   : > { %v4807_v27 = vadd.f32 %v4806_v22, %v4805_v19 }
 0x24e   : > { %v4808_v58 = vpop.f32.mrf.mxu1 }
 0x24f   : > { %5327 = vmatmul.mubr.bf16.gmra.mxu0 %v5689_v56  ;;  %v6684_v13 = vadd.f32 %v4807_v27, %v2421_v50  ;;  %3822 = vmatmul.mubr.bf16.gmra.mxu1 %v5707_v14  ;;  %v5723_v56 = vld [vmem:[#allocation2 + $0x13c] ss:$12 sps:$4 sm:$0xff]  }
 0x250   : > { %v5240_v54 = vpop.f32.mrf.mxu0  ;;  %5330 = vmatprep.mubr.bf16.mxu0 %v5690_v35  ;;  %3829 = vmatprep.mubr.bf16.mxu1 %v5714_v28  ;;  %v4809_v38 = vpop.f32.mrf.mxu1 }
 0x251   : > { %v4810_v45 = vadd.f32 %v4809_v38, %v4808_v58  ;;  %v5711_v38 = vld [vmem:[#allocation2 + $0x188] ss:$12 sps:$4 sm:$0xff]  }
 0x252   : > { %v2434_v37 = vpop.f32.mrf.mxu0  ;;  %v4811_v33 = vpop.f32.mrf.mxu1 }
 0x253   : > { %v6686_v40 = vadd.f32 %v5236_v34, %v4810_v45 }
 0x254   : > { %v5241_v17 = vpop.f32.mrf.mxu0  ;;  %v4812_v42 = vpop.f32.mrf.mxu1 }
 0x255   : > { %v4813_v39 = vadd.f32 %v4812_v42, %v4811_v33 }
 0x256   : > { %v4814_v10 = vpop.f32.mrf.mxu1  ;;  %v2437_v8 = vpop.f32.mrf.mxu0 }
 0x257   : > { %5331 = vmatmul.mubr.bf16.gmra.mxu0 %v5695_v52  ;;  %v6688_v41 = vadd.f32 %v5237_v16, %v4813_v39  ;;  %3830 = vmatmul.mubr.bf16.gmra.mxu1 %v5712_v51  ;;  %v5705_v16 = vld [vmem:[#allocation2 + $0x140] ss:$12 sps:$4 sm:$0xff]   ;;  %v5721_v52 = vld [vmem:[#allocation2 + $0x138] ss:$12 sps:$4 sm:$0xff]  }
 0x258   : > { %5334 = vmatprep.mubr.bf16.mxu0 %v5696_v63  ;;  %3837 = vmatprep.mubr.bf16.mxu1 %v5717_v11  ;;  %v4815_v1 = vpop.f32.mrf.mxu1 }
 0x259   : > { %v4816_v32 = vadd.f32 %v4815_v1, %v4814_v10 }
 0x25a   : > { %v4817_v12 = vpop.f32.mrf.mxu1 }
 0x25b   : > { %v6690_v46 = vadd.f32 %v4816_v32, %v2434_v37 }
 0x25c   : > { %v4818_v26 = vpop.f32.mrf.mxu1 }
 0x25d   : > { %v4819_v34 = vadd.f32 %v4818_v26, %v4817_v12 }
 0x25e   : > { %v4820_v5 = vpop.f32.mrf.mxu1 }
 0x25f   : > { %v5244_v55 = vpop.f32.mrf.mxu0  ;;  %5335 = vmatmul.mubr.bf16.gmra.mxu0 %v5700_v36  ;;  %v6692_v23 = vadd.f32 %v4819_v34, %v2437_v8  ;;  %3838 = vmatmul.mubr.bf16.gmra.mxu1 %v5715_v48  ;;  %v5733_v8 = vld [vmem:[#allocation2 + $0x1a0] ss:$12 sps:$4 sm:$0xff]  }
 0x260   : > { %5338 = vmatprep.mubr.bf16.mxu0 %v5701_v60  ;;  %3845 = vmatprep.mubr.bf16.mxu1 %v5720_v6  ;;  %v4821_v44 = vpop.f32.mrf.mxu1  ;;  %v5724_v60 = vld [vmem:[#allocation2 + $0x150] ss:$12 sps:$4 sm:$0xff]   ;;  %v5729_v34 = vld [vmem:[#allocation2 + $0x16c] ss:$12 sps:$4 sm:$0xff]  }
 0x261   : > { %v2450_v61 = vpop.f32.mrf.mxu0  ;;  %v4822_v21 = vadd.f32 %v4821_v44, %v4820_v5 }
 0x262   : > { %v4823_v31 = vpop.f32.mrf.mxu1 }
 0x263   : > { %v5245_v0 = vpop.f32.mrf.mxu0  ;;  %v6694_v47 = vadd.f32 %v5240_v54, %v4822_v21  ;;  %v5710_v54 = vld [vmem:[#allocation2 + $0x170] ss:$12 sps:$4 sm:$0xff]  }
 0x264   : > { %v4824_v3 = vpop.f32.mrf.mxu1 }
 0x265   : > { %v2453_v43 = vpop.f32.mrf.mxu0  ;;  %v4825_v50 = vadd.f32 %v4824_v3, %v4823_v31  ;;  %v5727_v3 = vld [vmem:[#allocation2 + $0x168] ss:$12 sps:$4 sm:$0xff]  }
 0x267   : > { %5339 = vmatmul.mubr.bf16.gmra.mxu0 %v5705_v16  ;;  %v4826_v19 = vpop.f32.mrf.mxu1  ;;  %v6696_v22 = vadd.f32 %v5241_v17, %v4825_v50  ;;  %3846 = vmatmul.mubr.bf16.gmra.mxu1 %v5718_v15  ;;  %v5726_v17 = vld [vmem:[#allocation2 + $0x154] ss:$12 sps:$4 sm:$0xff]   ;;  %v5732_v50 = vld [vmem:[#allocation2 + $0x184] ss:$12 sps:$4 sm:$0xff]  }
 0x268   : > { %5342 = vmatprep.mubr.bf16.mxu0 %v5706_v29  ;;  %3853 = vmatprep.mubr.bf16.mxu1 %v5723_v56 }
 0x269   : > { %v4827_v27 = vpop.f32.mrf.mxu1 }
 0x26a   : > { %v5248_v35 = vpop.f32.mrf.mxu0  ;;  %v4828_v14 = vadd.f32 %v4827_v27, %v4826_v19 }
 0x26b   : > { %v4829_v28 = vpop.f32.mrf.mxu1 }
 0x26c   : > { %v2466_v58 = vpop.f32.mrf.mxu0  ;;  %v6698_v37 = vadd.f32 %v4828_v14, %v2450_v61 }
 0x26d   : > { %v4830_v45 = vpop.f32.mrf.mxu1 }
 0x26e   : > { %v5249_v33 = vpop.f32.mrf.mxu0  ;;  %v4831_v63 = vadd.f32 %v4830_v45, %v4829_v28 }
 0x26f   : > { %5343 = vmatmul.mubr.bf16.gmra.mxu0 %v5710_v54  ;;  %v4832_v42 = vpop.f32.mrf.mxu1  ;;  %3854 = vmatmul.mubr.bf16.gmra.mxu1 %v5721_v52  ;;  %v3280_v54 = vld [vmem:[#allocation2 + $0x198] sm:$0xff] }
 0x270   : > { %5346 = vmatprep.mubr.bf16.mxu0 %v5711_v38  ;;  %v6700_v51 = vadd.f32 %v4831_v63, %v2453_v43  ;;  %3861 = vmatprep.mubr.bf16.mxu1 %v5726_v17  ;;  %v2469_v10 = vpop.f32.mrf.mxu0  ;;  %v4644_v17 = vcombine.high %v3280_v54, %v6606_v53 }
 0x271   : > { %v4833_v39 = vpop.f32.mrf.mxu1 }
 0x272   : > { %v4834_v11 = vadd.f32 %v4833_v39, %v4832_v42 }
 0x273   : > { %v4835_v1 = vpop.f32.mrf.mxu1 }
 0x274   : > { %v6702_v32 = vadd.f32 %v5244_v55, %v4834_v11 }
 0x275   : > { %v4836_v12 = vpop.f32.mrf.mxu1 }
 0x276   : > { %v4837_v26 = vadd.f32 %v4836_v12, %v4835_v1 }
 0x277   : > { %v6704_v36 = vpop.f32.mrf.mxu0  ;;  %5347 = vmatmul.mubr.bf16.gmra.mxu0 %v5733_v8  ;;  %v4838_v48 = vpop.f32.mrf.mxu1  ;;  %3862 = vmatmul.mubr.bf16.gmra.mxu1 %v5724_v60 }
 0x278   : > { %v6706_v5 = vadd.f32 %v5245_v0, %v4837_v26  ;;  %3869 = vmatprep.mubr.bf16.mxu1 %v5729_v34 }
 0x279   : > { %v2482_v61 = vpop.f32.mrf.mxu0  ;;  %v4839_v6 = vpop.f32.mrf.mxu1 }
 0x27a   : > { %v4840_v21 = vadd.f32 %v4839_v6, %v4838_v48 }
 0x27b   : > { %v6708_v44 = vpop.f32.mrf.mxu0  ;;  %v4841_v31 = vpop.f32.mrf.mxu1 }
 0x27c   : > { %v6710_v16 = vadd.f32 %v4840_v21, %v2466_v58 }
 0x27d   : > { %v2485_v55 = vpop.f32.mrf.mxu0  ;;  %v4842_v29 = vpop.f32.mrf.mxu1 }
 0x27e   : > { %v4843_v15 = vadd.f32 %v4842_v29, %v4841_v31  ;;  %v4643_v29 = vcombine.low %v3280_v54, %v6606_v53 }
 0x27f   : > { %v4902_v43 = vpop.f32.mrf.mxu0  ;;  %v4844_v0 = vpop.f32.mrf.mxu1  ;;  %3870 = vmatmul.mubr.bf16.gmra.mxu1 %v5727_v3 }
 0x280   : > { %v6712_v56 = vadd.f32 %v4843_v15, %v2469_v10  ;;  %3877 = vmatprep.mubr.bf16.mxu1 %v5732_v50  ;;  %v5730_v10 = vld [vmem:[#allocation2 + $0x180] ss:$12 sps:$4 sm:$0xff]  }
 0x281   : > { %v4903_v19 = vpop.f32.mrf.mxu0  ;;  %v4845_v28 = vpop.f32.mrf.mxu1 }
 0x282   : > { %v4904_v27 = vadd.f32 %v4903_v19, %v4902_v43  ;;  %v4846_v38 = vadd.f32 %v4845_v28, %v4844_v0 }
 0x283   : > { %v4905_v14 = vpop.f32.mrf.mxu0  ;;  %v4847_v52 = vpop.f32.mrf.mxu1 }
 0x284   : > { %v2932_v45 = vadd.f32 %v4904_v27, %v6647_v49  ;;  %v6715_v42 = vadd.f32 %v5248_v35, %v4846_v38 }
 0x285   : > { %v4906_v58 = vpop.f32.mrf.mxu0  ;;  %v4848_v11 = vpop.f32.mrf.mxu1 }
 0x286   : > { %v4907_v63 = vadd.f32 %v4906_v58, %v4905_v14  ;;  %v4849_v8 = vadd.f32 %v4848_v11, %v4847_v52 }
 0x287   : > { %v4908_v39 = vpop.f32.mrf.mxu0  ;;  %v4850_v60 = vpop.f32.mrf.mxu1  ;;  %3878 = vmatmul.mubr.bf16.gmra.mxu1 %v5730_v10 }
 0x288   : > { %v2935_v1 = vadd.f32 %v4907_v63, %v6651_v57  ;;  %v6719_v48 = vadd.f32 %v5249_v33, %v4849_v8  ;;  %3885 = vmatprep.mubr.bf16.mxu1 %v4644_v17 }
 0x289   : > { %v4909_v12 = vpop.f32.mrf.mxu0  ;;  %v4851_v34 = vpop.f32.mrf.mxu1 }
 0x28a   : > { %v4910_v26 = vadd.f32 %v4909_v12, %v4908_v39  ;;  %v4852_v6 = vadd.f32 %v4851_v34, %v4850_v60 }
 0x28b   : > { %v4911_v49 = vpop.f32.mrf.mxu0  ;;  %v4853_v31 = vpop.f32.mrf.mxu1 }
 0x28c   : > { %v2940_v35 = vadd.f32 %v4910_v26, %v6653_v62  ;;  %v6723_v3 = vadd.f32 %v4852_v6, %v2482_v61 }
 0x28d   : > { %v4912_v21 = vpop.f32.mrf.mxu0  ;;  %v4854_v15 = vpop.f32.mrf.mxu1 }
 0x28e   : > { %v4913_v43 = vadd.f32 %v4912_v21, %v4911_v49  ;;  %v4855_v50 = vadd.f32 %v4854_v15, %v4853_v31 }
 0x28f   : > { %v4914_v57 = vpop.f32.mrf.mxu0  ;;  %v4856_v0 = vpop.f32.mrf.mxu1  ;;  %3886 = vmatmul.mubr.bf16.gmra.mxu1 %v4643_v29 }
 0x290   : > { %v2943_v19 = vadd.f32 %v4913_v43, %v6657_v2  ;;  %v6726_v14 = vadd.f32 %v4855_v50, %v2485_v55 }
 0x291   : > { %v4915_v33 = vpop.f32.mrf.mxu0  ;;  %v4857_v62 = vpop.f32.mrf.mxu1 }
 0x292   : > { %v4916_v27 = vadd.f32 %v4915_v33, %v4914_v57  ;;  %v4858_v38 = vadd.f32 %v4857_v62, %v4856_v0 }
 0x293   : > { %v4917_v28 = vpop.f32.mrf.mxu0  ;;  %v4859_v54 = vpop.f32.mrf.mxu1 }
 0x294   : > { %v2948_v58 = vadd.f32 %v4916_v27, %v6661_v24  ;;  %v6730_v52 = vadd.f32 %v6704_v36, %v4858_v38 }
 0x295   : > { %v4918_v53 = vpop.f32.mrf.mxu0  ;;  %v4860_v17 = vpop.f32.mrf.mxu1 }
 0x296   : > { %v4919_v61 = vadd.f32 %v4918_v53, %v4917_v28  ;;  %v4861_v2 = vadd.f32 %v4860_v17, %v4859_v54 }
 0x297   : > { %v4920_v63 = vpop.f32.mrf.mxu0  ;;  %v5272_v11 = vpop.f32.mrf.mxu1 }
 0x298   : > { %v2951_v39 = vadd.f32 %v4919_v61, %v6665_v25  ;;  %v6734_v8 = vadd.f32 %v6708_v44, %v4861_v2  ;;  %v6736_v12 = vadd.f32 %v5272_v11, %v2940_v35 }
 0x299   : > { %v4921_v10 = vpop.f32.mrf.mxu0  ;;  %v3092_v60 = vpop.f32.mrf.mxu1 }
 0x29a   : > { %v4922_v55 = vadd.f32 %v4921_v10, %v4920_v63  ;;  %v6738_v26 = vadd.f32 %v3092_v60, %v2932_v45 }
 0x29b   : > { %v4923_v24 = vpop.f32.mrf.mxu0  ;;  %v5273_v34 = vpop.f32.mrf.mxu1 }
 0x29c   : > { %v2956_v36 = vadd.f32 %v4922_v55, %v6667_v4  ;;  %v6741_v21 = vadd.f32 %v5273_v34, %v2943_v19 }
 0x29d   : > { %v4924_v49 = vpop.f32.mrf.mxu0  ;;  %v3095_v31 = vpop.f32.mrf.mxu1 }
 0x29e   : > { %v4925_v6 = vadd.f32 %v4924_v49, %v4923_v24  ;;  %v6743_v29 = vadd.f32 %v3095_v31, %v2935_v1 }
 0x29f   : > { %v4926_v25 = vpop.f32.mrf.mxu0  ;;  %v5276_v35 = vpop.f32.mrf.mxu1 }
 0x2a0   : > { %v2959_v44 = vadd.f32 %v4925_v6, %v6672_v18  ;;  %v6746_v15 = vadd.f32 %v5276_v35, %v2956_v36 }
 0x2a1   : > { %v4927_v43 = vpop.f32.mrf.mxu0  ;;  %v3108_v50 = vpop.f32.mrf.mxu1 }
 0x2a2   : > { %v4928_v57 = vadd.f32 %v4927_v43, %v4926_v25  ;;  %v6748_v33 = vadd.f32 %v3108_v50, %v2948_v58 }
 0x2a3   : > { %v4929_v45 = vpop.f32.mrf.mxu0  ;;  %v5277_v19 = vpop.f32.mrf.mxu1 }
 0x2a4   : > { %v2964_v4 = vadd.f32 %v4928_v57, %v6674_v9  ;;  %v6751_v28 = vadd.f32 %v5277_v19, %v2959_v44 }
 0x2a5   : > { %v4930_v0 = vpop.f32.mrf.mxu0  ;;  %v3111_v62 = vpop.f32.mrf.mxu1 }
 0x2a6   : > { %v4931_v27 = vadd.f32 %v4930_v0, %v4929_v45  ;;  %v6753_v38 = vadd.f32 %v3111_v62, %v2951_v39 }
 0x2a7   : > { %v4932_v1 = vpop.f32.mrf.mxu0  ;;  %v5280_v54 = vpop.f32.mrf.mxu1 }
 0x2a8   : > { %v2967_v18 = vadd.f32 %v4931_v27, %v6676_v30 }
 0x2a9   : > { %v4933_v53 = vpop.f32.mrf.mxu0  ;;  %v3124_v17 = vpop.f32.mrf.mxu1 }
 0x2aa   : > { %v4934_v61 = vadd.f32 %v4933_v53, %v4932_v1  ;;  %v6757_v2 = vadd.f32 %v3124_v17, %v2964_v4 }
 0x2ab   : > { %v4935_v63 = vpop.f32.mrf.mxu0  ;;  %v5281_v10 = vpop.f32.mrf.mxu1 }
 0x2ac   : > { %v2972_v58 = vadd.f32 %v4934_v61, %v6678_v7 }
 0x2ad   : > { %v4936_v9 = vpop.f32.mrf.mxu0  ;;  %v3127_v60 = vpop.f32.mrf.mxu1 }
 0x2ae   : > { %v4937_v11 = vadd.f32 %v4936_v9, %v4935_v63  ;;  %v6759_v55 = vadd.f32 %v5280_v54, %v2972_v58  ;;  %v6762_v36 = vadd.f32 %v3127_v60, %v2967_v18 }
 0x2af   : > { %v4938_v24 = vpop.f32.mrf.mxu0  ;;  %v5284_v49 = vpop.f32.mrf.mxu1 }
 0x2b0   : > { %v2975_v39 = vadd.f32 %v4937_v11, %v6680_v59 }
 0x2b1   : > { %v4939_v30 = vpop.f32.mrf.mxu0  ;;  %v3140_v7 = vpop.f32.mrf.mxu1 }
 0x2b2   : > { %v4940_v34 = vadd.f32 %v4939_v30, %v4938_v24  ;;  %v6764_v6 = vadd.f32 %v5281_v10, %v2975_v39 }
 0x2b3   : > { %v4941_v25 = vpop.f32.mrf.mxu0  ;;  %v5285_v43 = vpop.f32.mrf.mxu1 }
 0x2b4   : > { %v2980_v31 = vadd.f32 %v4940_v34, %v6682_v20 }
 0x2b5   : > { %v4942_v44 = vpop.f32.mrf.mxu0  ;;  %v3143_v50 = vpop.f32.mrf.mxu1 }
 0x2b6   : > { %v4943_v35 = vadd.f32 %v4942_v44, %v4941_v25  ;;  %v6767_v57 = vadd.f32 %v3140_v7, %v2980_v31 }
 0x2b7   : > { %v4944_v45 = vpop.f32.mrf.mxu0  ;;  %v5288_v0 = vpop.f32.mrf.mxu1 }
 0x2b8   : > { %v2983_v59 = vadd.f32 %v4943_v35, %v6684_v13 }
 0x2b9   : > { %v4945_v4 = vpop.f32.mrf.mxu0  ;;  %v3156_v62 = vpop.f32.mrf.mxu1 }
 0x2ba   : > { %v4946_v19 = vadd.f32 %v4945_v4, %v4944_v45  ;;  %v6770_v27 = vadd.f32 %v3143_v50, %v2983_v59 }
 0x2bb   : > { %v4947_v1 = vpop.f32.mrf.mxu0  ;;  %v5289_v20 = vpop.f32.mrf.mxu1 }
 0x2bc   : > { %v2988_v18 = vadd.f32 %v4946_v19, %v6686_v40 }
 0x2bd   : > { %v4948_v53 = vpop.f32.mrf.mxu0  ;;  %v3159_v17 = vpop.f32.mrf.mxu1 }
 0x2be   : > { %v4949_v54 = vadd.f32 %v4948_v53, %v4947_v1  ;;  %v6773_v61 = vadd.f32 %v5284_v49, %v2988_v18 }
 0x2bf   : > { %v4950_v63 = vpop.f32.mrf.mxu0  ;;  %v5292_v13 = vpop.f32.mrf.mxu1 }
 0x2c0   : > { %v2991_v58 = vadd.f32 %v4949_v54, %v6688_v41 }
 0x2c1   : > { %v4951_v9 = vpop.f32.mrf.mxu0  ;;  %v3172_v60 = vpop.f32.mrf.mxu1 }
 0x2c2   : > { %v4952_v10 = vadd.f32 %v4951_v9, %v4950_v63  ;;  %v6776_v11 = vadd.f32 %v5285_v43, %v2991_v58 }
 0x2c3   : > { %v4953_v24 = vpop.f32.mrf.mxu0  ;;  %v5293_v40 = vpop.f32.mrf.mxu1 }
 0x2c4   : > { %v2996_v39 = vadd.f32 %v4952_v10, %v6690_v46 }
 0x2c5   : > { %v4954_v30 = vpop.f32.mrf.mxu0  ;;  %v3175_v7 = vpop.f32.mrf.mxu1 }
 0x2c6   : > { %v4955_v34 = vadd.f32 %v4954_v30, %v4953_v24  ;;  %v6779_v25 = vadd.f32 %v3156_v62, %v2996_v39 }
 0x2c7   : > { %v4956_v49 = vpop.f32.mrf.mxu0  ;;  %v6782_v41 = vpop.f32.mrf.mxu1 }
 0x2c8   : > { %v2999_v31 = vadd.f32 %v4955_v34, %v6692_v23 }
 0x2c9   : > { %v4957_v44 = vpop.f32.mrf.mxu0  ;;  %v3188_v50 = vpop.f32.mrf.mxu1 }
 0x2ca   : > { %v4958_v35 = vadd.f32 %v4957_v44, %v4956_v49  ;;  %v6784_v45 = vadd.f32 %v3159_v17, %v2999_v31 }
 0x2cb   : > { %v4959_v43 = vpop.f32.mrf.mxu0  ;;  %v6787_v4 = vpop.f32.mrf.mxu1 }
 0x2cc   : > { %v3004_v59 = vadd.f32 %v4958_v35, %v6694_v47 }
 0x2cd   : > { %v4960_v46 = vpop.f32.mrf.mxu0  ;;  %v3191_v18 = vpop.f32.mrf.mxu1 }
 0x2ce   : > { %v4961_v19 = vadd.f32 %v4960_v46, %v4959_v43  ;;  %v6789_v1 = vadd.f32 %v5288_v0, %v3004_v59 }
 0x2cf   : > { %v4962_v62 = vpop.f32.mrf.mxu0  ;;  %v6792_v54 = vpop.f32.mrf.mxu1 }
 0x2d0   : > { %v3007_v23 = vadd.f32 %v4961_v19, %v6696_v22 }
 0x2d1   : > { %v4963_v53 = vpop.f32.mrf.mxu0  ;;  %v6796_v9 = vpop.f32.mrf.mxu1 }
 0x2d2   : > { %v4964_v63 = vadd.f32 %v4963_v53, %v4962_v62  ;;  %v6794_v17 = vadd.f32 %v5289_v20, %v3007_v23 }
 0x2d3   : > { %v4965_v58 = vpop.f32.mrf.mxu0  ;;  %v6799_v24 = vpop.f32.mrf.mxu1 }
 0x2d4   : > { %v3012_v47 = vadd.f32 %v4964_v63, %v6698_v37 }
 0x2d5   : > { %v4966_v10 = vpop.f32.mrf.mxu0  ;;  %v6803_v34 = vpop.f32.mrf.mxu1 }
 0x2d6   : > { %v4967_v0 = vadd.f32 %v4966_v10, %v4965_v58  ;;  %v6801_v39 = vadd.f32 %v3172_v60, %v3012_v47 }
 0x2d7   : > { %v4968_v30 = vpop.f32.mrf.mxu0  ;;  %v5038_v31 = vpop.f32.mrf.mxu1 }
 0x2d8   : > { %v3015_v22 = vadd.f32 %v4967_v0, %v6700_v51 }
 0x2d9   : > { %v4969_v49 = vpop.f32.mrf.mxu0  ;;  %v5039_v43 = vpop.f32.mrf.mxu1 }
 0x2da   : > { %v4970_v20 = vadd.f32 %v4969_v49, %v4968_v30  ;;  %v6806_v44 = vadd.f32 %v3175_v7, %v3015_v22  ;;  %v6809_v59 = vadd.f32 %v5039_v43, %v5038_v31 }
 0x2db   : > { %v4971_v35 = vpop.f32.mrf.mxu0  ;;  %v5041_v19 = vpop.f32.mrf.mxu1 }
 0x2dc   : > { %v3020_v37 = vadd.f32 %v4970_v20, %v6702_v32 }
 0x2dd   : > { %v4972_v46 = vpop.f32.mrf.mxu0  ;;  %v5042_v53 = vpop.f32.mrf.mxu1 }
 0x2de   : > { %v4973_v60 = vadd.f32 %v4972_v46, %v4971_v35  ;;  %v6811_v62 = vadd.f32 %v5292_v13, %v3020_v37  ;;  %v6814_v63 = vadd.f32 %v5042_v53, %v5041_v19 }
 0x2df   : > { %v4974_v23 = vpop.f32.mrf.mxu0  ;;  %v5044_v7 = vpop.f32.mrf.mxu1 }
 0x2e0   : > { %v3023_v51 = vadd.f32 %v4973_v60, %v6706_v5 }
 0x2e1   : > { %v4975_v58 = vpop.f32.mrf.mxu0  ;;  %v5045_v32 = vpop.f32.mrf.mxu1 }
 0x2e2   : > { %v4976_v47 = vadd.f32 %v4975_v58, %v4974_v23  ;;  %v6816_v10 = vadd.f32 %v5293_v40, %v3023_v51  ;;  %v5046_v22 = vadd.f32 %v5045_v32, %v5044_v7 }
 0x2e3   : > { %v4977_v0 = vpop.f32.mrf.mxu0  ;;  %v5047_v31 = vpop.f32.mrf.mxu1 }
 0x2e4   : > { %v3028_v30 = vadd.f32 %v4976_v47, %v6710_v16 }
 0x2e5   : > { %v4978_v49 = vpop.f32.mrf.mxu0  ;;  %v5048_v43 = vpop.f32.mrf.mxu1 }
 0x2e6   : > { %v4979_v13 = vadd.f32 %v4978_v49, %v4977_v0  ;;  %v6819_v20 = vadd.f32 %v3188_v50, %v3028_v30  ;;  %v5049_v37 = vadd.f32 %v5048_v43, %v5047_v31 }
 0x2e7   : > { %v4980_v35 = vpop.f32.mrf.mxu0  ;;  %v5050_v19 = vpop.f32.mrf.mxu1 }
 0x2e8   : > { %v3031_v5 = vadd.f32 %v4979_v13, %v6712_v56 }
 0x2e9   : > { %v4981_v46 = vpop.f32.mrf.mxu0  ;;  %v5051_v53 = vpop.f32.mrf.mxu1 }
 0x2ea   : > { %v4982_v60 = vadd.f32 %v4981_v46, %v4980_v35  ;;  %v6822_v40 = vadd.f32 %v3191_v18, %v3031_v5  ;;  %v6825_v51 = vadd.f32 %v5051_v53, %v5050_v19 }
 0x2eb   : > { %v4983_v23 = vpop.f32.mrf.mxu0  ;;  %v5053_v7 = vpop.f32.mrf.mxu1 }
 0x2ec   : > { %v3036_v16 = vadd.f32 %v4982_v60, %v6715_v42 }
 0x2ed   : > { %v4984_v58 = vpop.f32.mrf.mxu0  ;;  %v5054_v56 = vpop.f32.mrf.mxu1 }
 0x2ee   : > { %v4985_v50 = vadd.f32 %v4984_v58, %v4983_v23  ;;  %v6828_v47 = vadd.f32 %v6782_v41, %v3036_v16  ;;  %v6831_v30 = vadd.f32 %v5054_v56, %v5053_v7 }
 0x2ef   : > { %v4986_v0 = vpop.f32.mrf.mxu0  ;;  %v5056_v49 = vpop.f32.mrf.mxu1 }
 0x2f0   : > { %v3039_v32 = vadd.f32 %v4985_v50, %v6719_v48 }
 0x2f1   : > { %v4987_v18 = vpop.f32.mrf.mxu0  ;;  %v5057_v35 = vpop.f32.mrf.mxu1 }
 0x2f2   : > { %v4988_v31 = vadd.f32 %v4987_v18, %v4986_v0  ;;  %v6834_v13 = vadd.f32 %v6787_v4, %v3039_v32  ;;  %v5058_v5 = vadd.f32 %v5057_v35, %v5056_v49 }
 0x2f3   : > { %v4989_v42 = vpop.f32.mrf.mxu0  ;;  %v5059_v41 = vpop.f32.mrf.mxu1 }
 0x2f4   : > { %v3044_v43 = vadd.f32 %v4988_v31, %v6723_v3 }
 0x2f5   : > { %v4990_v46 = vpop.f32.mrf.mxu0  ;;  %v5060_v23 = vpop.f32.mrf.mxu1 }
 0x2f6   : > { %v4991_v19 = vadd.f32 %v4990_v46, %v4989_v42  ;;  %v6838_v60 = vadd.f32 %v6796_v9, %v3044_v43  ;;  %v5061_v16 = vadd.f32 %v5060_v23, %v5059_v41 }
 0x2f7   : > { %v4992_v48 = vpop.f32.mrf.mxu0  ;;  %v5062_v7 = vpop.f32.mrf.mxu1 }
 0x2f8   : > { %v3047_v53 = vadd.f32 %v4991_v19, %v6726_v14 }
 0x2f9   : > { %v4993_v58 = vpop.f32.mrf.mxu0  ;;  %v5063_v3 = vpop.f32.mrf.mxu1 }
 0x2fa   : > { %v4994_v4 = vadd.f32 %v4993_v58, %v4992_v48  ;;  %v6842_v50 = vadd.f32 %v6803_v34, %v3047_v53  ;;  %v5064_v32 = vadd.f32 %v5063_v3, %v5062_v7 }
 0x2fb   : > { %v4995_v0 = vpop.f32.mrf.mxu0  ;;  %v5065_v49 = vpop.f32.mrf.mxu1 }
 0x2fc   : > { %v3052_v56 = vadd.f32 %v4994_v4, %v6730_v52 }
 0x2fd   : > { %v4996_v18 = vpop.f32.mrf.mxu0  ;;  %v5066_v14 = vpop.f32.mrf.mxu1 }
 0x2fe   : > { %v6846_v9 = vadd.f32 %v6792_v54, %v3052_v56  ;;  %v4997_v31 = vadd.f32 %v4996_v18, %v4995_v0  ;;  %v5067_v46 = vadd.f32 %v5066_v14, %v5065_v49 }
 0x2ff   : > { %v5320_v42 = vpop.f32.mrf.mxu0  ;;  %v5068_v34 = vpop.f32.mrf.mxu1 }
 0x300   : > { %v3055_v35 = vadd.f32 %v4997_v31, %v6734_v8  ;;  %v3937_v43 = vadd.f32 %v5320_v42, %v5046_v22 }
 0x301   : > { %v3928_v41 = vpop.f32.mrf.mxu0  ;;  %v5069_v54 = vpop.f32.mrf.mxu1 }
 0x302   : > { %v6850_v19 = vadd.f32 %v6799_v24, %v3055_v35  ;;  %v3929_v52 = vadd.f32 %v6809_v59, %v3928_v41  ;;  %v6854_v48 = vadd.f32 %v3937_v43, %v6736_v12  ;;  %v5070_v7 = vadd.f32 %v5069_v54, %v5068_v34 }
 0x303   : > { %v5321_v23 = vpop.f32.mrf.mxu0  ;;  %v5071_v22 = vpop.f32.mrf.mxu1 }
 0x304   : > { %v6857_v53 = vadd.f32 %v3929_v52, %v6738_v26  ;;  %v3940_v58 = vadd.f32 %v5321_v23, %v5049_v37 }
 0x305   : > { %v3931_v8 = vpop.f32.mrf.mxu0  ;;  %v5072_v3 = vpop.f32.mrf.mxu1 }
 0x306   : > { %v3932_v4 = vadd.f32 %v6814_v63, %v3931_v8  ;;  %v6861_v0 = vadd.f32 %v3940_v58, %v6741_v21  ;;  %v5073_v56 = vadd.f32 %v5072_v3, %v5071_v22 }
 0x307   : > { %v5324_v24 = vpop.f32.mrf.mxu0  ;;  %v5074_v49 = vpop.f32.mrf.mxu1 }
 0x308   : > { %v6864_v59 = vadd.f32 %v3932_v4, %v6743_v29  ;;  %v3953_v12 = vadd.f32 %v5324_v24, %v5058_v5 }
 0x309   : > { %v3944_v18 = vpop.f32.mrf.mxu0  ;;  %v5075_v42 = vpop.f32.mrf.mxu1 }
 0x30a   : > { %v3945_v26 = vadd.f32 %v6825_v51, %v3944_v18  ;;  %v6868_v37 = vadd.f32 %v3953_v12, %v6746_v15  ;;  %v5076_v14 = vadd.f32 %v5075_v42, %v5074_v49 }
 0x30b   : > { %v5325_v31 = vpop.f32.mrf.mxu0  ;;  %v5077_v43 = vpop.f32.mrf.mxu1 }
 0x30c   : > { %v6871_v63 = vadd.f32 %v3945_v26, %v6748_v33  ;;  %v3956_v21 = vadd.f32 %v5325_v31, %v5061_v16 }
 0x30d   : > { %v3947_v35 = vpop.f32.mrf.mxu0  ;;  %v5078_v34 = vpop.f32.mrf.mxu1 }
 0x30e   : > { %v3948_v29 = vadd.f32 %v6831_v30, %v3947_v35  ;;  %v6875_v5 = vadd.f32 %v3956_v21, %v6751_v28  ;;  %v5079_v52 = vadd.f32 %v5078_v34, %v5077_v43 }
 0x30f   : > { %v5328_v41 = vpop.f32.mrf.mxu0  ;;  %v5080_v54 = vpop.f32.mrf.mxu1 }
 0x310   : > { %v6878_v51 = vadd.f32 %v3948_v29, %v6753_v38  ;;  %v3969_v15 = vadd.f32 %v5328_v41, %v5070_v7 }
 0x311   : > { %v3960_v23 = vpop.f32.mrf.mxu0  ;;  %v5081_v8 = vpop.f32.mrf.mxu1 }
 0x312   : > { %v3961_v33 = vadd.f32 %v5064_v32, %v3960_v23  ;;  %v6881_v16 = vadd.f32 %v3969_v15, %v6759_v55  ;;  %v5082_v22 = vadd.f32 %v5081_v8, %v5080_v54 }
 0x313   : > { %v5329_v58 = vpop.f32.mrf.mxu0  ;;  %v5083_v24 = vpop.f32.mrf.mxu1 }
 0x314   : > { %v6884_v30 = vadd.f32 %v3961_v33, %v6757_v2  ;;  %v3972_v28 = vadd.f32 %v5329_v58, %v5073_v56 }
 0x315   : > { %v3963_v4 = vpop.f32.mrf.mxu0  ;;  %v5084_v12 = vpop.f32.mrf.mxu1 }
 0x316   : > { %v3964_v3 = vadd.f32 %v5067_v46, %v3963_v4  ;;  %v6887_v38 = vadd.f32 %v3972_v28, %v6764_v6  ;;  %v5085_v18 = vadd.f32 %v5084_v12, %v5083_v24 }
 0x317   : > { %v5332_v7 = vpop.f32.mrf.mxu0  ;;  %v5086_v26 = vpop.f32.mrf.mxu1 }
 0x318   : > { %v6890_v32 = vadd.f32 %v3964_v3, %v6762_v36  ;;  %v3985_v55 = vadd.f32 %v5332_v7, %v5082_v22 }
 0x319   : > { %v3976_v49 = vpop.f32.mrf.mxu0  ;;  %v5087_v42 = vpop.f32.mrf.mxu1 }
 0x31a   : > { %v3977_v31 = vadd.f32 %v5076_v14, %v3976_v49  ;;  %v6893_v2 = vadd.f32 %v3985_v55, %v6773_v61  ;;  %v5088_v29 = vadd.f32 %v5087_v42, %v5086_v26  ;;  %v6907_v61 = vld [vmem:[%s7038_s4] ss:$0 sm:$0xff] }
 0x31b   : > { %v5333_v56 = vpop.f32.mrf.mxu0  ;;  %v5089_v35 = vpop.f32.mrf.mxu1  ;;  %v4095_v55 = vadd.f32 %v6907_v61, %v6864_v59 }
 0x31c   : > { %v6896_v46 = vadd.f32 %v3977_v31, %v6767_v57  ;;  %v3988_v6 = vadd.f32 %v5333_v56, %v5085_v18  ;;  %v4096_v18 = vadd.f32 %v6907_v61, %v6854_v48  ;;  %v4097_v48 = vadd.f32 %v6907_v61, %v6861_v0 }
 0x31d   : > { %v3979_v21 = vpop.f32.mrf.mxu0  ;;  %v5090_v34 = vpop.f32.mrf.mxu1 }
 0x31e   : > { %v3980_v43 = vadd.f32 %v5079_v52, %v3979_v21  ;;  %v6899_v36 = vadd.f32 %v3988_v6, %v6776_v11  ;;  %v5091_v54 = vadd.f32 %v5090_v34, %v5089_v35  ;;  %v4094_v11 = vadd.f32 %v6907_v61, %v6857_v53 }
 0x31f   : > { %v5336_v41 = vpop.f32.mrf.mxu0  ;;  %v5092_v15 = vpop.f32.mrf.mxu1  ;;  %v4128_v59 = vmax.f32 %v4096_v18, 0.0 }
 0x320   : > { %v6902_v14 = vadd.f32 %v3980_v43, %v6770_v27  ;;  %v4126_v12 = vmax.f32 %v4094_v11, 0.0 }
 0x321   : > { %v3992_v57 = vpop.f32.mrf.mxu0  ;;  %v5093_v52 = vpop.f32.mrf.mxu1 }
 0x322   : > { %v3993_v23 = vadd.f32 %v5088_v29, %v3992_v57  ;;  %v5094_v58 = vadd.f32 %v5093_v52, %v5092_v15  ;;  %v4127_v29 = vmax.f32 %v4095_v55, 0.0 }
 0x323   : > { %v5337_v33 = vpop.f32.mrf.mxu0  ;;  %v5095_v27 = vpop.f32.mrf.mxu1 }
 0x324   : > { %v4071_v8 = vadd.f32 %v3993_v23, %v6779_v25  ;;  %v4001_v4 = vadd.f32 %v5336_v41, %v5094_v58  ;;  %v4098_v58 = vadd.f32 %v6907_v61, %v6871_v63 }
 0x325   : > { %v3995_v28 = vpop.f32.mrf.mxu0  ;;  %v5096_v7 = vpop.f32.mrf.mxu1 }
 0x326   : > { %v3996_v22 = vadd.f32 %v5091_v54, %v3995_v28  ;;  %v4110_v24 = vadd.f32 %v6907_v61, %v4071_v8  ;;  %v4073_v49 = vadd.f32 %v4001_v4, %v6789_v1  ;;  %v5097_v25 = vadd.f32 %v5096_v7, %v5095_v27 }
 0x327   : > { %v5340_v3 = vpop.f32.mrf.mxu0  ;;  %v5098_v56 = vpop.f32.mrf.mxu1  ;;  %v4130_v55 = vmax.f32 %v4098_v58, 0.0 }
 0x328   : > { %v4072_v53 = vadd.f32 %v3996_v22, %v6784_v45  ;;  %v4142_v26 = vmax.f32 %v4110_v24, 0.0  ;;  %v4004_v42 = vadd.f32 %v5337_v33, %v5097_v25  ;;  %v4112_v35 = vadd.f32 %v6907_v61, %v4073_v49 }
 0x329   : > { %v4008_v31 = vpop.f32.mrf.mxu0  ;;  %v5099_v43 = vpop.f32.mrf.mxu1 }
 0x32a   : > { %v5422_v6 = vpack.i.bf16 %v4142_v26, %v4126_v12  ;;  %v4111_v21 = vadd.f32 %v6907_v61, %v4072_v53  ;;  %v4074_v45 = vadd.f32 %v4004_v42, %v6794_v17  ;;  %v5100_v1 = vadd.f32 %v5099_v43, %v5098_v56 }
 0x32b   : > { %v4144_v34 = vmax.f32 %v4112_v35, 0.0  ;;  %v5341_v57 = vpop.f32.mrf.mxu0  ;;  %v5101_v15 = vpop.f32.mrf.mxu1  ;;  %v4129_v17 = vmax.f32 %v4097_v48, 0.0 }
 0x32c   : > { %5423 = vxpose.xlu0.b32.start [1/16] (narrow) %v5422_v6, 64  ;;  %v4143_v41 = vmax.f32 %v4111_v21, 0.0  ;;  %v4009_v23 = vadd.f32 %v5100_v1, %v4008_v31  ;;  %v4113_v52 = vadd.f32 %v6907_v61, %v4074_v45  ;;  %v4100_v6 = vadd.f32 %v6907_v61, %v6868_v37 }
 0x32d   : > { %v5426_v33 = vpack.i.bf16 %v4144_v34, %v4128_v59  ;;  %v5102_v11 = vpop.f32.mrf.mxu1  ;;  %v4011_v27 = vpop.f32.mrf.mxu0 }
 0x32e   : > { %v5424_v54 = vpack.i.bf16 %v4143_v41, %v4127_v29  ;;  %v4075_v8 = vadd.f32 %v4009_v23, %v6801_v39  ;;  %v5103_v0 = vadd.f32 %v5102_v11, %v5101_v15  ;;  %v4145_v28 = vmax.f32 %v4113_v52, 0.0 }
 0x32f   : > { %v5104_v22 = vpop.f32.mrf.mxu1  ;;  %v4099_v39 = vadd.f32 %v6907_v61, %v6878_v51  ;;  %v5344_v63 = vpop.f32.mrf.mxu0  ;;  %v4132_v1 = vmax.f32 %v4100_v6, 0.0  ;;  %v4102_v11 = vadd.f32 %v6907_v61, %v6884_v30 }
 0x330   : > { %5425 = vxpose.xlu0.b32.cont [2/16] (narrow) %v5424_v54, 64  ;;  %v4012_v4 = vadd.f32 %v5103_v0, %v4011_v27  ;;  %v5428_v24 = vpack.i.bf16 %v4145_v28, %v4129_v17  ;;  %v4114_v7 = vadd.f32 %v6907_v61, %v4075_v8 }
 0x331   : > { %v5105_v12 = vpop.f32.mrf.mxu1  ;;  %v4131_v35 = vmax.f32 %v4099_v39, 0.0  ;;  %v4024_v29 = vpop.f32.mrf.mxu0 }
 0x332   : > { %v4076_v18 = vadd.f32 %v4012_v4, %v6806_v44  ;;  %v5106_v53 = vadd.f32 %v5105_v12, %v5104_v22  ;;  %v4146_v49 = vmax.f32 %v4114_v7, 0.0 }
 0x333   : > { %v5107_v25 = vpop.f32.mrf.mxu1  ;;  %v5345_v37 = vpop.f32.mrf.mxu0 }
 0x334   : > { %5427 = vxpose.xlu0.b32.cont [3/16] (narrow) %v5426_v33, 64  ;;  %v4017_v26 = vadd.f32 %v5340_v3, %v5106_v53  ;;  %v5430_v31 = vpack.i.bf16 %v4146_v49, %v4130_v55  ;;  %v4115_v56 = vadd.f32 %v6907_v61, %v4076_v18 }
 0x335   : > { %v5108_v42 = vpop.f32.mrf.mxu1  ;;  %v4027_v17 = vpop.f32.mrf.mxu0 }
 0x336   : > { %v4077_v21 = vadd.f32 %v4017_v26, %v6811_v62  ;;  %v5109_v44 = vadd.f32 %v5108_v42, %v5107_v25  ;;  %v4147_v43 = vmax.f32 %v4115_v56, 0.0  ;;  %v4101_v62 = vadd.f32 %v6907_v61, %v6875_v5 }
 0x337   : > { %v5110_v59 = vpop.f32.mrf.mxu1  ;;  %v5348_v18 = vpop.f32.mrf.mxu0  ;;  %v4104_v26 = vadd.f32 %v6907_v61, %v6881_v16 }
 0x338   : > { %5429 = vxpose.xlu0.b32.cont [4/16] (narrow) %v5428_v24, 64  ;;  %v4020_v48 = vadd.f32 %v5341_v57, %v5109_v44  ;;  %v5432_v51 = vpack.i.bf16 %v4147_v43, %v4131_v35  ;;  %v4116_v45 = vadd.f32 %v6907_v61, %v4077_v21  ;;  %v4133_v8 = vmax.f32 %v4101_v62, 0.0 }
 0x339   : > { %v5111_v3 = vpop.f32.mrf.mxu1  ;;  %v4134_v24 = vmax.f32 %v4102_v11, 0.0  ;;  %v4040_v6 = vpop.f32.mrf.mxu0  ;;  %v4136_v43 = vmax.f32 %v4104_v26, 0.0 }
 0x33a   : > { %v4078_v41 = vadd.f32 %v4020_v48, %v6816_v10  ;;  %v5112_v34 = vadd.f32 %v5111_v3, %v5110_v59  ;;  %v4148_v15 = vmax.f32 %v4116_v45, 0.0 }
 0x33b   : > { %v5113_v23 = vpop.f32.mrf.mxu1  ;;  %v5349_v16 = vpop.f32.mrf.mxu0 }
 0x33c   : > { %5431 = vxpose.xlu0.b32.cont [5/16] (narrow) %v5430_v31, 64  ;;  %v4025_v54 = vadd.f32 %v5112_v34, %v4024_v29  ;;  %v5434_v33 = vpack.i.bf16 %v4148_v15, %v4132_v1  ;;  %v4117_v52 = vadd.f32 %v6907_v61, %v4078_v41  ;;  %v4106_v34 = vadd.f32 %v6907_v61, %v6896_v46 }
 0x33d   : > { %v5114_v57 = vpop.f32.mrf.mxu1 }
 0x33e   : > { %v4079_v58 = vadd.f32 %v4025_v54, %v6819_v20  ;;  %v5115_v10 = vadd.f32 %v5114_v57, %v5113_v23  ;;  %v4149_v0 = vmax.f32 %v4117_v52, 0.0  ;;  %v4103_v20 = vadd.f32 %v6907_v61, %v6890_v32  ;;  %v4043_v23 = vpop.f32.mrf.mxu0 }
 0x33f   : > { %v5116_v28 = vpop.f32.mrf.mxu1  ;;  %v4138_v11 = vmax.f32 %v4106_v34, 0.0 }
 0x340   : > { %5433 = vxpose.xlu0.b32.cont [6/16] (narrow) %v5432_v51, 64  ;;  %v4028_v27 = vadd.f32 %v5115_v10, %v4027_v17  ;;  %v5436_v5 = vpack.i.bf16 %v4149_v0, %v4133_v8  ;;  %v4118_v22 = vadd.f32 %v6907_v61, %v4079_v58  ;;  %v4135_v56 = vmax.f32 %v4103_v20, 0.0 }
 0x341   : > { %v5117_v4 = vpop.f32.mrf.mxu1 }
 0x342   : > { %v4080_v7 = vadd.f32 %v4028_v27, %v6822_v40  ;;  %v5118_v12 = vadd.f32 %v5117_v4, %v5116_v28  ;;  %v4150_v55 = vmax.f32 %v4118_v22, 0.0 }
 0x343   : > { %v5119_v30 = vpop.f32.mrf.mxu1 }
 0x344   : > { %5435 = vxpose.xlu0.b32.cont [7/16] (narrow) %v5434_v33, 64  ;;  %v4033_v53 = vadd.f32 %v5344_v63, %v5118_v12  ;;  %v5438_v49 = vpack.i.bf16 %v4150_v55, %v4134_v24  ;;  %v4119_v39 = vadd.f32 %v6907_v61, %v4080_v7 }
 0x345   : > { %v5120_v25 = vpop.f32.mrf.mxu1 }
 0x346   : > { %v4081_v31 = vadd.f32 %v4033_v53, %v6828_v47  ;;  %v5121_v40 = vadd.f32 %v5120_v25, %v5119_v30  ;;  %v4151_v42 = vmax.f32 %v4119_v39, 0.0  ;;  %v4105_v47 = vadd.f32 %v6907_v61, %v6887_v38 }
 0x347   : > { %v5122_v21 = vpop.f32.mrf.mxu1 }
 0x348   : > { %5437 = vxpose.xlu0.b32.cont [8/16] (narrow) %v5436_v5, 64  ;;  %v4036_v44 = vadd.f32 %v5345_v37, %v5121_v40  ;;  %v5440_v32 = vpack.i.bf16 %v4151_v42, %v4135_v56  ;;  %v4120_v35 = vadd.f32 %v6907_v61, %v4081_v31  ;;  %v4137_v62 = vmax.f32 %v4105_v47, 0.0 }
 0x349   : > { %v5123_v63 = vpop.f32.mrf.mxu1  ;;  %v4108_v5 = vadd.f32 %v6907_v61, %v6893_v2 }
 0x34a   : > { %v4082_v29 = vadd.f32 %v4036_v44, %v6834_v13  ;;  %v5124_v59 = vadd.f32 %v5123_v63, %v5122_v21  ;;  %v4152_v48 = vmax.f32 %v4120_v35, 0.0 }
 0x34b   : > { %v5125_v51 = vpop.f32.mrf.mxu1  ;;  %v4140_v20 = vmax.f32 %v4108_v5, 0.0 }
 0x34c   : > { %5439 = vxpose.xlu0.b32.cont [9/16] (narrow) %v5438_v49, 64  ;;  %v4041_v45 = vadd.f32 %v5124_v59, %v4040_v6  ;;  %v5442_v3 = vpack.i.bf16 %v4152_v48, %v4136_v43  ;;  %v4121_v1 = vadd.f32 %v6907_v61, %v4082_v29 }
 0x34d   : > { %v5126_v41 = vpop.f32.mrf.mxu1 }
 0x34e   : > { %v4083_v15 = vadd.f32 %v4041_v45, %v6838_v60  ;;  %v5127_v13 = vadd.f32 %v5126_v41, %v5125_v51  ;;  %v4153_v37 = vmax.f32 %v4121_v1, 0.0  ;;  %v4107_v60 = vadd.f32 %v6907_v61, %v6902_v14 }
 0x34f   : > { %v5128_v54 = vpop.f32.mrf.mxu1 }
 0x350   : > { %5441 = vxpose.xlu0.b32.cont [10/16] (narrow) %v5440_v32, 64  ;;  %v4044_v33 = vadd.f32 %v5127_v13, %v4043_v23  ;;  %v5444_v38 = vpack.i.bf16 %v4153_v37, %v4137_v62  ;;  %v4122_v52 = vadd.f32 %v6907_v61, %v4083_v15 }
 0x351   : > { %v5129_v57 = vpop.f32.mrf.mxu1 }
 0x352   : > { %v4084_v58 = vadd.f32 %v4044_v33, %v6842_v50  ;;  %v5130_v10 = vadd.f32 %v5129_v57, %v5128_v54  ;;  %v4154_v8 = vmax.f32 %v4122_v52, 0.0  ;;  %v4139_v50 = vmax.f32 %v4107_v60, 0.0 }
 0x353   : > { %v5131_v46 = vpop.f32.mrf.mxu1 }
 0x354   : > { %5443 = vxpose.xlu0.b32.cont [11/16] (narrow) %v5442_v3, 64  ;;  %v4049_v0 = vadd.f32 %v5348_v18, %v5130_v10  ;;  %v5446_v17 = vpack.i.bf16 %v4154_v8, %v4138_v11  ;;  %v4123_v28 = vadd.f32 %v6907_v61, %v4084_v58  ;;  %v4109_v18 = vadd.f32 %v6907_v61, %v6899_v36 }
 0x355   : > { %v5132_v27 = vpop.f32.mrf.mxu1 }
 0x356   : > { %v4085_v22 = vadd.f32 %v4049_v0, %v6846_v9  ;;  %v5133_v4 = vadd.f32 %v5132_v27, %v5131_v46  ;;  %v4155_v24 = vmax.f32 %v4123_v28, 0.0  ;;  %v4141_v53 = vmax.f32 %v4109_v18, 0.0 }
 0x358   : > { %5445 = vxpose.xlu0.b32.cont [12/16] (narrow) %v5444_v38, 64  ;;  %v4052_v7 = vadd.f32 %v5349_v16, %v5133_v4  ;;  %v5448_v12 = vpack.i.bf16 %v4155_v24, %v4139_v50  ;;  %v4124_v14 = vadd.f32 %v6907_v61, %v4085_v22 }
 0x35a   : > { %v4086_v55 = vadd.f32 %v4052_v7, %v6850_v19  ;;  %v4156_v30 = vmax.f32 %v4124_v14, 0.0 }
 0x35c   : > { %5447 = vxpose.xlu0.b32.cont [13/16] (narrow) %v5446_v17, 64  ;;  %v5450_v2 = vpack.i.bf16 %v4156_v30, %v4140_v20  ;;  %v4125_v9 = vadd.f32 %v6907_v61, %v4086_v55 }
 0x35e   : > { %v4157_v49 = vmax.f32 %v4125_v9, 0.0 }
 0x360   : > { %5449 = vxpose.xlu0.b32.cont [14/16] (narrow) %v5448_v12, 64  ;;  %v5452_v39 = vpack.i.bf16 %v4157_v49, %v4141_v53 }
 0x364   : > { %5451 = vxpose.xlu0.b32.cont [15/16] (narrow) %v5450_v2, 64 }
 0x368   : > { %5453 = vxpose.xlu0.b32.end [16/16] (narrow) %v5452_v39, 64 }
 0x3a8   : > { %v5454_v25 = vpop.trf.xlu0 }
 0x3a9   : > { %v5458_v26 = vunpack.i.h.bf16 %v5454_v25  ;;  %v5455_v31 = vunpack.i.l.bf16 %v5454_v25 }
 0x3ab   : > { %v4717_v19 = vpack.c.bf16 %v5458_v26, %v5455_v31 }
 0x3ac   : > { %v5459_v40 = vpop.trf.xlu0 }
 0x3ad   : > { %4270 = vst [vmem:[%s6974_s7] sm:$0xff] %v4717_v19  ;;  %v5463_v36 = vunpack.i.h.bf16 %v5459_v40  ;;  %v5460_v61 = vunpack.i.l.bf16 %v5459_v40 }
 0x3af   : > { %v4718_v56 = vpack.c.bf16 %v5463_v36, %v5460_v61 }
 0x3b0   : > { %v5464_v42 = vpop.trf.xlu0 }
 0x3b1   : > { %4271 = vst [vmem:[%s6974_s7 + $0x8] sm:$0xff] %v4718_v56  ;;  %v5468_v6 = vunpack.i.h.bf16 %v5464_v42  ;;  %v5465_v21 = vunpack.i.l.bf16 %v5464_v42 }
 0x3b3   : > { %v4719_v44 = vpack.c.bf16 %v5468_v6, %v5465_v21 }
 0x3b4   : > { %v5469_v32 = vpop.trf.xlu0 }
 0x3b5   : > { %4272 = vst [vmem:[%s6974_s7 + $0x10] sm:$0xff] %v4719_v44  ;;  %v5473_v35 = vunpack.i.h.bf16 %v5469_v32  ;;  %v5470_v63 = vunpack.i.l.bf16 %v5469_v32 }
 0x3b7   : > { %v4720_v43 = vpack.c.bf16 %v5473_v35, %v5470_v63 }
 0x3b8   : > { %v5474_v29 = vpop.trf.xlu0 }
 0x3b9   : > { %4273 = vst [vmem:[%s6974_s7 + $0x18] sm:$0xff] %v4720_v43  ;;  %v5478_v59 = vunpack.i.h.bf16 %v5474_v29  ;;  %v5475_v48 = vunpack.i.l.bf16 %v5474_v29 }
 0x3bb   : > { %v4721_v47 = vpack.c.bf16 %v5478_v59, %v5475_v48 }
 0x3bc   : > { %v5479_v16 = vpop.trf.xlu0 }
 0x3bd   : > { %4274 = vst [vmem:[%s6974_s7 + $0x20] sm:$0xff] %v4721_v47  ;;  %v5483_v51 = vunpack.i.h.bf16 %v5479_v16  ;;  %v5480_v45 = vunpack.i.l.bf16 %v5479_v16 }
 0x3bf   : > { %v4722_v3 = vpack.c.bf16 %v5483_v51, %v5480_v45 }
 0x3c0   : > { %v5484_v1 = vpop.trf.xlu0 }
 0x3c1   : > { %4275 = vst [vmem:[%s6974_s7 + $0x28] sm:$0xff] %v4722_v3  ;;  %v5488_v41 = vunpack.i.h.bf16 %v5484_v1  ;;  %v5485_v34 = vunpack.i.l.bf16 %v5484_v1 }
 0x3c3   : > { %v4723_v15 = vpack.c.bf16 %v5488_v41, %v5485_v34 }
 0x3c4   : > { %v5489_v13 = vpop.trf.xlu0 }
 0x3c5   : > { %4276 = vst [vmem:[%s6974_s7 + $0x30] sm:$0xff] %v4723_v15  ;;  %v5493_v62 = vunpack.i.h.bf16 %v5489_v13  ;;  %v5490_v37 = vunpack.i.l.bf16 %v5489_v13 }
 0x3c7   : > { %v4724_v23 = vpack.c.bf16 %v5493_v62, %v5490_v37 }
 0x3c9   : > { %4277 = vst [vmem:[%s6974_s7 + $0x38] sm:$0xff] %v4724_v23 }
 0x3ca   : > { %5835 = shalt.err (!%p5832_p3)
}
 0x3cb   : > { %s5836_s9 = scalar_lea.hbm %s6988_s8, 1024  ;;  %s5840_s13 = scalar_lea.hbm %s7039_s5, 2048 }
 0x3cc   : > { %p5837_p11 = scmp.ne.s32.totalorder %s6988_s8, %s5836_s9  ;;  %p5841_p4 = scmp.lt.s32.totalorder %s6988_s8, %s7039_s5 }
 0x3cd   : > { %p5842_p6 = scmp.lt.s32.totalorder %s5840_s13, %s5836_s9 }
 0x3ce   : > { %p5838_p9 = pnand %p5837_p11, %p7068_p2 }
 0x3cf   : > { %p5843_p8 = por %p5842_p6, %p5841_p4 }
 0x3d0   : > { %p5839_p1 = pneg %p5838_p9 }
 0x3d2   : > { %p5844_p5 = pnand %p5843_p8, %p5839_p1 }
 0x3d4   : > { %5847 = shalt.err (!%p5844_p5)
}
 0x3d5   : > { %s5899_s28 = smov 128   ;;  %s5900_s17 = smov 8  }
 0x3d6   : > { %5360 = dma.vmem_to_hbm [thread:$0]  (%p7068_p2), %s6990_s11, 1024, %s6988_s8, %s4279_s29, %s5899_s28, %s5899_s28, %s5900_s17  }
 0x3d7 PF: > { %s4307_s16 = sand.u32 1, %s5878_s18   ;;  %p7069_p7 = scmp.ne.s32.totalorder %s7046_s25, 0 }
 0x3d8   : > { %p7070_p12 = scmp.ge.s32.totalorder %s5890_s21, 2  ;;  %s4308_s6 = scalar_lea.sflag [#allocation5], %s4307_s16 }
 0x3da   : > { %p5374_p13 = pnand %p7070_p12, %p7069_p7 }
 0x3dc   : > { %p5375_p0 = pneg %p5374_p13 }
 0x3de   : > { %5873 = dma.done.wait (%p5375_p0), %s4308_s6, 1024  }
 0x3df   : > { %5875 = vsyncadd (%p5375_p0), %s4308_s6, 4294966272  ;;  %p19_p10 = scmp.ge.s32.totalorder %s6009_s15, 4   ;;  %s7071_s18 = smov %s5882_s19 }
 0x3e0   : > { %s7072_s19 = smov %s5886_s20  ;;  %s7073_s20 = smov %s6025_s27 }
 0x3e1   : > { %s7074_s21 = smov %s6009_s15  ;;  %21 = sbr.rel (!%p19_p10) target bundleno = 6 (0x6), region = 98 }
 0x3e6   :  { %4313 = vsyncpa [#allocation4], 1 }
 0x3e7   :  { %4315 = vsyncpa [#allocation4 + $0x1], 1 }
 0x3e8   :  { %4316 = vsyncpa [#allocation7], 1 }
 0x3e9   :  { %4317 = vsyncpa [#allocation5], 1 }
 0x3ea   :  { %4319 = vsyncpa [#allocation5 + $0x1], 1 }

</bundles_post_ra>
